<compile_context>
chip_gen: v7x
topology: tpu7x:2x2x1
jax: 0.10.0
libtpu: 0.0.40
codegen_flags: <defaults>
</compile_context>

<pallas_src>
import functools

import jax
import jax.numpy as jnp
import numpy as np
from jax import lax
from jax.experimental import pallas as pl
from jax.experimental.pallas import tpu as pltpu


def _bilstm_kernel(
    cols_ref,     # (T*G, 1) int32   gather column per fused row (fwd t | bwd T-1-t | pad)
    table_ref,    # (2V, 4H) f32     [emb @ Wih_f + b_f ; emb @ Wih_b + b_b]
    whh_ref,      # (H, 8H)  bf16    [Whh_f | Whh_b]
    out_ref,      # (B, T, 2H) f32   batch-first output, [:, :, :H]=fwd, [:, :, H:]=bwd
    h_last_ref,   # (2, B, H) f32    final hidden (0=fwd, 1=bwd) -- nn.LSTM convention
    c_last_ref,   # (2, B, H) f32    final cell
    xg_ref,       # VMEM scratch (T*G, 4H) f32: hoisted x-gates in fused per-step layout
    *, batch, seq_len, hidden_dim, group, table_rows,
):
    B, T, H, G = batch, seq_len, hidden_dim, group
    R = T * G

    # In-kernel embedding gather + input projection + bias: one-hot rows select rows of the
    # pre-projected table (exact f32 gather; the matmul is tiny: (R, 2V) @ (2V, 4H)).
    col_iota = lax.broadcasted_iota(jnp.int32, (R, table_rows), 1)
    onehot = (col_iota == cols_ref[...]).astype(jnp.float32)
    xg_ref[...] = jnp.dot(onehot, table_ref[...], preferred_element_type=jnp.float32)

    whh = whh_ref[...]                                                  # (H, 8H) bf16
    fwd_rows = lax.broadcasted_iota(jnp.int32, (G, 4 * H), 0) < B      # hoisted row mask

    def sig(x):  # sigmoid as a single EUP tanh + cheap VPU ops
        return 0.5 * jnp.tanh(0.5 * x) + 0.5

    # Fused per-direction state: rows 0:B forward, rows B:2B backward, rows 2B:G padding.
    h_cat = jnp.zeros((G, H), jnp.float32)
    c_cat = jnp.zeros((G, H), jnp.float32)
    h_steps = []

    # T is small & static here: fully unrolled recurrence, all ref indices static.
    # TODO(synk): for long T/B, tile the time axis (fori_loop + pl.ds over xg) and budget VMEM
    # for v7x's smaller 64 MiB via pltpu.CompilerParams(vmem_limit_bytes=...).
    for t in range(T):
        x_gates = xg_ref[G * t:G * (t + 1), :]                          # (G, 4H) aligned slice
        gp = jnp.dot(h_cat.astype(jnp.bfloat16), whh,
                     preferred_element_type=jnp.float32)                # one fused MXU matmul
        gates = x_gates + jnp.where(fwd_rows, gp[:, 0:4 * H], gp[:, 4 * H:8 * H])
        # PyTorch gate order: i, f, g, o; H % 128 == 0 keeps every slice lane-aligned.
        i = sig(gates[:, 0 * H:1 * H])
        f = sig(gates[:, 1 * H:2 * H])
        g = jnp.tanh(gates[:, 2 * H:3 * H])
        o = sig(gates[:, 3 * H:4 * H])
        c_cat = f * c_cat + i * g
        h_cat = o * jnp.tanh(c_cat)
        h_steps.append(h_cat)

    # One dense batch-first output store after the loop (no per-step masked vst in the loop).
    fwd = jnp.stack([h_steps[t][0:B, :] for t in range(T)], axis=1)              # (B, T, H)
    bwd = jnp.stack([h_steps[T - 1 - t][B:2 * B, :] for t in range(T)], axis=1)  # (B, T, H)
    out_ref[...] = jnp.concatenate([fwd, bwd], axis=2)

    # Final states written once (forward=0, backward=1), matching nn.LSTM(bidirectional=True).
    h_last_ref[0] = h_steps[-1][0:B, :]
    h_last_ref[1] = h_steps[-1][B:2 * B, :]
    c_last_ref[0] = c_cat[0:B, :]
    c_last_ref[1] = c_cat[B:2 * B, :]


def prepare_encoder_params(params):
    """One-time packing, outside the per-call path (per perf review).

    Folds the embedding table through the input weights/biases (pure reparameterization of the
    linear ops) and packs both directions' recurrent weights as bf16.
    """
    hp = lax.Precision.HIGHEST
    emb = params["embedding"].astype(jnp.float32)
    table_f = jnp.dot(emb, params["wih_f"], precision=hp) + params["b_f"]   # (V, 4H)
    table_b = jnp.dot(emb, params["wih_b"], precision=hp) + params["b_b"]   # (V, 4H)
    return {
        "table_proj": jnp.concatenate([table_f, table_b], axis=0),          # (2V, 4H) f32
        "whh": jnp.concatenate([params["whh_f"], params["whh_b"]],
                               axis=1).astype(jnp.bfloat16),                 # (H, 8H) bf16
    }


@jax.jit
def encoder_forward(x_ids, enc):
    """Mirrors Encoder.forward: embedded = embedding(x); output, hidden = lstm(embedded).

    Returns:
      output: (B, T, 2*H) float32  (batch-first, features = [fwd ; bwd])
      hidden: (h, c), each (2, B, H) float32  (index 0 = forward, 1 = backward)
    """
    table_proj, whh = enc["table_proj"], enc["whh"]
    V = table_proj.shape[0] // 2
    H = whh.shape[0]
    B, T = x_ids.shape
    G = ((2 * B + 7) // 8) * 8          # fused rows per step (fwd B + bwd B, padded to sublanes)

    # Tiny int32 index plumbing only (T*G values): fused row order per step t is
    # [fwd tokens at time t | bwd tokens at time T-1-t | pad]; bwd indexes table rows V:2V.
    ids_tm = x_ids.T.astype(jnp.int32)                                  # (T, B)
    cols = jnp.concatenate(
        [ids_tm, ids_tm[::-1, :] + V, jnp.zeros((T, G - 2 * B), jnp.int32)], axis=1)
    cols = cols.reshape(T * G, 1)

    kernel = functools.partial(_bilstm_kernel, batch=B, seq_len=T, hidden_dim=H,
                               group=G, table_rows=table_proj.shape[0])
    vmem = pl.BlockSpec(memory_space=pltpu.MemorySpace.VMEM)

    output, h_last, c_last = pl.pallas_call(
        kernel,
        out_shape=(
            jax.ShapeDtypeStruct((B, T, 2 * H), jnp.float32),
            jax.ShapeDtypeStruct((2, B, H), jnp.float32),
            jax.ShapeDtypeStruct((2, B, H), jnp.float32),
        ),
        in_specs=[vmem, vmem, vmem],
        out_specs=(vmem, vmem, vmem),
        scratch_shapes=[pltpu.VMEM((T * G, 4 * H), jnp.float32)],
    )(cols, table_proj, whh)
    # TODO(synk): on v7x, split the two directions across the 2 TensorCores (grid=(2,) with
    # dimension_semantics=("parallel",)); on v5e/v6e (1 TC) that only adds grid overhead.
    return output, (h_last, c_last)


# ------------------------- plain-JAX f32 reference (for sanity check) -------------------------
def _lstm_cell_ref(x, h, c, Wih, Whh, b, H):
    hp = lax.Precision.HIGHEST
    gates = (jnp.dot(x, Wih, preferred_element_type=jnp.float32, precision=hp)
             + jnp.dot(h, Whh, preferred_element_type=jnp.float32, precision=hp) + b)
    i = jax.nn.sigmoid(gates[:, 0 * H:1 * H])
    f = jax.nn.sigmoid(gates[:, 1 * H:2 * H])
    g = jnp.tanh(gates[:, 2 * H:3 * H])
    o = jax.nn.sigmoid(gates[:, 3 * H:4 * H])
    c_new = f * c + i * g
    h_new = o * jnp.tanh(c_new)
    return h_new, c_new


def _lstm_scan_ref(emb_tm, Wih, Whh, b, H):
    B = emb_tm.shape[1]
    h0 = jnp.zeros((B, H), jnp.float32)
    c0 = jnp.zeros((B, H), jnp.float32)

    def step(carry, x):
        h, c = carry
        h, c = _lstm_cell_ref(x, h, c, Wih, Whh, b, H)
        return (h, c), h

    (h, c), ys = lax.scan(step, (h0, c0), emb_tm)
    return ys, h, c


def encoder_forward_ref(x_ids, params):
    emb_table = params["embedding"]
    H = params["whh_f"].shape[0]
    emb = jnp.transpose(emb_table[x_ids], (1, 0, 2)).astype(jnp.float32)  # (T, B, E)
    ys_f, h_f, c_f = _lstm_scan_ref(emb, params["wih_f"], params["whh_f"], params["b_f"], H)
    ys_b, h_b, c_b = _lstm_scan_ref(emb[::-1], params["wih_b"], params["whh_b"], params["b_b"], H)
    ys_b = ys_b[::-1]
    output = jnp.concatenate(
        [jnp.transpose(ys_f, (1, 0, 2)), jnp.transpose(ys_b, (1, 0, 2))], axis=-1)
    h = jnp.stack([h_f, h_b], axis=0)
    c = jnp.stack([c_f, c_b], axis=0)
    return output, (h, c)


def init_params(key, input_dim, embedding_dim, hidden_dim):
    ks = jax.random.split(key, 9)
    bound = 1.0 / np.sqrt(hidden_dim)
    u = lambda k, shape: jax.random.uniform(k, shape, jnp.float32, -bound, bound)
    # Weights stored transposed relative to PyTorch ((4H, E) -> (E, 4H)) for x @ W.
    return {
        "embedding": jax.random.normal(ks[0], (input_dim, embedding_dim), jnp.float32),
        "wih_f": u(ks[1], (embedding_dim, 4 * hidden_dim)),
        "whh_f": u(ks[2], (hidden_dim, 4 * hidden_dim)),
        "b_f": u(ks[3], (1, 4 * hidden_dim)) + u(ks[4], (1, 4 * hidden_dim)),  # b_ih + b_hh
        "wih_b": u(ks[5], (embedding_dim, 4 * hidden_dim)),
        "whh_b": u(ks[6], (hidden_dim, 4 * hidden_dim)),
        "b_b": u(ks[7], (1, 4 * hidden_dim)) + u(ks[8], (1, 4 * hidden_dim)),
    }


if __name__ == "__main__":
    INPUT_DIM = 32       # vocab size (module uses len(vocab); small here)
    EMBEDDING_DIM = 32   # module sets EMBEDDING_DIM = len(vocab)
    HIDDEN_DIM = 128     # matches the module's HIDDEN_DIM; lane-aligned gate slices
    B, T = 2, 8

    key = jax.random.PRNGKey(0)
    k_param, k_tok = jax.random.split(key)
    params = init_params(k_param, INPUT_DIM, EMBEDDING_DIM, HIDDEN_DIM)
    enc = prepare_encoder_params(params)            # one-time packing, outside per-call path
    x_ids = jax.random.randint(k_tok, (B, T), 0, INPUT_DIM, dtype=jnp.int32)

    out, (h, c) = jax.block_until_ready(encoder_forward(x_ids, enc))
    out_ref, (h_ref, c_ref) = jax.block_until_ready(encoder_forward_ref(x_ids, params))

    # Kernel uses bf16 recurrent-matmul operands with f32 accumulation (per perf review);
    # the pure-f32 reference therefore differs at the ~1e-2 level, well inside these tolerances.
    np.testing.assert_allclose(np.asarray(out), np.asarray(out_ref), rtol=5e-2, atol=5e-2)
    np.testing.assert_allclose(np.asarray(h), np.asarray(h_ref), rtol=5e-2, atol=5e-2)
    np.testing.assert_allclose(np.asarray(c), np.asarray(c_ref), rtol=5e-2, atol=5e-2)

    assert out.shape == (B, T, 2 * HIDDEN_DIM)
    assert h.shape == (2, B, HIDDEN_DIM) and c.shape == (2, B, HIDDEN_DIM)
    print("KERNEL_OK")
</pallas_src>

<mosaic_0001>
module attributes {stable_mosaic.version = 11 : i64} {
  func.func @_bilstm_kernel(%arg0: memref<64x1xi32, #tpu.memory_space<vmem>>, %arg1: memref<64x512xf32, #tpu.memory_space<vmem>>, %arg2: memref<128x1024xbf16, #tpu.memory_space<vmem>>, %arg3: memref<2x8x256xf32, #tpu.memory_space<vmem>>, %arg4: memref<2x2x128xf32, #tpu.memory_space<vmem>>, %arg5: memref<2x2x128xf32, #tpu.memory_space<vmem>>, %arg6: memref<64x512xf32, #tpu.memory_space<vmem>>) attributes {dimension_semantics = [], scalar_prefetch = 0 : i64, scratch_operands = 1 : i64, tpu.core_type = #tpu.core_type<tc>} {
    %0 = tpu.iota {dimensions = array<i32: 1>} : vector<64x64xi32>
    %c0 = arith.constant 0 : index
    %c0_0 = arith.constant 0 : index
    %1 = vector.load %arg0[%c0, %c0_0] : memref<64x1xi32, #tpu.memory_space<vmem>>, vector<64x1xi32>
    %2 = vector.broadcast %1 : vector<64x1xi32> to vector<64x64xi32>
    %3 = arith.cmpi eq, %0, %2 : vector<64x64xi32>
    %4 = arith.extui %3 : vector<64x64xi1> to vector<64x64xi32>
    %5 = arith.sitofp %4 : vector<64x64xi32> to vector<64x64xf32>
    %c0_1 = arith.constant 0 : index
    %c0_2 = arith.constant 0 : index
    %6 = vector.load %arg1[%c0_1, %c0_2] : memref<64x512xf32, #tpu.memory_space<vmem>>, vector<64x512xf32>
    %cst = arith.constant dense<0.000000e+00> : vector<64x512xf32>
    %7 = tpu.matmul %5, %6, %cst {dimension_numbers = #tpu.dot_dimension_numbers<[1], [0], [0], [1], [0, 0, 1, 1], [], []>} : vector<64x64xf32>, vector<64x512xf32>, vector<64x512xf32> -> vector<64x512xf32>
    %c0_3 = arith.constant 0 : index
    %c0_4 = arith.constant 0 : index
    %8 = vector.load %arg6[%c0_3, %c0_4] : memref<64x512xf32, #tpu.memory_space<vmem>>, vector<64x512xf32>
    tpu.vector_store %arg6[%c0_3, %c0_4], %7 {strides = array<i32>} : memref<64x512xf32, #tpu.memory_space<vmem>>, vector<64x512xf32>,
    %c0_5 = arith.constant 0 : index
    %c0_6 = arith.constant 0 : index
    %9 = vector.load %arg2[%c0_5, %c0_6] : memref<128x1024xbf16, #tpu.memory_space<vmem>>, vector<128x1024xbf16>
    %10 = tpu.iota {dimensions = array<i32: 0>} : vector<8x512xi32>
    %c2_i32 = arith.constant 2 : i32
    %11 = vector.broadcast %c2_i32 : i32 to vector<8x512xi32>
    %12 = arith.cmpi slt, %10, %11 : vector<8x512xi32>
    %cst_7 = arith.constant 0.000000e+00 : f32
    %13 = vector.broadcast %cst_7 : f32 to vector<8x128xf32>
    %cst_8 = arith.constant 0.000000e+00 : f32
    %14 = vector.broadcast %cst_8 : f32 to vector<8x128xf32>
    %c0_9 = arith.constant 0 : index
    %c0_10 = arith.constant 0 : index
    %15 = vector.load %arg6[%c0_9, %c0_10] : memref<64x512xf32, #tpu.memory_space<vmem>>, vector<8x512xf32>
    %16 = arith.truncf %13 : vector<8x128xf32> to vector<8x128xbf16>
    %cst_11 = arith.constant dense<0.000000e+00> : vector<8x1024xf32>
    %17 = tpu.matmul %16, %9, %cst_11 {dimension_numbers = #tpu.dot_dimension_numbers<[1], [0], [0], [1], [0, 0, 1, 1], [], []>} : vector<8x128xbf16>, vector<128x1024xbf16>, vector<8x1024xf32> -> vector<8x1024xf32>
    %18 = vector.extract_strided_slice %17 {offsets = [0, 0], sizes = [8, 512], strides = [1, 1]} : vector<8x1024xf32> to vector<8x512xf32>
    %19 = vector.extract_strided_slice %17 {offsets = [0, 512], sizes = [8, 512], strides = [1, 1]} : vector<8x1024xf32> to vector<8x512xf32>
    %20 = arith.select %12, %18, %19 : vector<8x512xi1>, vector<8x512xf32>
    %21 = arith.addf %15, %20 : vector<8x512xf32>
    %22 = vector.extract_strided_slice %21 {offsets = [0, 0], sizes = [8, 128], strides = [1, 1]} : vector<8x512xf32> to vector<8x128xf32>
    %cst_12 = arith.constant 5.000000e-01 : f32
    %23 = vector.broadcast %cst_12 : f32 to vector<8x128xf32>
    %24 = arith.mulf %23, %22 : vector<8x128xf32>
    %25 = math.tanh %24 : vector<8x128xf32>
    %cst_13 = arith.constant 5.000000e-01 : f32
    %26 = vector.broadcast %cst_13 : f32 to vector<8x128xf32>
    %27 = arith.mulf %26, %25 : vector<8x128xf32>
    %cst_14 = arith.constant 5.000000e-01 : f32
    %28 = vector.broadcast %cst_14 : f32 to vector<8x128xf32>
    %29 = arith.addf %27, %28 : vector<8x128xf32>
    %30 = vector.extract_strided_slice %21 {offsets = [0, 128], sizes = [8, 128], strides = [1, 1]} : vector<8x512xf32> to vector<8x128xf32>
    %cst_15 = arith.constant 5.000000e-01 : f32
    %31 = vector.broadcast %cst_15 : f32 to vector<8x128xf32>
    %32 = arith.mulf %31, %30 : vector<8x128xf32>
    %33 = math.tanh %32 : vector<8x128xf32>
    %cst_16 = arith.constant 5.000000e-01 : f32
    %34 = vector.broadcast %cst_16 : f32 to vector<8x128xf32>
    %35 = arith.mulf %34, %33 : vector<8x128xf32>
    %cst_17 = arith.constant 5.000000e-01 : f32
    %36 = vector.broadcast %cst_17 : f32 to vector<8x128xf32>
    %37 = arith.addf %35, %36 : vector<8x128xf32>
    %38 = vector.extract_strided_slice %21 {offsets = [0, 256], sizes = [8, 128], strides = [1, 1]} : vector<8x512xf32> to vector<8x128xf32>
    %39 = math.tanh %38 : vector<8x128xf32>
    %40 = vector.extract_strided_slice %21 {offsets = [0, 384], sizes = [8, 128], strides = [1, 1]} : vector<8x512xf32> to vector<8x128xf32>
    %cst_18 = arith.constant 5.000000e-01 : f32
    %41 = vector.broadcast %cst_18 : f32 to vector<8x128xf32>
    %42 = arith.mulf %41, %40 : vector<8x128xf32>
    %43 = math.tanh %42 : vector<8x128xf32>
    %cst_19 = arith.constant 5.000000e-01 : f32
    %44 = vector.broadcast %cst_19 : f32 to vector<8x128xf32>
    %45 = arith.mulf %44, %43 : vector<8x128xf32>
    %cst_20 = arith.constant 5.000000e-01 : f32
    %46 = vector.broadcast %cst_20 : f32 to vector<8x128xf32>
    %47 = arith.addf %45, %46 : vector<8x128xf32>
    %48 = arith.mulf %37, %14 : vector<8x128xf32>
    %49 = arith.mulf %29, %39 : vector<8x128xf32>
    %50 = arith.addf %48, %49 : vector<8x128xf32>
    %51 = math.tanh %50 : vector<8x128xf32>
    %52 = arith.mulf %47, %51 : vector<8x128xf32>
    %c8 = arith.constant 8 : index
    %c0_21 = arith.constant 0 : index
    %53 = vector.load %arg6[%c8, %c0_21] : memref<64x512xf32, #tpu.memory_space<vmem>>, vector<8x512xf32>
    %54 = arith.truncf %52 : vector<8x128xf32> to vector<8x128xbf16>
    %cst_22 = arith.constant dense<0.000000e+00> : vector<8x1024xf32>
    %55 = tpu.matmul %54, %9, %cst_22 {dimension_numbers = #tpu.dot_dimension_numbers<[1], [0], [0], [1], [0, 0, 1, 1], [], []>} : vector<8x128xbf16>, vector<128x1024xbf16>, vector<8x1024xf32> -> vector<8x1024xf32>
    %56 = vector.extract_strided_slice %55 {offsets = [0, 0], sizes = [8, 512], strides = [1, 1]} : vector<8x1024xf32> to vector<8x512xf32>
    %57 = vector.extract_strided_slice %55 {offsets = [0, 512], sizes = [8, 512], strides = [1, 1]} : vector<8x1024xf32> to vector<8x512xf32>
    %58 = arith.select %12, %56, %57 : vector<8x512xi1>, vector<8x512xf32>
    %59 = arith.addf %53, %58 : vector<8x512xf32>
    %60 = vector.extract_strided_slice %59 {offsets = [0, 0], sizes = [8, 128], strides = [1, 1]} : vector<8x512xf32> to vector<8x128xf32>
    %cst_23 = arith.constant 5.000000e-01 : f32
    %61 = vector.broadcast %cst_23 : f32 to vector<8x128xf32>
    %62 = arith.mulf %61, %60 : vector<8x128xf32>
    %63 = math.tanh %62 : vector<8x128xf32>
    %cst_24 = arith.constant 5.000000e-01 : f32
    %64 = vector.broadcast %cst_24 : f32 to vector<8x128xf32>
    %65 = arith.mulf %64, %63 : vector<8x128xf32>
    %cst_25 = arith.constant 5.000000e-01 : f32
    %66 = vector.broadcast %cst_25 : f32 to vector<8x128xf32>
    %67 = arith.addf %65, %66 : vector<8x128xf32>
    %68 = vector.extract_strided_slice %59 {offsets = [0, 128], sizes = [8, 128], strides = [1, 1]} : vector<8x512xf32> to vector<8x128xf32>
    %cst_26 = arith.constant 5.000000e-01 : f32
    %69 = vector.broadcast %cst_26 : f32 to vector<8x128xf32>
    %70 = arith.mulf %69, %68 : vector<8x128xf32>
    %71 = math.tanh %70 : vector<8x128xf32>
    %cst_27 = arith.constant 5.000000e-01 : f32
    %72 = vector.broadcast %cst_27 : f32 to vector<8x128xf32>
    %73 = arith.mulf %72, %71 : vector<8x128xf32>
    %cst_28 = arith.constant 5.000000e-01 : f32
    %74 = vector.broadcast %cst_28 : f32 to vector<8x128xf32>
    %75 = arith.addf %73, %74 : vector<8x128xf32>
    %76 = vector.extract_strided_slice %59 {offsets = [0, 256], sizes = [8, 128], strides = [1, 1]} : vector<8x512xf32> to vector<8x128xf32>
    %77 = math.tanh %76 : vector<8x128xf32>
    %78 = vector.extract_strided_slice %59 {offsets = [0, 384], sizes = [8, 128], strides = [1, 1]} : vector<8x512xf32> to vector<8x128xf32>
    %cst_29 = arith.constant 5.000000e-01 : f32
    %79 = vector.broadcast %cst_29 : f32 to vector<8x128xf32>
    %80 = arith.mulf %79, %78 : vector<8x128xf32>
    %81 = math.tanh %80 : vector<8x128xf32>
    %cst_30 = arith.constant 5.000000e-01 : f32
    %82 = vector.broadcast %cst_30 : f32 to vector<8x128xf32>
    %83 = arith.mulf %82, %81 : vector<8x128xf32>
    %cst_31 = arith.constant 5.000000e-01 : f32
    %84 = vector.broadcast %cst_31 : f32 to vector<8x128xf32>
    %85 = arith.addf %83, %84 : vector<8x128xf32>
    %86 = arith.mulf %75, %50 : vector<8x128xf32>
    %87 = arith.mulf %67, %77 : vector<8x128xf32>
    %88 = arith.addf %86, %87 : vector<8x128xf32>
    %89 = math.tanh %88 : vector<8x128xf32>
    %90 = arith.mulf %85, %89 : vector<8x128xf32>
    %c16 = arith.constant 16 : index
    %c0_32 = arith.constant 0 : index
    %91 = vector.load %arg6[%c16, %c0_32] : memref<64x512xf32, #tpu.memory_space<vmem>>, vector<8x512xf32>
    %92 = arith.truncf %90 : vector<8x128xf32> to vector<8x128xbf16>
    %cst_33 = arith.constant dense<0.000000e+00> : vector<8x1024xf32>
    %93 = tpu.matmul %92, %9, %cst_33 {dimension_numbers = #tpu.dot_dimension_numbers<[1], [0], [0], [1], [0, 0, 1, 1], [], []>} : vector<8x128xbf16>, vector<128x1024xbf16>, vector<8x1024xf32> -> vector<8x1024xf32>
    %94 = vector.extract_strided_slice %93 {offsets = [0, 0], sizes = [8, 512], strides = [1, 1]} : vector<8x1024xf32> to vector<8x512xf32>
    %95 = vector.extract_strided_slice %93 {offsets = [0, 512], sizes = [8, 512], strides = [1, 1]} : vector<8x1024xf32> to vector<8x512xf32>
    %96 = arith.select %12, %94, %95 : vector<8x512xi1>, vector<8x512xf32>
    %97 = arith.addf %91, %96 : vector<8x512xf32>
    %98 = vector.extract_strided_slice %97 {offsets = [0, 0], sizes = [8, 128], strides = [1, 1]} : vector<8x512xf32> to vector<8x128xf32>
    %cst_34 = arith.constant 5.000000e-01 : f32
    %99 = vector.broadcast %cst_34 : f32 to vector<8x128xf32>
    %100 = arith.mulf %99, %98 : vector<8x128xf32>
    %101 = math.tanh %100 : vector<8x128xf32>
    %cst_35 = arith.constant 5.000000e-01 : f32
    %102 = vector.broadcast %cst_35 : f32 to vector<8x128xf32>
    %103 = arith.mulf %102, %101 : vector<8x128xf32>
    %cst_36 = arith.constant 5.000000e-01 : f32
    %104 = vector.broadcast %cst_36 : f32 to vector<8x128xf32>
    %105 = arith.addf %103, %104 : vector<8x128xf32>
    %106 = vector.extract_strided_slice %97 {offsets = [0, 128], sizes = [8, 128], strides = [1, 1]} : vector<8x512xf32> to vector<8x128xf32>
    %cst_37 = arith.constant 5.000000e-01 : f32
    %107 = vector.broadcast %cst_37 : f32 to vector<8x128xf32>
    %108 = arith.mulf %107, %106 : vector<8x128xf32>
    %109 = math.tanh %108 : vector<8x128xf32>
    %cst_38 = arith.constant 5.000000e-01 : f32
    %110 = vector.broadcast %cst_38 : f32 to vector<8x128xf32>
    %111 = arith.mulf %110, %109 : vector<8x128xf32>
    %cst_39 = arith.constant 5.000000e-01 : f32
    %112 = vector.broadcast %cst_39 : f32 to vector<8x128xf32>
    %113 = arith.addf %111, %112 : vector<8x128xf32>
    %114 = vector.extract_strided_slice %97 {offsets = [0, 256], sizes = [8, 128], strides = [1, 1]} : vector<8x512xf32> to vector<8x128xf32>
    %115 = math.tanh %114 : vector<8x128xf32>
    %116 = vector.extract_strided_slice %97 {offsets = [0, 384], sizes = [8, 128], strides = [1, 1]} : vector<8x512xf32> to vector<8x128xf32>
    %cst_40 = arith.constant 5.000000e-01 : f32
    %117 = vector.broadcast %cst_40 : f32 to vector<8x128xf32>
    %118 = arith.mulf %117, %116 : vector<8x128xf32>
    %119 = math.tanh %118 : vector<8x128xf32>
    %cst_41 = arith.constant 5.000000e-01 : f32
    %120 = vector.broadcast %cst_41 : f32 to vector<8x128xf32>
    %121 = arith.mulf %120, %119 : vector<8x128xf32>
    %cst_42 = arith.constant 5.000000e-01 : f32
    %122 = vector.broadcast %cst_42 : f32 to vector<8x128xf32>
    %123 = arith.addf %121, %122 : vector<8x128xf32>
    %124 = arith.mulf %113, %88 : vector<8x128xf32>
    %125 = arith.mulf %105, %115 : vector<8x128xf32>
    %126 = arith.addf %124, %125 : vector<8x128xf32>
    %127 = math.tanh %126 : vector<8x128xf32>
    %128 = arith.mulf %123, %127 : vector<8x128xf32>
    %c24 = arith.constant 24 : index
    %c0_43 = arith.constant 0 : index
    %129 = vector.load %arg6[%c24, %c0_43] : memref<64x512xf32, #tpu.memory_space<vmem>>, vector<8x512xf32>
    %130 = arith.truncf %128 : vector<8x128xf32> to vector<8x128xbf16>
    %cst_44 = arith.constant dense<0.000000e+00> : vector<8x1024xf32>
    %131 = tpu.matmul %130, %9, %cst_44 {dimension_numbers = #tpu.dot_dimension_numbers<[1], [0], [0], [1], [0, 0, 1, 1], [], []>} : vector<8x128xbf16>, vector<128x1024xbf16>, vector<8x1024xf32> -> vector<8x1024xf32>
    %132 = vector.extract_strided_slice %131 {offsets = [0, 0], sizes = [8, 512], strides = [1, 1]} : vector<8x1024xf32> to vector<8x512xf32>
    %133 = vector.extract_strided_slice %131 {offsets = [0, 512], sizes = [8, 512], strides = [1, 1]} : vector<8x1024xf32> to vector<8x512xf32>
    %134 = arith.select %12, %132, %133 : vector<8x512xi1>, vector<8x512xf32>
    %135 = arith.addf %129, %134 : vector<8x512xf32>
    %136 = vector.extract_strided_slice %135 {offsets = [0, 0], sizes = [8, 128], strides = [1, 1]} : vector<8x512xf32> to vector<8x128xf32>
    %cst_45 = arith.constant 5.000000e-01 : f32
    %137 = vector.broadcast %cst_45 : f32 to vector<8x128xf32>
    %138 = arith.mulf %137, %136 : vector<8x128xf32>
    %139 = math.tanh %138 : vector<8x128xf32>
    %cst_46 = arith.constant 5.000000e-01 : f32
    %140 = vector.broadcast %cst_46 : f32 to vector<8x128xf32>
    %141 = arith.mulf %140, %139 : vector<8x128xf32>
    %cst_47 = arith.constant 5.000000e-01 : f32
    %142 = vector.broadcast %cst_47 : f32 to vector<8x128xf32>
    %143 = arith.addf %141, %142 : vector<8x128xf32>
    %144 = vector.extract_strided_slice %135 {offsets = [0, 128], sizes = [8, 128], strides = [1, 1]} : vector<8x512xf32> to vector<8x128xf32>
    %cst_48 = arith.constant 5.000000e-01 : f32
    %145 = vector.broadcast %cst_48 : f32 to vector<8x128xf32>
    %146 = arith.mulf %145, %144 : vector<8x128xf32>
    %147 = math.tanh %146 : vector<8x128xf32>
    %cst_49 = arith.constant 5.000000e-01 : f32
    %148 = vector.broadcast %cst_49 : f32 to vector<8x128xf32>
    %149 = arith.mulf %148, %147 : vector<8x128xf32>
    %cst_50 = arith.constant 5.000000e-01 : f32
    %150 = vector.broadcast %cst_50 : f32 to vector<8x128xf32>
    %151 = arith.addf %149, %150 : vector<8x128xf32>
    %152 = vector.extract_strided_slice %135 {offsets = [0, 256], sizes = [8, 128], strides = [1, 1]} : vector<8x512xf32> to vector<8x128xf32>
    %153 = math.tanh %152 : vector<8x128xf32>
    %154 = vector.extract_strided_slice %135 {offsets = [0, 384], sizes = [8, 128], strides = [1, 1]} : vector<8x512xf32> to vector<8x128xf32>
    %cst_51 = arith.constant 5.000000e-01 : f32
    %155 = vector.broadcast %cst_51 : f32 to vector<8x128xf32>
    %156 = arith.mulf %155, %154 : vector<8x128xf32>
    %157 = math.tanh %156 : vector<8x128xf32>
    %cst_52 = arith.constant 5.000000e-01 : f32
    %158 = vector.broadcast %cst_52 : f32 to vector<8x128xf32>
    %159 = arith.mulf %158, %157 : vector<8x128xf32>
    %cst_53 = arith.constant 5.000000e-01 : f32
    %160 = vector.broadcast %cst_53 : f32 to vector<8x128xf32>
    %161 = arith.addf %159, %160 : vector<8x128xf32>
    %162 = arith.mulf %151, %126 : vector<8x128xf32>
    %163 = arith.mulf %143, %153 : vector<8x128xf32>
    %164 = arith.addf %162, %163 : vector<8x128xf32>
    %165 = math.tanh %164 : vector<8x128xf32>
    %166 = arith.mulf %161, %165 : vector<8x128xf32>
    %c32 = arith.constant 32 : index
    %c0_54 = arith.constant 0 : index
    %167 = vector.load %arg6[%c32, %c0_54] : memref<64x512xf32, #tpu.memory_space<vmem>>, vector<8x512xf32>
    %168 = arith.truncf %166 : vector<8x128xf32> to vector<8x128xbf16>
    %cst_55 = arith.constant dense<0.000000e+00> : vector<8x1024xf32>
    %169 = tpu.matmul %168, %9, %cst_55 {dimension_numbers = #tpu.dot_dimension_numbers<[1], [0], [0], [1], [0, 0, 1, 1], [], []>} : vector<8x128xbf16>, vector<128x1024xbf16>, vector<8x1024xf32> -> vector<8x1024xf32>
    %170 = vector.extract_strided_slice %169 {offsets = [0, 0], sizes = [8, 512], strides = [1, 1]} : vector<8x1024xf32> to vector<8x512xf32>
    %171 = vector.extract_strided_slice %169 {offsets = [0, 512], sizes = [8, 512], strides = [1, 1]} : vector<8x1024xf32> to vector<8x512xf32>
    %172 = arith.select %12, %170, %171 : vector<8x512xi1>, vector<8x512xf32>
    %173 = arith.addf %167, %172 : vector<8x512xf32>
    %174 = vector.extract_strided_slice %173 {offsets = [0, 0], sizes = [8, 128], strides = [1, 1]} : vector<8x512xf32> to vector<8x128xf32>
    %cst_56 = arith.constant 5.000000e-01 : f32
    %175 = vector.broadcast %cst_56 : f32 to vector<8x128xf32>
    %176 = arith.mulf %175, %174 : vector<8x128xf32>
    %177 = math.tanh %176 : vector<8x128xf32>
    %cst_57 = arith.constant 5.000000e-01 : f32
    %178 = vector.broadcast %cst_57 : f32 to vector<8x128xf32>
    %179 = arith.mulf %178, %177 : vector<8x128xf32>
    %cst_58 = arith.constant 5.000000e-01 : f32
    %180 = vector.broadcast %cst_58 : f32 to vector<8x128xf32>
    %181 = arith.addf %179, %180 : vector<8x128xf32>
    %182 = vector.extract_strided_slice %173 {offsets = [0, 128], sizes = [8, 128], strides = [1, 1]} : vector<8x512xf32> to vector<8x128xf32>
    %cst_59 = arith.constant 5.000000e-01 : f32
    %183 = vector.broadcast %cst_59 : f32 to vector<8x128xf32>
    %184 = arith.mulf %183, %182 : vector<8x128xf32>
    %185 = math.tanh %184 : vector<8x128xf32>
    %cst_60 = arith.constant 5.000000e-01 : f32
    %186 = vector.broadcast %cst_60 : f32 to vector<8x128xf32>
    %187 = arith.mulf %186, %185 : vector<8x128xf32>
    %cst_61 = arith.constant 5.000000e-01 : f32
    %188 = vector.broadcast %cst_61 : f32 to vector<8x128xf32>
    %189 = arith.addf %187, %188 : vector<8x128xf32>
    %190 = vector.extract_strided_slice %173 {offsets = [0, 256], sizes = [8, 128], strides = [1, 1]} : vector<8x512xf32> to vector<8x128xf32>
    %191 = math.tanh %190 : vector<8x128xf32>
    %192 = vector.extract_strided_slice %173 {offsets = [0, 384], sizes = [8, 128], strides = [1, 1]} : vector<8x512xf32> to vector<8x128xf32>
    %cst_62 = arith.constant 5.000000e-01 : f32
    %193 = vector.broadcast %cst_62 : f32 to vector<8x128xf32>
    %194 = arith.mulf %193, %192 : vector<8x128xf32>
    %195 = math.tanh %194 : vector<8x128xf32>
    %cst_63 = arith.constant 5.000000e-01 : f32
    %196 = vector.broadcast %cst_63 : f32 to vector<8x128xf32>
    %197 = arith.mulf %196, %195 : vector<8x128xf32>
    %cst_64 = arith.constant 5.000000e-01 : f32
    %198 = vector.broadcast %cst_64 : f32 to vector<8x128xf32>
    %199 = arith.addf %197, %198 : vector<8x128xf32>
    %200 = arith.mulf %189, %164 : vector<8x128xf32>
    %201 = arith.mulf %181, %191 : vector<8x128xf32>
    %202 = arith.addf %200, %201 : vector<8x128xf32>
    %203 = math.tanh %202 : vector<8x128xf32>
    %204 = arith.mulf %199, %203 : vector<8x128xf32>
    %c40 = arith.constant 40 : index
    %c0_65 = arith.constant 0 : index
    %205 = vector.load %arg6[%c40, %c0_65] : memref<64x512xf32, #tpu.memory_space<vmem>>, vector<8x512xf32>
    %206 = arith.truncf %204 : vector<8x128xf32> to vector<8x128xbf16>
    %cst_66 = arith.constant dense<0.000000e+00> : vector<8x1024xf32>
    %207 = tpu.matmul %206, %9, %cst_66 {dimension_numbers = #tpu.dot_dimension_numbers<[1], [0], [0], [1], [0, 0, 1, 1], [], []>} : vector<8x128xbf16>, vector<128x1024xbf16>, vector<8x1024xf32> -> vector<8x1024xf32>
    %208 = vector.extract_strided_slice %207 {offsets = [0, 0], sizes = [8, 512], strides = [1, 1]} : vector<8x1024xf32> to vector<8x512xf32>
    %209 = vector.extract_strided_slice %207 {offsets = [0, 512], sizes = [8, 512], strides = [1, 1]} : vector<8x1024xf32> to vector<8x512xf32>
    %210 = arith.select %12, %208, %209 : vector<8x512xi1>, vector<8x512xf32>
    %211 = arith.addf %205, %210 : vector<8x512xf32>
    %212 = vector.extract_strided_slice %211 {offsets = [0, 0], sizes = [8, 128], strides = [1, 1]} : vector<8x512xf32> to vector<8x128xf32>
    %cst_67 = arith.constant 5.000000e-01 : f32
    %213 = vector.broadcast %cst_67 : f32 to vector<8x128xf32>
    %214 = arith.mulf %213, %212 : vector<8x128xf32>
    %215 = math.tanh %214 : vector<8x128xf32>
    %cst_68 = arith.constant 5.000000e-01 : f32
    %216 = vector.broadcast %cst_68 : f32 to vector<8x128xf32>
    %217 = arith.mulf %216, %215 : vector<8x128xf32>
    %cst_69 = arith.constant 5.000000e-01 : f32
    %218 = vector.broadcast %cst_69 : f32 to vector<8x128xf32>
    %219 = arith.addf %217, %218 : vector<8x128xf32>
    %220 = vector.extract_strided_slice %211 {offsets = [0, 128], sizes = [8, 128], strides = [1, 1]} : vector<8x512xf32> to vector<8x128xf32>
    %cst_70 = arith.constant 5.000000e-01 : f32
    %221 = vector.broadcast %cst_70 : f32 to vector<8x128xf32>
    %222 = arith.mulf %221, %220 : vector<8x128xf32>
    %223 = math.tanh %222 : vector<8x128xf32>
    %cst_71 = arith.constant 5.000000e-01 : f32
    %224 = vector.broadcast %cst_71 : f32 to vector<8x128xf32>
    %225 = arith.mulf %224, %223 : vector<8x128xf32>
    %cst_72 = arith.constant 5.000000e-01 : f32
    %226 = vector.broadcast %cst_72 : f32 to vector<8x128xf32>
    %227 = arith.addf %225, %226 : vector<8x128xf32>
    %228 = vector.extract_strided_slice %211 {offsets = [0, 256], sizes = [8, 128], strides = [1, 1]} : vector<8x512xf32> to vector<8x128xf32>
    %229 = math.tanh %228 : vector<8x128xf32>
    %230 = vector.extract_strided_slice %211 {offsets = [0, 384], sizes = [8, 128], strides = [1, 1]} : vector<8x512xf32> to vector<8x128xf32>
    %cst_73 = arith.constant 5.000000e-01 : f32
    %231 = vector.broadcast %cst_73 : f32 to vector<8x128xf32>
    %232 = arith.mulf %231, %230 : vector<8x128xf32>
    %233 = math.tanh %232 : vector<8x128xf32>
    %cst_74 = arith.constant 5.000000e-01 : f32
    %234 = vector.broadcast %cst_74 : f32 to vector<8x128xf32>
    %235 = arith.mulf %234, %233 : vector<8x128xf32>
    %cst_75 = arith.constant 5.000000e-01 : f32
    %236 = vector.broadcast %cst_75 : f32 to vector<8x128xf32>
    %237 = arith.addf %235, %236 : vector<8x128xf32>
    %238 = arith.mulf %227, %202 : vector<8x128xf32>
    %239 = arith.mulf %219, %229 : vector<8x128xf32>
    %240 = arith.addf %238, %239 : vector<8x128xf32>
    %241 = math.tanh %240 : vector<8x128xf32>
    %242 = arith.mulf %237, %241 : vector<8x128xf32>
    %c48 = arith.constant 48 : index
    %c0_76 = arith.constant 0 : index
    %243 = vector.load %arg6[%c48, %c0_76] : memref<64x512xf32, #tpu.memory_space<vmem>>, vector<8x512xf32>
    %244 = arith.truncf %242 : vector<8x128xf32> to vector<8x128xbf16>
    %cst_77 = arith.constant dense<0.000000e+00> : vector<8x1024xf32>
    %245 = tpu.matmul %244, %9, %cst_77 {dimension_numbers = #tpu.dot_dimension_numbers<[1], [0], [0], [1], [0, 0, 1, 1], [], []>} : vector<8x128xbf16>, vector<128x1024xbf16>, vector<8x1024xf32> -> vector<8x1024xf32>
    %246 = vector.extract_strided_slice %245 {offsets = [0, 0], sizes = [8, 512], strides = [1, 1]} : vector<8x1024xf32> to vector<8x512xf32>
    %247 = vector.extract_strided_slice %245 {offsets = [0, 512], sizes = [8, 512], strides = [1, 1]} : vector<8x1024xf32> to vector<8x512xf32>
    %248 = arith.select %12, %246, %247 : vector<8x512xi1>, vector<8x512xf32>
    %249 = arith.addf %243, %248 : vector<8x512xf32>
    %250 = vector.extract_strided_slice %249 {offsets = [0, 0], sizes = [8, 128], strides = [1, 1]} : vector<8x512xf32> to vector<8x128xf32>
    %cst_78 = arith.constant 5.000000e-01 : f32
    %251 = vector.broadcast %cst_78 : f32 to vector<8x128xf32>
    %252 = arith.mulf %251, %250 : vector<8x128xf32>
    %253 = math.tanh %252 : vector<8x128xf32>
    %cst_79 = arith.constant 5.000000e-01 : f32
    %254 = vector.broadcast %cst_79 : f32 to vector<8x128xf32>
    %255 = arith.mulf %254, %253 : vector<8x128xf32>
    %cst_80 = arith.constant 5.000000e-01 : f32
    %256 = vector.broadcast %cst_80 : f32 to vector<8x128xf32>
    %257 = arith.addf %255, %256 : vector<8x128xf32>
    %258 = vector.extract_strided_slice %249 {offsets = [0, 128], sizes = [8, 128], strides = [1, 1]} : vector<8x512xf32> to vector<8x128xf32>
    %cst_81 = arith.constant 5.000000e-01 : f32
    %259 = vector.broadcast %cst_81 : f32 to vector<8x128xf32>
    %260 = arith.mulf %259, %258 : vector<8x128xf32>
    %261 = math.tanh %260 : vector<8x128xf32>
    %cst_82 = arith.constant 5.000000e-01 : f32
    %262 = vector.broadcast %cst_82 : f32 to vector<8x128xf32>
    %263 = arith.mulf %262, %261 : vector<8x128xf32>
    %cst_83 = arith.constant 5.000000e-01 : f32
    %264 = vector.broadcast %cst_83 : f32 to vector<8x128xf32>
    %265 = arith.addf %263, %264 : vector<8x128xf32>
    %266 = vector.extract_strided_slice %249 {offsets = [0, 256], sizes = [8, 128], strides = [1, 1]} : vector<8x512xf32> to vector<8x128xf32>
    %267 = math.tanh %266 : vector<8x128xf32>
    %268 = vector.extract_strided_slice %249 {offsets = [0, 384], sizes = [8, 128], strides = [1, 1]} : vector<8x512xf32> to vector<8x128xf32>
    %cst_84 = arith.constant 5.000000e-01 : f32
    %269 = vector.broadcast %cst_84 : f32 to vector<8x128xf32>
    %270 = arith.mulf %269, %268 : vector<8x128xf32>
    %271 = math.tanh %270 : vector<8x128xf32>
    %cst_85 = arith.constant 5.000000e-01 : f32
    %272 = vector.broadcast %cst_85 : f32 to vector<8x128xf32>
    %273 = arith.mulf %272, %271 : vector<8x128xf32>
    %cst_86 = arith.constant 5.000000e-01 : f32
    %274 = vector.broadcast %cst_86 : f32 to vector<8x128xf32>
    %275 = arith.addf %273, %274 : vector<8x128xf32>
    %276 = arith.mulf %265, %240 : vector<8x128xf32>
    %277 = arith.mulf %257, %267 : vector<8x128xf32>
    %278 = arith.addf %276, %277 : vector<8x128xf32>
    %279 = math.tanh %278 : vector<8x128xf32>
    %280 = arith.mulf %275, %279 : vector<8x128xf32>
    %c56 = arith.constant 56 : index
    %c0_87 = arith.constant 0 : index
    %281 = vector.load %arg6[%c56, %c0_87] : memref<64x512xf32, #tpu.memory_space<vmem>>, vector<8x512xf32>
    %282 = arith.truncf %280 : vector<8x128xf32> to vector<8x128xbf16>
    %cst_88 = arith.constant dense<0.000000e+00> : vector<8x1024xf32>
    %283 = tpu.matmul %282, %9, %cst_88 {dimension_numbers = #tpu.dot_dimension_numbers<[1], [0], [0], [1], [0, 0, 1, 1], [], []>} : vector<8x128xbf16>, vector<128x1024xbf16>, vector<8x1024xf32> -> vector<8x1024xf32>
    %284 = vector.extract_strided_slice %283 {offsets = [0, 0], sizes = [8, 512], strides = [1, 1]} : vector<8x1024xf32> to vector<8x512xf32>
    %285 = vector.extract_strided_slice %283 {offsets = [0, 512], sizes = [8, 512], strides = [1, 1]} : vector<8x1024xf32> to vector<8x512xf32>
    %286 = arith.select %12, %284, %285 : vector<8x512xi1>, vector<8x512xf32>
    %287 = arith.addf %281, %286 : vector<8x512xf32>
    %288 = vector.extract_strided_slice %287 {offsets = [0, 0], sizes = [8, 128], strides = [1, 1]} : vector<8x512xf32> to vector<8x128xf32>
    %cst_89 = arith.constant 5.000000e-01 : f32
    %289 = vector.broadcast %cst_89 : f32 to vector<8x128xf32>
    %290 = arith.mulf %289, %288 : vector<8x128xf32>
    %291 = math.tanh %290 : vector<8x128xf32>
    %cst_90 = arith.constant 5.000000e-01 : f32
    %292 = vector.broadcast %cst_90 : f32 to vector<8x128xf32>
    %293 = arith.mulf %292, %291 : vector<8x128xf32>
    %cst_91 = arith.constant 5.000000e-01 : f32
    %294 = vector.broadcast %cst_91 : f32 to vector<8x128xf32>
    %295 = arith.addf %293, %294 : vector<8x128xf32>
    %296 = vector.extract_strided_slice %287 {offsets = [0, 128], sizes = [8, 128], strides = [1, 1]} : vector<8x512xf32> to vector<8x128xf32>
    %cst_92 = arith.constant 5.000000e-01 : f32
    %297 = vector.broadcast %cst_92 : f32 to vector<8x128xf32>
    %298 = arith.mulf %297, %296 : vector<8x128xf32>
    %299 = math.tanh %298 : vector<8x128xf32>
    %cst_93 = arith.constant 5.000000e-01 : f32
    %300 = vector.broadcast %cst_93 : f32 to vector<8x128xf32>
    %301 = arith.mulf %300, %299 : vector<8x128xf32>
    %cst_94 = arith.constant 5.000000e-01 : f32
    %302 = vector.broadcast %cst_94 : f32 to vector<8x128xf32>
    %303 = arith.addf %301, %302 : vector<8x128xf32>
    %304 = vector.extract_strided_slice %287 {offsets = [0, 256], sizes = [8, 128], strides = [1, 1]} : vector<8x512xf32> to vector<8x128xf32>
    %305 = math.tanh %304 : vector<8x128xf32>
    %306 = vector.extract_strided_slice %287 {offsets = [0, 384], sizes = [8, 128], strides = [1, 1]} : vector<8x512xf32> to vector<8x128xf32>
    %cst_95 = arith.constant 5.000000e-01 : f32
    %307 = vector.broadcast %cst_95 : f32 to vector<8x128xf32>
    %308 = arith.mulf %307, %306 : vector<8x128xf32>
    %309 = math.tanh %308 : vector<8x128xf32>
    %cst_96 = arith.constant 5.000000e-01 : f32
    %310 = vector.broadcast %cst_96 : f32 to vector<8x128xf32>
    %311 = arith.mulf %310, %309 : vector<8x128xf32>
    %cst_97 = arith.constant 5.000000e-01 : f32
    %312 = vector.broadcast %cst_97 : f32 to vector<8x128xf32>
    %313 = arith.addf %311, %312 : vector<8x128xf32>
    %314 = arith.mulf %303, %278 : vector<8x128xf32>
    %315 = arith.mulf %295, %305 : vector<8x128xf32>
    %316 = arith.addf %314, %315 : vector<8x128xf32>
    %317 = math.tanh %316 : vector<8x128xf32>
    %318 = arith.mulf %313, %317 : vector<8x128xf32>
    %319 = vector.extract_strided_slice %52 {offsets = [0, 0], sizes = [2, 128], strides = [1, 1]} : vector<8x128xf32> to vector<2x128xf32>
    %320 = vector.extract_strided_slice %90 {offsets = [0, 0], sizes = [2, 128], strides = [1, 1]} : vector<8x128xf32> to vector<2x128xf32>
    %321 = vector.extract_strided_slice %128 {offsets = [0, 0], sizes = [2, 128], strides = [1, 1]} : vector<8x128xf32> to vector<2x128xf32>
    %322 = vector.extract_strided_slice %166 {offsets = [0, 0], sizes = [2, 128], strides = [1, 1]} : vector<8x128xf32> to vector<2x128xf32>
    %323 = vector.extract_strided_slice %204 {offsets = [0, 0], sizes = [2, 128], strides = [1, 1]} : vector<8x128xf32> to vector<2x128xf32>
    %324 = vector.extract_strided_slice %242 {offsets = [0, 0], sizes = [2, 128], strides = [1, 1]} : vector<8x128xf32> to vector<2x128xf32>
    %325 = vector.extract_strided_slice %280 {offsets = [0, 0], sizes = [2, 128], strides = [1, 1]} : vector<8x128xf32> to vector<2x128xf32>
    %326 = vector.extract_strided_slice %318 {offsets = [0, 0], sizes = [2, 128], strides = [1, 1]} : vector<8x128xf32> to vector<2x128xf32>
    %327 = vector.shape_cast %319 : vector<2x128xf32> to vector<2x1x128xf32>
    %328 = vector.shape_cast %320 : vector<2x128xf32> to vector<2x1x128xf32>
    %329 = vector.shape_cast %321 : vector<2x128xf32> to vector<2x1x128xf32>
    %330 = vector.shape_cast %322 : vector<2x128xf32> to vector<2x1x128xf32>
    %331 = vector.shape_cast %323 : vector<2x128xf32> to vector<2x1x128xf32>
    %332 = vector.shape_cast %324 : vector<2x128xf32> to vector<2x1x128xf32>
    %333 = vector.shape_cast %325 : vector<2x128xf32> to vector<2x1x128xf32>
    %334 = vector.shape_cast %326 : vector<2x128xf32> to vector<2x1x128xf32>
    %335 = tpu.concatenate %327, %328, %329, %330, %331, %332, %333, %334 in 1 : vector<2x1x128xf32>, vector<2x1x128xf32>, vector<2x1x128xf32>, vector<2x1x128xf32>, vector<2x1x128xf32>, vector<2x1x128xf32>, vector<2x1x128xf32>, vector<2x1x128xf32> -> vector<2x8x128xf32>
    %336 = vector.extract_strided_slice %318 {offsets = [2, 0], sizes = [2, 128], strides = [1, 1]} : vector<8x128xf32> to vector<2x128xf32>
    %337 = vector.extract_strided_slice %280 {offsets = [2, 0], sizes = [2, 128], strides = [1, 1]} : vector<8x128xf32> to vector<2x128xf32>
    %338 = vector.extract_strided_slice %242 {offsets = [2, 0], sizes = [2, 128], strides = [1, 1]} : vector<8x128xf32> to vector<2x128xf32>
    %339 = vector.extract_strided_slice %204 {offsets = [2, 0], sizes = [2, 128], strides = [1, 1]} : vector<8x128xf32> to vector<2x128xf32>
    %340 = vector.extract_strided_slice %166 {offsets = [2, 0], sizes = [2, 128], strides = [1, 1]} : vector<8x128xf32> to vector<2x128xf32>
    %341 = vector.extract_strided_slice %128 {offsets = [2, 0], sizes = [2, 128], strides = [1, 1]} : vector<8x128xf32> to vector<2x128xf32>
    %342 = vector.extract_strided_slice %90 {offsets = [2, 0], sizes = [2, 128], strides = [1, 1]} : vector<8x128xf32> to vector<2x128xf32>
    %343 = vector.extract_strided_slice %52 {offsets = [2, 0], sizes = [2, 128], strides = [1, 1]} : vector<8x128xf32> to vector<2x128xf32>
    %344 = vector.shape_cast %336 : vector<2x128xf32> to vector<2x1x128xf32>
    %345 = vector.shape_cast %337 : vector<2x128xf32> to vector<2x1x128xf32>
    %346 = vector.shape_cast %338 : vector<2x128xf32> to vector<2x1x128xf32>
    %347 = vector.shape_cast %339 : vector<2x128xf32> to vector<2x1x128xf32>
    %348 = vector.shape_cast %340 : vector<2x128xf32> to vector<2x1x128xf32>
    %349 = vector.shape_cast %341 : vector<2x128xf32> to vector<2x1x128xf32>
    %350 = vector.shape_cast %342 : vector<2x128xf32> to vector<2x1x128xf32>
    %351 = vector.shape_cast %343 : vector<2x128xf32> to vector<2x1x128xf32>
    %352 = tpu.concatenate %344, %345, %346, %347, %348, %349, %350, %351 in 1 : vector<2x1x128xf32>, vector<2x1x128xf32>, vector<2x1x128xf32>, vector<2x1x128xf32>, vector<2x1x128xf32>, vector<2x1x128xf32>, vector<2x1x128xf32>, vector<2x1x128xf32> -> vector<2x8x128xf32>
    %353 = tpu.concatenate %335, %352 in 2 : vector<2x8x128xf32>, vector<2x8x128xf32> -> vector<2x8x256xf32>
    %c0_98 = arith.constant 0 : index
    %c0_99 = arith.constant 0 : index
    %c0_100 = arith.constant 0 : index
    %354 = vector.load %arg3[%c0_98, %c0_99, %c0_100] : memref<2x8x256xf32, #tpu.memory_space<vmem>>, vector<2x8x256xf32>
    tpu.vector_store %arg3[%c0_98, %c0_99, %c0_100], %353 {strides = array<i32>} : memref<2x8x256xf32, #tpu.memory_space<vmem>>, vector<2x8x256xf32>,
    %355 = vector.extract_strided_slice %318 {offsets = [0, 0], sizes = [2, 128], strides = [1, 1]} : vector<8x128xf32> to vector<2x128xf32>
    %c0_101 = arith.constant 0 : index
    %c0_102 = arith.constant 0 : index
    %c0_103 = arith.constant 0 : index
    %356 = vector.load %arg4[%c0_101, %c0_102, %c0_103] : memref<2x2x128xf32, #tpu.memory_space<vmem>>, vector<1x2x128xf32>
    %357 = vector.shape_cast %356 : vector<1x2x128xf32> to vector<2x128xf32>
    %358 = vector.shape_cast %355 : vector<2x128xf32> to vector<1x2x128xf32>
    tpu.vector_store %arg4[%c0_101, %c0_102, %c0_103], %358 {strides = array<i32>} : memref<2x2x128xf32, #tpu.memory_space<vmem>>, vector<1x2x128xf32>,
    %359 = vector.extract_strided_slice %318 {offsets = [2, 0], sizes = [2, 128], strides = [1, 1]} : vector<8x128xf32> to vector<2x128xf32>
    %c1 = arith.constant 1 : index
    %c0_104 = arith.constant 0 : index
    %c0_105 = arith.constant 0 : index
    %360 = vector.load %arg4[%c1, %c0_104, %c0_105] : memref<2x2x128xf32, #tpu.memory_space<vmem>>, vector<1x2x128xf32>
    %361 = vector.shape_cast %360 : vector<1x2x128xf32> to vector<2x128xf32>
    %362 = vector.shape_cast %359 : vector<2x128xf32> to vector<1x2x128xf32>
    tpu.vector_store %arg4[%c1, %c0_104, %c0_105], %362 {strides = array<i32>} : memref<2x2x128xf32, #tpu.memory_space<vmem>>, vector<1x2x128xf32>,
    %363 = vector.extract_strided_slice %316 {offsets = [0, 0], sizes = [2, 128], strides = [1, 1]} : vector<8x128xf32> to vector<2x128xf32>
    %c0_106 = arith.constant 0 : index
    %c0_107 = arith.constant 0 : index
    %c0_108 = arith.constant 0 : index
    %364 = vector.load %arg5[%c0_106, %c0_107, %c0_108] : memref<2x2x128xf32, #tpu.memory_space<vmem>>, vector<1x2x128xf32>
    %365 = vector.shape_cast %364 : vector<1x2x128xf32> to vector<2x128xf32>
    %366 = vector.shape_cast %363 : vector<2x128xf32> to vector<1x2x128xf32>
    tpu.vector_store %arg5[%c0_106, %c0_107, %c0_108], %366 {strides = array<i32>} : memref<2x2x128xf32, #tpu.memory_space<vmem>>, vector<1x2x128xf32>,
    %367 = vector.extract_strided_slice %316 {offsets = [2, 0], sizes = [2, 128], strides = [1, 1]} : vector<8x128xf32> to vector<2x128xf32>
    %c1_109 = arith.constant 1 : index
    %c0_110 = arith.constant 0 : index
    %c0_111 = arith.constant 0 : index
    %368 = vector.load %arg5[%c1_109, %c0_110, %c0_111] : memref<2x2x128xf32, #tpu.memory_space<vmem>>, vector<1x2x128xf32>
    %369 = vector.shape_cast %368 : vector<1x2x128xf32> to vector<2x128xf32>
    %370 = vector.shape_cast %367 : vector<2x128xf32> to vector<1x2x128xf32>
    tpu.vector_store %arg5[%c1_109, %c0_110, %c0_111], %370 {strides = array<i32>} : memref<2x2x128xf32, #tpu.memory_space<vmem>>, vector<1x2x128xf32>,
    return
  }
}

</mosaic_0001>

<bundles_post_ra>
// kernel: encoder_forward.1
= control target key start
LH: loop header
LB: loop body
LE: loop exit
PB: predicated region body
PF: predicated region fallthrough
CT: control target
= control target key end

     0   :  { %11 = vsyncpa [#allocation4], 0  ;;  %s4361_s0 = inlined_call_operand.vmem [shape: s32[64,1], index: 0, kind: input, shape index: {}]   ;;  %s4362_s1 = inlined_call_operand.hbm [shape: f32[64,512], index: 1, kind: input, shape index: {}]   ;;  %s4363_s2 = inlined_call_operand.hbm [shape: bf16[128,1024], index: 2, kind: input, shape index: {}]   ;;  %s4364_s3 = inlined_call_operand.hbm [shape: f32[2,8,256], index: 3, kind: output, shape index: {0}]   ;;  %s4365_s4 = inlined_call_operand.hbm [shape: f32[2,2,128], index: 4, kind: output, shape index: {1}]   ;;  %s4366_s5 = inlined_call_operand.hbm [shape: f32[2,2,128], index: 5, kind: output, shape index: {2}]  }
   0x1   :  { %12 = vsyncpa [#allocation7], 0 }
   0x2   :  { %13 = vsyncpa [#allocation5], 0 }
   0x3   :  { %14 = vsyncpa [#allocation10], 0  ;;  %s3138_s18 = smov [#allocation3]   ;;  %s3020_s22 = scalar_lea.hbm %s4362_s1, 4096 }
   0x4   :  { %s22_s19 = sshll.u32 %s3138_s18, 4  ;;  %p3021_p0 = scmp.ne.s32.totalorder %s4362_s1, %s3020_s22  ;;  %s23_s19 = int_to_ptr.vmem [resolvable:$true] %s22_s19 }
   0x5   :  { %p3024_p1 = scmp.lt.u32.totalorder %s3020_s22, %s4362_s1 }
   0x7   :  { %p3026_p2 = pnand %p3024_p1, %p3021_p0 }
   0x9   :  { %3029 = shalt.err (!%p3026_p2)
}
   0xa   :  { %s3030_s27 = scalar_lea.vmem %s23_s19, 4096  ;;  %p3035_p4 = scmp.lt.s32.totalorder %s23_s19, %s23_s19 }
   0xb   :  { %p3031_p3 = scmp.ne.s32.totalorder %s23_s19, %s3030_s27  ;;  %p3036_p5 = scmp.lt.s32.totalorder %s3030_s27, %s3030_s27 }
   0xd   :  { %p3037_p6 = por %p3036_p5, %p3035_p4 }
   0xf   :  { %p3038_p7 = pnand %p3037_p6, %p3031_p3 }
  0x11   :  { %3041 = shalt.err (!%p3038_p7)
}
  0x12   :  { %s3139_s28 = smov 512   ;;  %s3140_s29 = smov 32  }
  0x13   :  { %28 = dma.hbm_to_vmem [thread:$0]  %s4362_s1, 4096, %s23_s19, [#allocation4], %s3139_s28, %s3139_s28, %s3140_s29  }
  0x14   :  { %s3141_s7 = smov [#allocation6]   ;;  %s3042_s11 = scalar_lea.hbm %s4363_s2, 8192 }
  0x15   :  { %s34_s8 = sshll.u32 %s3141_s7, 4  ;;  %p3043_p8 = scmp.ne.s32.totalorder %s4363_s2, %s3042_s11  ;;  %s35_s8 = int_to_ptr.vmem [resolvable:$true] %s34_s8 }
  0x16   :  { %p3046_p9 = scmp.lt.u32.totalorder %s3042_s11, %s4363_s2 }
  0x18   :  { %p3048_p10 = pnand %p3046_p9, %p3043_p8 }
  0x1a   :  { %3051 = shalt.err (!%p3048_p10)
}
  0x1b   :  { %s3052_s16 = scalar_lea.vmem %s35_s8, 8192  ;;  %p3057_p12 = scmp.lt.s32.totalorder %s35_s8, %s35_s8 }
  0x1c   :  { %p3053_p11 = scmp.ne.s32.totalorder %s35_s8, %s3052_s16  ;;  %p3058_p13 = scmp.lt.s32.totalorder %s3052_s16, %s3052_s16 }
  0x1e   :  { %p3059_p0 = por %p3058_p13, %p3057_p12 }
  0x20   :  { %p3060_p1 = pnand %p3059_p0, %p3053_p11 }
  0x22   :  { %3063 = shalt.err (!%p3060_p1)
}
  0x23   :  { %40 = dma.hbm_to_vmem [thread:$0]  %s4363_s2, 8192, %s35_s8, [#allocation7], %s3139_s28, %s3139_s28, %s3140_s29  }
  0x24   :  { %3130 = dma.done.wait [#allocation4], 4096  }
  0x25   :  { %3131 = vsyncadd [#allocation4], 4294963200 }
  0x26   :  { %3132 = dma.done.wait [#allocation7], 8192  }
  0x27   :  { %3133 = vsyncadd [#allocation7], 4294959104  ;;  %v4368_v0 = vmov 0   ;;  %v3143_v1 = vmov 0.0   ;;  %v52_v2 = vld [vmem:[%s4361_s0 + $0x10] sm:$0xff]  ;;  %v50_v3 = vld [vmem:[%s4361_s0] sm:$0xff] }
  0x28   :  { %2939 = vset.pattern.permute.xlu1 %v4368_v0  ;;  %2938 = vset.pattern.permute.xlu0 %v4368_v0  ;;  %v53_v4 = vld [vmem:[%s4361_s0 + $0x18] sm:$0xff]  ;;  %v51_v5 = vld [vmem:[%s4361_s0 + $0x8] sm:$0xff]  ;;  %v54_v11 = vld [vmem:[%s4361_s0 + $0x20] sm:$0xff]  ;;  %vm138_vm0 = vcmask 523264   ;;  %vm2623_vm10 = vcmask 1040384   ;;  %vm2626_vm11 = vcmask 1041408  }
  0x29   :  { %227 = vmatprep.mubr.f32.mxu0 %v3143_v1  ;;  %340 = vmatprep.mubr.f32.mxu1 %v3143_v1  ;;  %v107_v6 = vld [vmem:[#allocation3 + $0x8] sm:$0xff]  ;;  %v109_v8 = vld [vmem:[#allocation3 + $0x18] sm:$0xff]  ;;  %v106_v14 = vld [vmem:[#allocation3] sm:$0xff]  ;;  %vm2629_vm12 = vcmask 1042432   ;;  %vm2632_vm13 = vcmask 1043456   ;;  %vm2635_vm14 = vcmask 1044480  }
  0x2a   :  { %65 = vperm.xlu1 %2939, %v52_v2   ;;  %59 = vperm.xlu0 %2938, %v50_v3   ;;  %v111_v7 = vld [vmem:[#allocation3 + $0x28] sm:$0xff]  ;;  %v113_v9 = vld [vmem:[#allocation3 + $0x38] sm:$0xff]  ;;  %v110_v15 = vld [vmem:[#allocation3 + $0x20] sm:$0xff]  ;;  %vm2638_vm15 = vcmask 1045504   ;;  %s3146_s10 = smov [#allocation11]  }
  0x2b   :  { %v55_v10 = vld [vmem:[%s4361_s0 + $0x28] sm:$0xff]  ;;  %v2893_v12 = vpack.c.bf16 %v111_v7, %v107_v6  ;;  %v2909_v13 = vpack.c.bf16 %v113_v9, %v109_v8  ;;  %v108_v16 = vld [vmem:[#allocation3 + $0x10] sm:$0xff]  ;;  %v2895_v17 = vpack.c.bf16 %v110_v15, %v106_v14  ;;  %v117_v23 = vld [vmem:[#allocation3 + $0x58] sm:$0xff]  ;;  %s2785_s11 = sshll.u32 %s3146_s10, 4  ;;  %s4277_s11 = int_to_ptr.vmem [resolvable:$true] %s2785_s11 }
  0x2c   :  { %v112_v18 = vld [vmem:[#allocation3 + $0x30] sm:$0xff]  ;;  %v115_v19 = vld [vmem:[#allocation3 + $0x48] sm:$0xff]  ;;  %v121_v24 = vld [vmem:[#allocation3 + $0x78] sm:$0xff] }
  0x2d   :  { %v119_v20 = vld [vmem:[#allocation3 + $0x68] sm:$0xff]  ;;  %2894 = vmatprep.subr.bf16.mxu0 %v2893_v12  ;;  %2910 = vmatprep.subr.bf16.mxu1 %v2909_v13  ;;  %v2911_v21 = vpack.c.bf16 %v112_v18, %v108_v16  ;;  %v114_v25 = vld [vmem:[#allocation3 + $0x40] sm:$0xff]  ;;  %v2913_v26 = vpack.c.bf16 %v121_v24, %v117_v23  ;;  %v116_v28 = vld [vmem:[#allocation3 + $0x50] sm:$0xff] }
  0x2e   :  { %68 = vperm.xlu1 %2939, %v53_v4   ;;  %62 = vperm.xlu0 %2938, %v51_v5   ;;  %v2897_v22 = vpack.c.bf16 %v119_v20, %v115_v19  ;;  %v118_v27 = vld [vmem:[#allocation3 + $0x60] sm:$0xff]  ;;  %v120_v29 = vld [vmem:[#allocation3 + $0x70] sm:$0xff]  ;;  %v57_v30 = vld [vmem:[%s4361_s0 + $0x38] sm:$0xff]  ;;  %v4367_v4 = vlaneseq }
  0x2f   :  { %2896 = vmatpush1.bf16.msra.mxu0 %v2895_v17  ;;  %v56_v31 = vld [vmem:[%s4361_s0 + $0x30] sm:$0xff]  ;;  %2912 = vmatpush1.bf16.msra.mxu1 %v2911_v21  ;;  %v2899_v32 = vpack.c.bf16 %v118_v27, %v114_v25  ;;  %v2915_v33 = vpack.c.bf16 %v120_v29, %v116_v28  ;;  %v123_v34 = vld [vmem:[#allocation3 + $0x88] sm:$0xff]  ;;  %v125_v36 = vld [vmem:[#allocation3 + $0x98] sm:$0xff]  ;;  %s3145_s0 = smov [#allocation9]  }
  0x30   :  { %2898 = vmatprep.subr.bf16.mxu0 %v2897_v22  ;;  %v127_v35 = vld [vmem:[#allocation3 + $0xa8] sm:$0xff]  ;;  %v129_v38 = vld [vmem:[#allocation3 + $0xb8] sm:$0xff]  ;;  %v122_v39 = vld [vmem:[#allocation3 + $0x80] sm:$0xff]  ;;  %2914 = vmatprep.subr.bf16.mxu1 %v2913_v26  ;;  %v3246_v5 = vand.u32 127, %v4367_v4  ;;  %s2773_s9 = sshll.u32 %s3145_s0, 4  ;;  %s2774_s9 = int_to_ptr.vmem [resolvable:$true] %s2773_s9 }
  0x31   :  { %v2901_v37 = vpack.c.bf16 %v127_v35, %v123_v34  ;;  %v126_v40 = vld [vmem:[#allocation3 + $0xa0] sm:$0xff]  ;;  %v2917_v41 = vpack.c.bf16 %v129_v38, %v125_v36  ;;  %v124_v42 = vld [vmem:[#allocation3 + $0x90] sm:$0xff]  ;;  %v131_v44 = vld [vmem:[#allocation3 + $0xc8] sm:$0xff]  ;;  %s3064_s12 = scalar_lea.vmem %s2774_s9, 64  ;;  %p3069_p3 = scmp.lt.s32.totalorder %s2774_s9, %s2774_s9 }
  0x32   :  { %74 = vperm.xlu1 %2939, %v55_v10   ;;  %71 = vperm.xlu0 %2938, %v54_v11   ;;  %v128_v43 = vld [vmem:[#allocation3 + $0xb0] sm:$0xff]  ;;  %v2903_v45 = vpack.c.bf16 %v126_v40, %v122_v39  ;;  %v135_v46 = vld [vmem:[#allocation3 + $0xe8] sm:$0xff]  ;;  %v133_v47 = vld [vmem:[#allocation3 + $0xd8] sm:$0xff]  ;;  %p3065_p2 = scmp.ne.s32.totalorder %s2774_s9, %s3064_s12  ;;  %p3070_p4 = scmp.lt.s32.totalorder %s3064_s12, %s3064_s12 }
  0x33   :  { %2900 = vmatpush1.bf16.msra.mxu0 %v2899_v32  ;;  %v137_v48 = vld [vmem:[#allocation3 + $0xf8] sm:$0xff]  ;;  %2916 = vmatpush1.bf16.msra.mxu1 %v2915_v33  ;;  %v2919_v49 = vpack.c.bf16 %v128_v43, %v124_v42  ;;  %v2905_v50 = vpack.c.bf16 %v135_v46, %v131_v44  ;;  %v130_v51 = vld [vmem:[#allocation3 + $0xc0] sm:$0xff]  ;;  %v132_v53 = vld [vmem:[#allocation3 + $0xd0] sm:$0xff] }
  0x34   :  { %2902 = vmatprep.subr.bf16.mxu0 %v2901_v37  ;;  %v134_v52 = vld [vmem:[#allocation3 + $0xe0] sm:$0xff]  ;;  %v2921_v54 = vpack.c.bf16 %v137_v48, %v133_v47  ;;  %v136_v55 = vld [vmem:[#allocation3 + $0xf0] sm:$0xff]  ;;  %2918 = vmatprep.subr.bf16.mxu1 %v2917_v41  ;;  %v422_v58 = vld [vmem:[#allocation6 + $0x8] sm:$0xff]  ;;  %p3071_p5 = por %p3070_p4, %p3069_p3 }
  0x35   :  { %v421_v56 = vld [vmem:[#allocation6] sm:$0xff]  ;;  %v426_v59 = vld [vmem:[#allocation6 + $0x28] sm:$0xff]  ;;  %v2907_v61 = vpack.c.bf16 %v134_v52, %v130_v51  ;;  %v2923_v63 = vpack.c.bf16 %v136_v55, %v132_v53  ;;  %v471_v4 = vld [vmem:[#allocation6 + $0x190] sm:$0xff] }
  0x36   :  { %80 = vperm.xlu1 %2939, %v57_v30   ;;  %77 = vperm.xlu0 %2938, %v56_v31   ;;  %v425_v57 = vld [vmem:[#allocation6 + $0x20] sm:$0xff]  ;;  %v3237_v62 = vcombine.low %v422_v58, %v426_v59  ;;  %v3241_v3 = vcombine.high %v422_v58, %v426_v59  ;;  %v430_v8 = vld [vmem:[#allocation6 + $0x48] sm:$0xff]  ;;  %p3072_p6 = pnand %p3071_p5, %p3065_p2 }
  0x37   :  { %v3235_v60 = vcombine.low %v421_v56, %v425_v57  ;;  %2904 = vmatpush1.bf16.msra.mxu0 %v2903_v45  ;;  %2920 = vmatpush1.bf16.msra.mxu1 %v2919_v49  ;;  %v3239_v2 = vcombine.high %v421_v56, %v425_v57  ;;  %v429_v6 = vld [vmem:[#allocation6 + $0x40] sm:$0xff]  ;;  %v434_v9 = vld [vmem:[#allocation6 + $0x68] sm:$0xff] }
  0x38   :  { %2906 = vmatprep.subr.bf16.mxu0 %v2905_v50  ;;  %2922 = vmatprep.subr.bf16.mxu1 %v2921_v54  ;;  %v433_v7 = vld [vmem:[#allocation6 + $0x60] sm:$0xff]  ;;  %v3252_v13 = vcombine.high %v430_v8, %v434_v9  ;;  %v438_v16 = vld [vmem:[#allocation6 + $0x88] sm:$0xff]  ;;  %v3260_v21 = vcombine.low %v430_v8, %v434_v9 }
  0x39   :  { %v3250_v12 = vcombine.high %v429_v6, %v433_v7  ;;  %v437_v14 = vld [vmem:[#allocation6 + $0x80] sm:$0xff]  ;;  %v442_v17 = vld [vmem:[#allocation6 + $0xa8] sm:$0xff]  ;;  %v3258_v20 = vcombine.low %v429_v6, %v433_v7 }
  0x3a   :  { %4444 = vst [vmem:[#allocation16_spill] sm:$0xff] %v3252_v13  ;;  %v441_v15 = vld [vmem:[#allocation6 + $0xa0] sm:$0xff]  ;;  %4446 = vst [vmem:[#allocation18_spill] sm:$0xff] %v3260_v21  ;;  %v3271_v24 = vcombine.high %v438_v16, %v442_v17  ;;  %v446_v27 = vld [vmem:[#allocation6 + $0xc8] sm:$0xff]  ;;  %v3280_v31 = vcombine.low %v438_v16, %v442_v17 }
  0x3b   :  { %2908 = vmatpush1.bf16.msra.mxu0 %v2907_v61  ;;  %2924 = vmatpush1.bf16.msra.mxu1 %v2923_v63  ;;  %4445 = vst [vmem:[#allocation17_spill] sm:$0xff] %v3258_v20  ;;  %v3269_v23 = vcombine.high %v437_v14, %v441_v15  ;;  %v445_v25 = vld [vmem:[#allocation6 + $0xc0] sm:$0xff]  ;;  %v450_v28 = vld [vmem:[#allocation6 + $0xe8] sm:$0xff]  ;;  %v3278_v30 = vcombine.low %v437_v14, %v441_v15 }
  0x3c   :  { %812 = vmatprep.subr.bf16.mxu0 %v3239_v2  ;;  %853 = vmatprep.subr.bf16.mxu1 %v3241_v3  ;;  %4448 = vst [vmem:[#allocation20_spill] sm:$0xff] %v3271_v24  ;;  %v449_v26 = vld [vmem:[#allocation6 + $0xe0] sm:$0xff]  ;;  %4450 = vst [vmem:[#allocation22_spill] sm:$0xff] %v3280_v31  ;;  %v3288_v34 = vcombine.high %v446_v27, %v450_v28  ;;  %v454_v37 = vld [vmem:[#allocation6 + $0x108] sm:$0xff]  ;;  %v3297_v41 = vcombine.low %v446_v27, %v450_v28 }
  0x3d   :  { %4447 = vst [vmem:[#allocation19_spill] sm:$0xff] %v3269_v23  ;;  %4449 = vst [vmem:[#allocation21_spill] sm:$0xff] %v3278_v30  ;;  %v3286_v33 = vcombine.high %v445_v25, %v449_v26  ;;  %v453_v35 = vld [vmem:[#allocation6 + $0x100] sm:$0xff]  ;;  %v458_v38 = vld [vmem:[#allocation6 + $0x128] sm:$0xff]  ;;  %v3295_v40 = vcombine.low %v445_v25, %v449_v26 }
  0x3e   :  { %4452 = vst [vmem:[#allocation24_spill] sm:$0xff] %v3288_v34  ;;  %v457_v36 = vld [vmem:[#allocation6 + $0x120] sm:$0xff]  ;;  %4454 = vst [vmem:[#allocation26_spill] sm:$0xff] %v3297_v41  ;;  %v3306_v44 = vcombine.high %v454_v37, %v458_v38  ;;  %v462_v47 = vld [vmem:[#allocation6 + $0x148] sm:$0xff]  ;;  %v3315_v51 = vcombine.low %v454_v37, %v458_v38 }
  0x3f   :  { %4451 = vst [vmem:[#allocation23_spill] sm:$0xff] %v3286_v33  ;;  %4453 = vst [vmem:[#allocation25_spill] sm:$0xff] %v3295_v40  ;;  %v3304_v43 = vcombine.high %v453_v35, %v457_v36  ;;  %v461_v45 = vld [vmem:[#allocation6 + $0x140] sm:$0xff]  ;;  %v466_v48 = vld [vmem:[#allocation6 + $0x168] sm:$0xff]  ;;  %v3313_v50 = vcombine.low %v453_v35, %v457_v36 }
  0x40   :  { %4456 = vst [vmem:[#allocation28_spill] sm:$0xff] %v3306_v44  ;;  %v465_v46 = vld [vmem:[#allocation6 + $0x160] sm:$0xff]  ;;  %4458 = vst [vmem:[#allocation30_spill] sm:$0xff] %v3315_v51  ;;  %v3324_v54 = vcombine.high %v462_v47, %v466_v48  ;;  %v470_v57 = vld [vmem:[#allocation6 + $0x188] sm:$0xff]  ;;  %v3333_v63 = vcombine.low %v462_v47, %v466_v48 }
  0x41   :  { %4455 = vst [vmem:[#allocation27_spill] sm:$0xff] %v3304_v43  ;;  %4457 = vst [vmem:[#allocation29_spill] sm:$0xff] %v3313_v50  ;;  %v3322_v53 = vcombine.high %v461_v45, %v465_v46  ;;  %v469_v55 = vld [vmem:[#allocation6 + $0x180] sm:$0xff]  ;;  %v474_v58 = vld [vmem:[#allocation6 + $0x1a8] sm:$0xff]  ;;  %v3331_v61 = vcombine.low %v461_v45, %v465_v46 }
  0x42   :  { %4460 = vst [vmem:[#allocation32_spill] sm:$0xff] %v3324_v54  ;;  %v473_v56 = vld [vmem:[#allocation6 + $0x1a0] sm:$0xff]  ;;  %4462 = vst [vmem:[#allocation34_spill] sm:$0xff] %v3333_v63  ;;  %v3342_v8 = vcombine.high %v470_v57, %v474_v58  ;;  %v482_v14 = vld [vmem:[#allocation6 + $0x1e8] sm:$0xff]  ;;  %v3351_v17 = vcombine.low %v470_v57, %v474_v58 }
  0x43   :  { %4459 = vst [vmem:[#allocation31_spill] sm:$0xff] %v3322_v53  ;;  %4461 = vst [vmem:[#allocation33_spill] sm:$0xff] %v3331_v61  ;;  %v3340_v7 = vcombine.high %v469_v55, %v473_v56  ;;  %v477_v9 = vld [vmem:[#allocation6 + $0x1c0] sm:$0xff]  ;;  %v3349_v16 = vcombine.low %v469_v55, %v473_v56  ;;  %v423_v25 = vld [vmem:[#allocation6 + $0x10] sm:$0xff] }
  0x44   :  { %4464 = vst [vmem:[#allocation36_spill] sm:$0xff] %v3342_v8  ;;  %4466 = vst [vmem:[#allocation38_spill] sm:$0xff] %v3351_v17  ;;  %v427_v26 = vld [vmem:[#allocation6 + $0x30] sm:$0xff]  ;;  %v424_v27 = vld [vmem:[#allocation6 + $0x18] sm:$0xff] }
  0x45   :  { %4463 = vst [vmem:[#allocation35_spill] sm:$0xff] %v3340_v7  ;;  %4465 = vst [vmem:[#allocation37_spill] sm:$0xff] %v3349_v16  ;;  %v428_v28 = vld [vmem:[#allocation6 + $0x38] sm:$0xff]  ;;  %v3376_v36 = vcombine.high %v423_v25, %v427_v26  ;;  %v435_v38 = vld [vmem:[#allocation6 + $0x70] sm:$0xff] }
  0x46   :  { %v3378_v37 = vcombine.high %v424_v27, %v428_v28  ;;  %v3386_v45 = vcombine.low %v424_v27, %v428_v28  ;;  %v439_v48 = vld [vmem:[#allocation6 + $0x90] sm:$0xff]  ;;  %v444_v55 = vld [vmem:[#allocation6 + $0xb8] sm:$0xff] }
  0x47   :  { %4471 = vst [vmem:[#allocation43_spill] sm:$0xff] %v3376_v36  ;;  %v459_v27 = vld [vmem:[#allocation6 + $0x130] sm:$0xff]  ;;  %v456_v28 = vld [vmem:[#allocation6 + $0x118] sm:$0xff] }
  0x48   :  { %4472 = vst [vmem:[#allocation44_spill] sm:$0xff] %v3378_v37 }
  0xa9   :  { %v60_v10 = vpop.permute.xlu0 %59  ;;  %v66_v18 = vpop.permute.xlu1 %65 }
  0xaa   :  { %vm82_vm1 = vcmp.eq.s32.totalorder %v3246_v5, %v60_v10  ;;  %vm84_vm2 = vcmp.eq.s32.totalorder %v3246_v5, %v66_v18  ;;  %v481_v10 = vld [vmem:[#allocation6 + $0x1e0] sm:$0xff] }
  0xab   :  { %v2805_v11 = vsel %vm82_vm1, 1.0, %v3143_v1  ;;  %v2807_v29 = vsel %vm84_vm2, 1.0, %v3143_v1 }
  0xac   :  { %2813 = vmatmul.mubr.msk.f32.vlgmr.msra.gmra.mrb[0].mxu0 %vm138_vm0, %v2805_v11  ;;  %2821 = vmatmul.mubr.msk.f32.vlgmr.msra.gmra.mrb[0].mxu1 %vm138_vm0, %v2805_v11  ;;  %v478_v11 = vld [vmem:[#allocation6 + $0x1c8] sm:$0xff] }
  0xad   :  { %813 = vmatpush1.bf16.msra.mxu0 %v3235_v60  ;;  %854 = vmatpush1.bf16.msra.mxu1 %v3237_v62  ;;  %v63_v19 = vpop.permute.xlu0 %62  ;;  %v69_v32 = vpop.permute.xlu1 %68 }
  0xae   :  { %vm83_vm3 = vcmp.eq.s32.totalorder %v3246_v5, %v63_v19  ;;  %233 = vmatprep.mubr.f32.mxu0 %v3143_v1  ;;  %346 = vmatprep.mubr.f32.mxu1 %v3143_v1  ;;  %vm85_vm4 = vcmp.eq.s32.totalorder %v3246_v5, %v69_v32  ;;  %v3358_v19 = vcombine.high %v477_v9, %v481_v10 }
  0xaf   :  { %v2806_v22 = vsel %vm83_vm3, 1.0, %v3143_v1  ;;  %814 = vmatprep.subr.bf16.mxu0 %v3250_v12  ;;  %855 = vmatprep.subr.bf16.mxu1 %v3252_v13  ;;  %v2808_v42 = vsel %vm85_vm4, 1.0, %v3143_v1  ;;  %v3369_v32 = vcombine.low %v478_v11, %v482_v14 }
  0xb0   :  { %2814 = vmatmul.mubr.msk.f32.gmra.mrb[2].mxu0 %vm138_vm0, %v2806_v22  ;;  %2822 = vmatmul.mubr.msk.f32.gmra.mrb[2].mxu1 %vm138_vm0, %v2806_v22  ;;  %4467 = vst [vmem:[#allocation39_spill] sm:$0xff] %v3358_v19  ;;  %v3360_v22 = vcombine.high %v478_v11, %v482_v14  ;;  %v452_v11 = vld [vmem:[#allocation6 + $0xf8] sm:$0xff] }
  0xb1   :  { %815 = vmatpush1.bf16.msra.mxu0 %v3258_v20  ;;  %856 = vmatpush1.bf16.msra.mxu1 %v3260_v21  ;;  %v72_v39 = vpop.permute.xlu0 %71  ;;  %v75_v49 = vpop.permute.xlu1 %74  ;;  %4470 = vst [vmem:[#allocation42_spill] sm:$0xff] %v3369_v32 }
  0xb2   :  { %239 = vmatprep.mubr.f32.mxu0 %v3143_v1  ;;  %352 = vmatprep.mubr.f32.mxu1 %v3143_v1  ;;  %vm86_vm5 = vcmp.eq.s32.totalorder %v3246_v5, %v72_v39  ;;  %vm87_vm6 = vcmp.eq.s32.totalorder %v3246_v5, %v75_v49  ;;  %4468 = vst [vmem:[#allocation40_spill] sm:$0xff] %v3360_v22  ;;  %v432_v39 = vld [vmem:[#allocation6 + $0x58] sm:$0xff]  ;;  %v443_v49 = vld [vmem:[#allocation6 + $0xb0] sm:$0xff] }
  0xb3   :  { %816 = vmatprep.subr.bf16.mxu0 %v3269_v23  ;;  %857 = vmatprep.subr.bf16.mxu1 %v3271_v24  ;;  %v2809_v52 = vsel %vm86_vm5, 1.0, %v3143_v1  ;;  %v2810_v6 = vsel %vm87_vm6, 1.0, %v3143_v1  ;;  %v3406_v58 = vcombine.high %v439_v48, %v443_v49  ;;  %v3414_v14 = vcombine.low %v439_v48, %v443_v49  ;;  %v463_v48 = vld [vmem:[#allocation6 + $0x150] sm:$0xff] }
  0xb4   :  { %2815 = vmatmul.mubr.msk.f32.gmra.mrb[4].mxu0 %vm138_vm0, %v2807_v29  ;;  %2823 = vmatmul.mubr.msk.f32.gmra.mrb[4].mxu1 %vm138_vm0, %v2807_v29  ;;  %v3367_v29 = vcombine.low %v477_v9, %v481_v10  ;;  %v451_v9 = vld [vmem:[#allocation6 + $0xf0] sm:$0xff]  ;;  %v448_v10 = vld [vmem:[#allocation6 + $0xd8] sm:$0xff] }
  0xb5   :  { %817 = vmatpush1.bf16.msra.mxu0 %v3278_v30  ;;  %858 = vmatpush1.bf16.msra.mxu1 %v3280_v31  ;;  %v78_v59 = vpop.permute.xlu0 %77  ;;  %v81_v15 = vpop.permute.xlu1 %80  ;;  %v467_v49 = vld [vmem:[#allocation6 + $0x170] sm:$0xff] }
  0xb6   :  { %245 = vmatprep.mubr.f32.mxu0 %v3143_v1  ;;  %358 = vmatprep.mubr.f32.mxu1 %v3143_v1  ;;  %vm88_vm7 = vcmp.eq.s32.totalorder %v3246_v5, %v78_v59  ;;  %vm89_vm8 = vcmp.eq.s32.totalorder %v3246_v5, %v81_v15  ;;  %4469 = vst [vmem:[#allocation41_spill] sm:$0xff] %v3367_v29  ;;  %v431_v5 = vld [vmem:[#allocation6 + $0x50] sm:$0xff] }
  0xb7   :  { %818 = vmatprep.subr.bf16.mxu0 %v3286_v33  ;;  %859 = vmatprep.subr.bf16.mxu1 %v3288_v34  ;;  %v2811_v18 = vsel %vm88_vm7, 1.0, %v3143_v1  ;;  %v2812_v35 = vsel %vm89_vm8, 1.0, %v3143_v1  ;;  %v3390_v46 = vcombine.high %v431_v5, %v435_v38  ;;  %v3400_v56 = vcombine.low %v431_v5, %v435_v38  ;;  %v460_v5 = vld [vmem:[#allocation6 + $0x138] sm:$0xff] }
  0xb8   :  { %2816 = vmatmul.mubr.msk.f32.gmra.mrb[6].mxu0 %vm138_vm0, %v2808_v42  ;;  %2824 = vmatmul.mubr.msk.f32.gmra.mrb[6].mxu1 %vm138_vm0, %v2808_v42  ;;  %v436_v42 = vld [vmem:[#allocation6 + $0x78] sm:$0xff]  ;;  %v3428_v38 = vcombine.low %v448_v10, %v452_v11 }
  0xb9   :  { %819 = vmatpush1.bf16.msra.mxu0 %v3295_v40  ;;  %860 = vmatpush1.bf16.msra.mxu1 %v3297_v41  ;;  %v3392_v47 = vcombine.high %v432_v39, %v436_v42  ;;  %v3402_v57 = vcombine.low %v432_v39, %v436_v42  ;;  %v3434_v42 = vcombine.high %v456_v28, %v460_v5 }
  0xba   :  { %251 = vmatprep.mubr.f32.mxu0 %v3143_v1  ;;  %364 = vmatprep.mubr.f32.mxu1 %v3143_v1  ;;  %4476 = vst [vmem:[#allocation48_spill] sm:$0xff] %v3428_v38 }
  0xbb   :  { %820 = vmatprep.subr.bf16.mxu0 %v3304_v43  ;;  %861 = vmatprep.subr.bf16.mxu1 %v3306_v44  ;;  %4478 = vst [vmem:[#allocation50_spill] sm:$0xff] %v3434_v42 }
  0xbc   :  { %2817 = vmatmul.mubr.msk.f32.gmra.mrb[8].mxu0 %vm138_vm0, %v2809_v52  ;;  %2825 = vmatmul.mubr.msk.f32.gmra.mrb[8].mxu1 %vm138_vm0, %v2809_v52  ;;  %v440_v52 = vld [vmem:[#allocation6 + $0x98] sm:$0xff] }
  0xbd   :  { %821 = vmatpush1.bf16.msra.mxu0 %v3313_v50  ;;  %862 = vmatpush1.bf16.msra.mxu1 %v3315_v51  ;;  %v3408_v59 = vcombine.high %v440_v52, %v444_v55  ;;  %v3416_v15 = vcombine.low %v440_v52, %v444_v55  ;;  %v464_v52 = vld [vmem:[#allocation6 + $0x158] sm:$0xff] }
  0xbe   :  { %257 = vmatprep.mubr.f32.mxu0 %v3143_v1  ;;  %370 = vmatprep.mubr.f32.mxu1 %v3143_v1  ;;  %v468_v55 = vld [vmem:[#allocation6 + $0x178] sm:$0xff] }
  0xbf   :  { %822 = vmatprep.subr.bf16.mxu0 %v3322_v53  ;;  %863 = vmatprep.subr.bf16.mxu1 %v3324_v54 }
  0xc0   :  { %2818 = vmatmul.mubr.msk.f32.gmra.mrb[10].mxu0 %vm138_vm0, %v2810_v6  ;;  %2826 = vmatmul.mubr.msk.f32.gmra.mrb[10].mxu1 %vm138_vm0, %v2810_v6  ;;  %v447_v6 = vld [vmem:[#allocation6 + $0xd0] sm:$0xff] }
  0xc1   :  { %823 = vmatpush1.bf16.msra.mxu0 %v3331_v61  ;;  %864 = vmatpush1.bf16.msra.mxu1 %v3333_v63 }
  0xc2   :  { %263 = vmatprep.mubr.f32.mxu0 %v3143_v1  ;;  %376 = vmatprep.mubr.f32.mxu1 %v3143_v1 }
  0xc3   :  { %824 = vmatprep.subr.bf16.mxu0 %v3340_v7  ;;  %865 = vmatprep.subr.bf16.mxu1 %v3342_v8 }
  0xc4   :  { %2819 = vmatmul.mubr.msk.f32.gmra.mrb[12].mxu0 %vm138_vm0, %v2811_v18  ;;  %2827 = vmatmul.mubr.msk.f32.gmra.mrb[12].mxu1 %vm138_vm0, %v2811_v18  ;;  %v3420_v18 = vcombine.high %v447_v6, %v451_v9 }
  0xc5   :  { %825 = vmatpush1.bf16.msra.mxu0 %v3349_v16  ;;  %866 = vmatpush1.bf16.msra.mxu1 %v3351_v17 }
  0xc6   :  { %269 = vmatprep.mubr.f32.mxu0 %v3143_v1  ;;  %382 = vmatprep.mubr.f32.mxu1 %v3143_v1  ;;  %v3384_v1 = vcombine.low %v423_v25, %v427_v26  ;;  %4473 = vst [vmem:[#allocation45_spill] sm:$0xff] %v3420_v18  ;;  %v3422_v25 = vcombine.high %v448_v10, %v452_v11  ;;  %v455_v26 = vld [vmem:[#allocation6 + $0x110] sm:$0xff] }
  0xc7   :  { %826 = vmatprep.subr.bf16.mxu0 %v3358_v19  ;;  %867 = vmatprep.subr.bf16.mxu1 %v3360_v22  ;;  %v3432_v39 = vcombine.high %v455_v26, %v459_v27  ;;  %v3444_v10 = vcombine.high %v463_v48, %v467_v49  ;;  %v3446_v11 = vcombine.high %v464_v52, %v468_v55 }
  0xc8   :  { %2820 = vmatmul.mubr.msk.f32.gmra.mrb[14].mxu0 %vm138_vm0, %v2812_v35  ;;  %2828 = vmatmul.mubr.msk.f32.gmra.mrb[14].mxu1 %vm138_vm0, %v2812_v35  ;;  %4474 = vst [vmem:[#allocation46_spill] sm:$0xff] %v3422_v25  ;;  %v3426_v35 = vcombine.low %v447_v6, %v451_v9  ;;  %v3438_v6 = vcombine.low %v455_v26, %v459_v27 }
  0xc9   :  { %827 = vmatpush1.bf16.msra.mxu0 %v3367_v29  ;;  %868 = vmatpush1.bf16.msra.mxu1 %v3369_v32  ;;  %4477 = vst [vmem:[#allocation49_spill] sm:$0xff] %v3432_v39  ;;  %v3440_v9 = vcombine.low %v456_v28, %v460_v5  ;;  %4479 = vst [vmem:[#allocation51_spill] sm:$0xff] %v3446_v11  ;;  %v3450_v26 = vcombine.low %v463_v48, %v467_v49 }
  0xca   :  { %844 = vmatprep.mubr.bf16.mxu0 %v4368_v0  ;;  %885 = vmatprep.mubr.bf16.mxu1 %v4368_v0  ;;  %4475 = vst [vmem:[#allocation47_spill] sm:$0xff] %v3426_v35  ;;  %v3452_v27 = vcombine.low %v464_v52, %v468_v55 }
  0xcb   :  { %894 = vmatprep.subr.bf16.mxu0 %v3376_v36  ;;  %935 = vmatprep.subr.bf16.mxu1 %v3378_v37  ;;  %4480 = vst [vmem:[#allocation52_spill] sm:$0xff] %v3450_v26 }
  0xcc   :  { %845 = vmatmul.mubr.bf16.vlgmr.msra.gmra.mrb[16].mxu0 %v4368_v0  ;;  %886 = vmatmul.mubr.bf16.vlgmr.msra.gmra.mrb[16].mxu1 %v4368_v0 }
  0xcd   :  { %895 = vmatpush1.bf16.msra.mxu0 %v3384_v1  ;;  %936 = vmatpush1.bf16.msra.mxu1 %v3386_v45 }
  0xce   :  { %896 = vmatprep.subr.bf16.mxu0 %v3390_v46  ;;  %937 = vmatprep.subr.bf16.mxu1 %v3392_v47 }
  0xcf   :  { %926 = vmatprep.mubr.bf16.mxu0 %v4368_v0  ;;  %967 = vmatprep.mubr.bf16.mxu1 %v4368_v0  ;;  %v475_v0 = vld [vmem:[#allocation6 + $0x1b0] sm:$0xff] }
  0xd0   :  { %v3456_v28 = vcombine.high %v471_v4, %v475_v0  ;;  %v3462_v48 = vcombine.low %v471_v4, %v475_v0  ;;  %v4481_v0 = vmov 0  }
  0xd1   :  { %897 = vmatpush1.bf16.msra.mxu0 %v3400_v56  ;;  %938 = vmatpush1.bf16.msra.mxu1 %v3402_v57 }
  0xd2   :  { %898 = vmatprep.subr.bf16.mxu0 %v3406_v58  ;;  %939 = vmatprep.subr.bf16.mxu1 %v3408_v59 }
  0xd5   :  { %899 = vmatpush1.bf16.msra.mxu0 %v3414_v14  ;;  %940 = vmatpush1.bf16.msra.mxu1 %v3416_v15 }
  0xd6   :  { %900 = vmatprep.subr.bf16.mxu0 %v3420_v18  ;;  %941 = vmatprep.subr.bf16.mxu1 %v3422_v25  ;;  %v472_v25 = vld [vmem:[#allocation6 + $0x198] sm:$0xff] }
  0xd7   :  { %v476_v18 = vld [vmem:[#allocation6 + $0x1b8] sm:$0xff] }
  0xd8   :  { %v3458_v5 = vcombine.high %v472_v25, %v476_v18  ;;  %v3464_v49 = vcombine.low %v472_v25, %v476_v18 }
  0xd9   :  { %901 = vmatpush1.bf16.msra.mxu0 %v3426_v35  ;;  %942 = vmatpush1.bf16.msra.mxu1 %v3428_v38  ;;  %v480_v38 = vld [vmem:[#allocation6 + $0x1d8] sm:$0xff] }
  0xda   :  { %902 = vmatprep.subr.bf16.mxu0 %v3432_v39  ;;  %943 = vmatprep.subr.bf16.mxu1 %v3434_v42  ;;  %v479_v42 = vld [vmem:[#allocation6 + $0x1d0] sm:$0xff]  ;;  %v484_v35 = vld [vmem:[#allocation6 + $0x1f8] sm:$0xff] }
  0xdb   :  { %v483_v39 = vld [vmem:[#allocation6 + $0x1f0] sm:$0xff]  ;;  %v3470_v55 = vcombine.high %v480_v38, %v484_v35 }
  0xdc   :  { %v3468_v52 = vcombine.high %v479_v42, %v483_v39 }
  0xdd   :  { %903 = vmatpush1.bf16.msra.mxu0 %v3438_v6  ;;  %944 = vmatpush1.bf16.msra.mxu1 %v3440_v9 }
  0xde   :  { %904 = vmatprep.subr.bf16.mxu0 %v3444_v10  ;;  %945 = vmatprep.subr.bf16.mxu1 %v3446_v11  ;;  %v3474_v11 = vcombine.low %v479_v42, %v483_v39 }
  0xe1   :  { %905 = vmatpush1.bf16.msra.mxu0 %v3450_v26  ;;  %946 = vmatpush1.bf16.msra.mxu1 %v3452_v27  ;;  %v3476_v26 = vcombine.low %v480_v38, %v484_v35 }
  0xe2   :  { %906 = vmatprep.subr.bf16.mxu0 %v3456_v28  ;;  %947 = vmatprep.subr.bf16.mxu1 %v3458_v5 }
  0xe5   :  { %907 = vmatpush1.bf16.msra.mxu0 %v3462_v48  ;;  %948 = vmatpush1.bf16.msra.mxu1 %v3464_v49 }
  0xe6   :  { %908 = vmatprep.subr.bf16.mxu0 %v3468_v52  ;;  %949 = vmatprep.subr.bf16.mxu1 %v3470_v55 }
  0xe9   :  { %909 = vmatpush1.bf16.msra.mxu0 %v3474_v11  ;;  %950 = vmatpush1.bf16.msra.mxu1 %v3476_v26 }
  0xea   :  { %1007 = vmatprep.subr.bf16.mxu0 %v3239_v2  ;;  %1048 = vmatprep.subr.bf16.mxu1 %v3241_v3 }
  0xec   :  { %927 = vmatmul.mubr.bf16.vlgmr.msra.gmra.mrb[20].mxu0 %v4481_v0  ;;  %968 = vmatmul.mubr.bf16.vlgmr.msra.gmra.mrb[20].mxu1 %v4481_v0 }
  0xed   :  { %1008 = vmatpush1.bf16.msra.mxu0 %v3235_v60  ;;  %1049 = vmatpush1.bf16.msra.mxu1 %v3237_v62 }
  0xee   :  { %1009 = vmatprep.subr.bf16.mxu0 %v3250_v12  ;;  %1050 = vmatprep.subr.bf16.mxu1 %v3252_v13 }
  0xef   :  { %1039 = vmatprep.mubr.bf16.mxu0 %v4481_v0  ;;  %1080 = vmatprep.mubr.bf16.mxu1 %v4481_v0 }
  0xf1   :  { %1010 = vmatpush1.bf16.msra.mxu0 %v3258_v20  ;;  %1051 = vmatpush1.bf16.msra.mxu1 %v3260_v21 }
  0xf2   :  { %1011 = vmatprep.subr.bf16.mxu0 %v3269_v23  ;;  %1052 = vmatprep.subr.bf16.mxu1 %v3271_v24 }
  0xf5   :  { %1012 = vmatpush1.bf16.msra.mxu0 %v3278_v30  ;;  %1053 = vmatpush1.bf16.msra.mxu1 %v3280_v31 }
  0xf6   :  { %1013 = vmatprep.subr.bf16.mxu0 %v3286_v33  ;;  %1054 = vmatprep.subr.bf16.mxu1 %v3288_v34 }
  0xf9   :  { %1014 = vmatpush1.bf16.msra.mxu0 %v3295_v40  ;;  %1055 = vmatpush1.bf16.msra.mxu1 %v3297_v41 }
  0xfa   :  { %1015 = vmatprep.subr.bf16.mxu0 %v3304_v43  ;;  %1056 = vmatprep.subr.bf16.mxu1 %v3306_v44 }
  0xfd   :  { %1016 = vmatpush1.bf16.msra.mxu0 %v3313_v50  ;;  %1057 = vmatpush1.bf16.msra.mxu1 %v3315_v51 }
  0xfe   :  { %1017 = vmatprep.subr.bf16.mxu0 %v3322_v53  ;;  %1058 = vmatprep.subr.bf16.mxu1 %v3324_v54 }
 0x101   :  { %1018 = vmatpush1.bf16.msra.mxu0 %v3331_v61  ;;  %1059 = vmatpush1.bf16.msra.mxu1 %v3333_v63  ;;  %v4510_v61 = vlaneseq }
 0x102   :  { %1019 = vmatprep.subr.bf16.mxu0 %v3340_v7  ;;  %1060 = vmatprep.subr.bf16.mxu1 %v3342_v8 }
 0x105   :  { %1020 = vmatpush1.bf16.msra.mxu0 %v3349_v16  ;;  %1061 = vmatpush1.bf16.msra.mxu1 %v3351_v17 }
 0x106   :  { %1021 = vmatprep.subr.bf16.mxu0 %v3358_v19  ;;  %1062 = vmatprep.subr.bf16.mxu1 %v3360_v22 }
 0x109   :  { %1022 = vmatpush1.bf16.msra.mxu0 %v3367_v29  ;;  %1063 = vmatpush1.bf16.msra.mxu1 %v3369_v32 }
 0x10a   :  { %1089 = vmatprep.subr.bf16.mxu0 %v3376_v36  ;;  %1130 = vmatprep.subr.bf16.mxu1 %v3378_v37 }
 0x17f   :  { %v229_v4 = vpop.f32.mrb[0].mxu0  ;;  %v342_v18 = vpop.f32.mrb[0].mxu1 }
 0x180   :  { %v231_v25 = vpop.f32.mrb[1].mxu0  ;;  %v344_v35 = vpop.f32.mrb[1].mxu1 }
 0x183   :  { %v3520_v38 = vpop.f32.mrb[2].mxu0  ;;  %v3522_v39 = vpop.f32.mrb[2].mxu1 }
 0x184   :  { %4482 = vst [vmem:[#allocation53_spill] sm:$0xff] %v3520_v38  ;;  %4483 = vst [vmem:[#allocation54_spill] sm:$0xff] %v3522_v39  ;;  %v3524_v42 = vpop.f32.mrb[3].mxu0  ;;  %v3526_v19 = vpop.f32.mrb[3].mxu1 }
 0x185   :  { %4484 = vst [vmem:[#allocation55_spill] sm:$0xff] %v3524_v42  ;;  %4485 = vst [vmem:[#allocation56_spill] sm:$0xff] %v3526_v19 }
 0x187   :  { %v3528_v22 = vpop.f32.mrb[4].mxu0  ;;  %v3530_v29 = vpop.f32.mrb[4].mxu1 }
 0x188   :  { %4486 = vst [vmem:[#allocation57_spill] sm:$0xff] %v3528_v22  ;;  %4487 = vst [vmem:[#allocation58_spill] sm:$0xff] %v3530_v29  ;;  %v3532_v32 = vpop.f32.mrb[5].mxu0  ;;  %v3534_v36 = vpop.f32.mrb[5].mxu1 }
 0x189   :  { %4488 = vst [vmem:[#allocation59_spill] sm:$0xff] %v3532_v32  ;;  %4489 = vst [vmem:[#allocation60_spill] sm:$0xff] %v3534_v36 }
 0x18b   :  { %v3536_v37 = vpop.f32.mrb[6].mxu0  ;;  %v3538_v17 = vpop.f32.mrb[6].mxu1 }
 0x18c   :  { %4490 = vst [vmem:[#allocation61_spill] sm:$0xff] %v3536_v37  ;;  %4491 = vst [vmem:[#allocation62_spill] sm:$0xff] %v3538_v17  ;;  %v3540_v16 = vpop.f32.mrb[7].mxu0  ;;  %v3542_v38 = vpop.f32.mrb[7].mxu1 }
 0x18d   :  { %4492 = vst [vmem:[#allocation63_spill] sm:$0xff] %v3540_v16  ;;  %4493 = vst [vmem:[#allocation64_spill] sm:$0xff] %v3542_v38 }
 0x18f   :  { %v3544_v39 = vpop.f32.mrb[8].mxu0  ;;  %v3546_v42 = vpop.f32.mrb[8].mxu1 }
 0x190   :  { %4494 = vst [vmem:[#allocation65_spill] sm:$0xff] %v3544_v39  ;;  %4495 = vst [vmem:[#allocation66_spill] sm:$0xff] %v3546_v42  ;;  %v3548_v19 = vpop.f32.mrb[9].mxu0  ;;  %v3550_v22 = vpop.f32.mrb[9].mxu1 }
 0x191   :  { %4496 = vst [vmem:[#allocation67_spill] sm:$0xff] %v3548_v19  ;;  %4497 = vst [vmem:[#allocation68_spill] sm:$0xff] %v3550_v22 }
 0x193   :  { %v3552_v29 = vpop.f32.mrb[10].mxu0  ;;  %v3554_v32 = vpop.f32.mrb[10].mxu1 }
 0x194   :  { %4498 = vst [vmem:[#allocation69_spill] sm:$0xff] %v3552_v29  ;;  %4499 = vst [vmem:[#allocation70_spill] sm:$0xff] %v3554_v32  ;;  %v3556_v36 = vpop.f32.mrb[11].mxu0  ;;  %v3558_v37 = vpop.f32.mrb[11].mxu1 }
 0x195   :  { %4500 = vst [vmem:[#allocation71_spill] sm:$0xff] %v3556_v36  ;;  %4501 = vst [vmem:[#allocation72_spill] sm:$0xff] %v3558_v37 }
 0x197   :  { %v3560_v17 = vpop.f32.mrb[12].mxu0  ;;  %v3562_v16 = vpop.f32.mrb[12].mxu1 }
 0x198   :  { %4502 = vst [vmem:[#allocation73_spill] sm:$0xff] %v3560_v17  ;;  %4503 = vst [vmem:[#allocation74_spill] sm:$0xff] %v3562_v16  ;;  %v3564_v38 = vpop.f32.mrb[13].mxu0  ;;  %v3566_v39 = vpop.f32.mrb[13].mxu1 }
 0x199   :  { %4504 = vst [vmem:[#allocation75_spill] sm:$0xff] %v3564_v38  ;;  %4505 = vst [vmem:[#allocation76_spill] sm:$0xff] %v3566_v39  ;;  %v3577_v38 = vshrl.u32 %v4510_v61, 7 }
 0x19b   :  { %v3568_v42 = vpop.f32.mrb[14].mxu0  ;;  %v3570_v19 = vpop.f32.mrb[14].mxu1  ;;  %vm487_vm9 = vcmp.lt.s32.totalorder %v3577_v38, 2 }
 0x19c   :  { %4506 = vst [vmem:[#allocation77_spill] sm:$0xff] %v3568_v42  ;;  %4507 = vst [vmem:[#allocation78_spill] sm:$0xff] %v3570_v19  ;;  %v3572_v22 = vpop.f32.mrb[15].mxu0  ;;  %v3574_v29 = vpop.f32.mrb[15].mxu1 }
 0x19d   :  { %4508 = vst [vmem:[#allocation79_spill] sm:$0xff] %v3572_v22  ;;  %4509 = vst [vmem:[#allocation80_spill] sm:$0xff] %v3574_v29 }
 0x19f   :  { %v846_v32 = vpop.f32.mrb[16].mxu0  ;;  %v887_v36 = vpop.f32.mrb[16].mxu1 }
 0x1a0   :  { %v848_v8 = vpop.f32.mrb[17].mxu0  ;;  %v889_v37 = vpop.f32.mrb[17].mxu1 }
 0x1a1   :  { %v850_v7 = vpop.f32.mrb[18].mxu0  ;;  %v891_v17 = vpop.f32.mrb[18].mxu1 }
 0x1a2   :  { %v851_v63 = vpop.f32.mrb[19].mxu0  ;;  %v892_v16 = vpop.f32.mrb[19].mxu1 }
 0x1bf   :  { %v928_v42 = vpop.f32.mrb[20].mxu0  ;;  %v969_v39 = vpop.f32.mrb[20].mxu1 }
 0x1c0   :  { %v976_v22 = vsel %vm487_vm9, %v846_v32, %v928_v42  ;;  %v978_v29 = vsel %vm487_vm9, %v887_v36, %v969_v39  ;;  %v930_v19 = vpop.f32.mrb[21].mxu0  ;;  %v971_v54 = vpop.f32.mrb[21].mxu1 }
 0x1c1   :  { %v980_v53 = vadd.f32 %v976_v22, %v229_v4  ;;  %v982_v7 = vadd.f32 %v978_v29, %v342_v18  ;;  %v977_v63 = vsel %vm487_vm9, %v848_v8, %v930_v19  ;;  %v979_v61 = vsel %vm487_vm9, %v889_v37, %v971_v54  ;;  %v932_v16 = vpop.f32.mrb[22].mxu0  ;;  %v973_v17 = vpop.f32.mrb[22].mxu1 }
 0x1c2   :  { %v981_v51 = vadd.f32 %v977_v63, %v231_v25  ;;  %v983_v50 = vadd.f32 %v979_v61, %v344_v35  ;;  %v933_v44 = vpop.f32.mrb[23].mxu0  ;;  %v974_v43 = vpop.f32.mrb[23].mxu1 }
 0x1c3   :  { %v984_v32 = vmul.f32 0.5, %v980_v53  ;;  %v3144_v43 = vmov 1966171168  }
 0x1c4   :  { %v988_v42 = vmul.f32 0.5, %v981_v51  ;;  %v993_v36 = vmul.f32 0.5, %v983_v50  ;;  %v2369_v44 = vunpack.c.l.s4 %v3144_v43  ;;  %v4517_v43 = vld [vmem:[#allocation49_spill] sm:$0xff] }
 0x1c5   :  { %2940 = vtanh.f32 %v984_v32  ;;  %v3596_v32 = vsub.s32 0, %v3577_v38 }
 0x1c6   :  { %2942 = vtanh.f32 %v988_v42  ;;  %v2370_v53 = vunpack.c.0.s8 %v2369_v44  ;;  %v4518_v44 = vld [vmem:[#allocation50_spill] sm:$0xff] }
 0x1c7   :  { %2944 = vtanh.f32 %v982_v7 }
 0x1c8   :  { %2946 = vtanh.f32 %v993_v36  ;;  %v3592_v50 = vsub.s32 %v2370_v53, %v3577_v38  ;;  %v4520_v53 = vld [vmem:[#allocation52_spill] sm:$0xff] }
 0x1cf   :  { %v2941_v22 = vpop.eup %2940 }
 0x1d0   :  { %v2943_v29 = vpop.eup %2942  ;;  %v986_v4 = vmul.f32 0.5, %v2941_v22 }
 0x1d1   :  { %v990_v18 = vmul.f32 0.5, %v2943_v29  ;;  %v2945_v19 = vpop.eup %2944 }
 0x1d2   :  { %v987_v8 = vadd.f32 0.5, %v986_v4  ;;  %v2947_v51 = vpop.eup %2946 }
 0x1d3   :  { %v991_v54 = vadd.f32 0.5, %v990_v18  ;;  %v995_v35 = vmul.f32 0.5, %v2947_v51  ;;  %v4519_v51 = vld [vmem:[#allocation51_spill] sm:$0xff] }
 0x1d4   :  { %v998_v37 = vmul.f32 %v2945_v19, %v987_v8  ;;  %v4513_v19 = vld [vmem:[#allocation45_spill] sm:$0xff] }
 0x1d5   :  { %v997_v39 = vmul.f32 0.0, %v991_v54  ;;  %v996_v7 = vadd.f32 0.5, %v995_v35  ;;  %v4514_v54 = vld [vmem:[#allocation46_spill] sm:$0xff]  ;;  %v4521_v35 = vld [vmem:[#allocation27_spill] sm:$0xff] }
 0x1d7   :  { %v3588_v25 = vadd.f32 %v998_v37, %v997_v39  ;;  %v4515_v37 = vld [vmem:[#allocation47_spill] sm:$0xff]  ;;  %v4516_v39 = vld [vmem:[#allocation48_spill] sm:$0xff] }
 0x1d9   :  { %2948 = vtanh.f32 %v3588_v25 }
 0x1e3   :  { %v2949_v63 = vpop.eup %2948 }
 0x1e4   :  { %v1001_v61 = vmul.f32 %v2949_v63, %v996_v7  ;;  %v4522_v7 = vld [vmem:[#allocation28_spill] sm:$0xff]  ;;  %v4523_v63 = vld [vmem:[#allocation29_spill] sm:$0xff] }
 0x1e6   :  { %v2374_v16 = vrot.slane %v1001_v61, %v3592_v50  ;;  %v1006_v17 = vpack.c.bf16 %v1001_v61, %v1001_v61  ;;  %v4524_v61 = vld [vmem:[#allocation30_spill] sm:$0xff] }
 0x1e8   :  { %v2375_v42 = vcombine.high %v2374_v16, %v2374_v16  ;;  %v3599_v36 = vrot.slane %v2374_v16, %v3592_v50  ;;  %1040 = vmatmul.mubr.bf16.vlgmr.msra.gmra.mrb[24].mxu0 %v1006_v17  ;;  %1081 = vmatmul.mubr.bf16.vlgmr.msra.gmra.mrb[24].mxu1 %v1006_v17  ;;  %v4525_v16 = vld [vmem:[#allocation31_spill] sm:$0xff] }
 0x1e9   :  { %1090 = vmatpush1.bf16.msra.mxu0 %v3384_v1  ;;  %1131 = vmatpush1.bf16.msra.mxu1 %v3386_v45 }
 0x1ea   :  { %v3604_v22 = vrot.slane %v2375_v42, %v3592_v50  ;;  %v2660_v29 = vcombine.high %v3599_v36, %v3599_v36  ;;  %1091 = vmatprep.subr.bf16.mxu0 %v3390_v46  ;;  %1132 = vmatprep.subr.bf16.mxu1 %v3392_v47  ;;  %v4527_v42 = vld [vmem:[#allocation33_spill] sm:$0xff] }
 0x1eb   :  { %1121 = vmatprep.mubr.bf16.mxu0 %v4481_v0  ;;  %1162 = vmatprep.mubr.bf16.mxu1 %v4481_v0 }
 0x1ec   :  { %v2661_v4 = vcombine.high %v3604_v22, %v3604_v22  ;;  %v3615_v18 = vrot.slane %v2660_v29, %v3596_v32  ;;  %v4528_v29 = vld [vmem:[#allocation34_spill] sm:$0xff] }
 0x1ed   :  { %1092 = vmatpush1.bf16.msra.mxu0 %v3400_v56  ;;  %1133 = vmatpush1.bf16.msra.mxu1 %v3402_v57 }
 0x1ee   :  { %4511 = vst [vmem:[#allocation81_spill] sm:$0xff] %v3615_v18  ;;  %v3620_v8 = vrot.slane %v2661_v4, %v3596_v32  ;;  %1093 = vmatprep.subr.bf16.mxu0 %v3406_v58  ;;  %1134 = vmatprep.subr.bf16.mxu1 %v3408_v59  ;;  %v4529_v4 = vld [vmem:[#allocation35_spill] sm:$0xff]  ;;  %v4531_v18 = vld [vmem:[#allocation37_spill] sm:$0xff] }
 0x1f0   :  { %4512 = vst [vmem:[#allocation82_spill] sm:$0xff] %v3620_v8  ;;  %v4530_v8 = vld [vmem:[#allocation36_spill] sm:$0xff] }
 0x1f1   :  { %1094 = vmatpush1.bf16.msra.mxu0 %v3414_v14  ;;  %1135 = vmatpush1.bf16.msra.mxu1 %v3416_v15 }
 0x1f2   :  { %1095 = vmatprep.subr.bf16.mxu0 %v4513_v19  ;;  %1136 = vmatprep.subr.bf16.mxu1 %v4514_v54 }
 0x1f5   :  { %1096 = vmatpush1.bf16.msra.mxu0 %v4515_v37  ;;  %1137 = vmatpush1.bf16.msra.mxu1 %v4516_v39 }
 0x1f6   :  { %1097 = vmatprep.subr.bf16.mxu0 %v4517_v43  ;;  %1138 = vmatprep.subr.bf16.mxu1 %v4518_v44 }
 0x1f9   :  { %1098 = vmatpush1.bf16.msra.mxu0 %v3438_v6  ;;  %1139 = vmatpush1.bf16.msra.mxu1 %v3440_v9 }
 0x1fa   :  { %1099 = vmatprep.subr.bf16.mxu0 %v3444_v10  ;;  %1140 = vmatprep.subr.bf16.mxu1 %v4519_v51 }
 0x1fd   :  { %1100 = vmatpush1.bf16.msra.mxu0 %v4520_v53  ;;  %1141 = vmatpush1.bf16.msra.mxu1 %v3452_v27 }
 0x1fe   :  { %1101 = vmatprep.subr.bf16.mxu0 %v3456_v28  ;;  %1142 = vmatprep.subr.bf16.mxu1 %v3458_v5 }
 0x201   :  { %1102 = vmatpush1.bf16.msra.mxu0 %v3462_v48  ;;  %1143 = vmatpush1.bf16.msra.mxu1 %v3464_v49 }
 0x202   :  { %1103 = vmatprep.subr.bf16.mxu0 %v3468_v52  ;;  %1144 = vmatprep.subr.bf16.mxu1 %v3470_v55 }
 0x205   :  { %1104 = vmatpush1.bf16.msra.mxu0 %v3474_v11  ;;  %1145 = vmatpush1.bf16.msra.mxu1 %v3476_v26 }
 0x206   :  { %1202 = vmatprep.subr.bf16.mxu0 %v3239_v2  ;;  %1243 = vmatprep.subr.bf16.mxu1 %v3241_v3 }
 0x208   :  { %1122 = vmatmul.mubr.bf16.vlgmr.msra.gmra.mrb[28].mxu0 %v1006_v17  ;;  %1163 = vmatmul.mubr.bf16.vlgmr.msra.gmra.mrb[28].mxu1 %v1006_v17  ;;  %v4526_v17 = vld [vmem:[#allocation32_spill] sm:$0xff] }
 0x209   :  { %1203 = vmatpush1.bf16.msra.mxu0 %v3235_v60  ;;  %1244 = vmatpush1.bf16.msra.mxu1 %v3237_v62 }
 0x20a   :  { %1204 = vmatprep.subr.bf16.mxu0 %v3250_v12  ;;  %1245 = vmatprep.subr.bf16.mxu1 %v3252_v13 }
 0x20b   :  { %1234 = vmatprep.mubr.bf16.mxu0 %v4481_v0  ;;  %1275 = vmatprep.mubr.bf16.mxu1 %v4481_v0 }
 0x20d   :  { %1205 = vmatpush1.bf16.msra.mxu0 %v3258_v20  ;;  %1246 = vmatpush1.bf16.msra.mxu1 %v3260_v21 }
 0x20e   :  { %1206 = vmatprep.subr.bf16.mxu0 %v3269_v23  ;;  %1247 = vmatprep.subr.bf16.mxu1 %v3271_v24  ;;  %v4541_v23 = vld [vmem:[#allocation55_spill] sm:$0xff] }
 0x211   :  { %1207 = vmatpush1.bf16.msra.mxu0 %v3278_v30  ;;  %1248 = vmatpush1.bf16.msra.mxu1 %v3280_v31  ;;  %v4539_v31 = vld [vmem:[#allocation53_spill] sm:$0xff]  ;;  %v4540_v30 = vld [vmem:[#allocation54_spill] sm:$0xff] }
 0x212   :  { %1208 = vmatprep.subr.bf16.mxu0 %v3286_v33  ;;  %1249 = vmatprep.subr.bf16.mxu1 %v3288_v34 }
 0x215   :  { %1209 = vmatpush1.bf16.msra.mxu0 %v3295_v40  ;;  %1250 = vmatpush1.bf16.msra.mxu1 %v3297_v41 }
 0x216   :  { %1210 = vmatprep.subr.bf16.mxu0 %v4521_v35  ;;  %1251 = vmatprep.subr.bf16.mxu1 %v4522_v7  ;;  %v4532_v35 = vld [vmem:[#allocation38_spill] sm:$0xff]  ;;  %v4533_v7 = vld [vmem:[#allocation39_spill] sm:$0xff] }
 0x219   :  { %1211 = vmatpush1.bf16.msra.mxu0 %v4523_v63  ;;  %1252 = vmatpush1.bf16.msra.mxu1 %v4524_v61  ;;  %v4534_v63 = vld [vmem:[#allocation40_spill] sm:$0xff]  ;;  %v4535_v61 = vld [vmem:[#allocation41_spill] sm:$0xff] }
 0x21a   :  { %1212 = vmatprep.subr.bf16.mxu0 %v4525_v16  ;;  %1253 = vmatprep.subr.bf16.mxu1 %v4526_v17  ;;  %v4536_v16 = vld [vmem:[#allocation42_spill] sm:$0xff]  ;;  %v4537_v17 = vld [vmem:[#allocation43_spill] sm:$0xff] }
 0x21d   :  { %1213 = vmatpush1.bf16.msra.mxu0 %v4527_v42  ;;  %1254 = vmatpush1.bf16.msra.mxu1 %v4528_v29  ;;  %v4538_v42 = vld [vmem:[#allocation44_spill] sm:$0xff] }
 0x21e   :  { %1214 = vmatprep.subr.bf16.mxu0 %v4529_v4  ;;  %1255 = vmatprep.subr.bf16.mxu1 %v4530_v8 }
 0x221   :  { %1215 = vmatpush1.bf16.msra.mxu0 %v4531_v18  ;;  %1256 = vmatpush1.bf16.msra.mxu1 %v4532_v35 }
 0x222   :  { %1216 = vmatprep.subr.bf16.mxu0 %v4533_v7  ;;  %1257 = vmatprep.subr.bf16.mxu1 %v4534_v63 }
 0x225   :  { %1217 = vmatpush1.bf16.msra.mxu0 %v4535_v61  ;;  %1258 = vmatpush1.bf16.msra.mxu1 %v4536_v16 }
 0x226   :  { %1284 = vmatprep.subr.bf16.mxu0 %v4537_v17  ;;  %1325 = vmatprep.subr.bf16.mxu1 %v4538_v42 }
 0x2bb   :  { %v1041_v29 = vpop.f32.mrb[24].mxu0  ;;  %v1082_v4 = vpop.f32.mrb[24].mxu1 }
 0x2bc   :  { %v1043_v41 = vpop.f32.mrb[25].mxu0  ;;  %v1084_v8 = vpop.f32.mrb[25].mxu1 }
 0x2bd   :  { %v1045_v40 = vpop.f32.mrb[26].mxu0  ;;  %v1086_v18 = vpop.f32.mrb[26].mxu1 }
 0x2be   :  { %v1046_v34 = vpop.f32.mrb[27].mxu0  ;;  %v1087_v35 = vpop.f32.mrb[27].mxu1 }
 0x2db   :  { %v1123_v33 = vpop.f32.mrb[28].mxu0  ;;  %v1164_v7 = vpop.f32.mrb[28].mxu1 }
 0x2dc   :  { %v1171_v63 = vsel %vm487_vm9, %v1041_v29, %v1123_v33  ;;  %v1173_v16 = vsel %vm487_vm9, %v1082_v4, %v1164_v7  ;;  %v1125_v61 = vpop.f32.mrb[29].mxu0  ;;  %v1166_v17 = vpop.f32.mrb[29].mxu1  ;;  %v4542_v33 = vld [vmem:[#allocation56_spill] sm:$0xff] }
 0x2dd   :  { %v1175_v42 = vadd.f32 %v1171_v63, %v4539_v31  ;;  %v1177_v24 = vadd.f32 %v1173_v16, %v4540_v30  ;;  %v1172_v40 = vsel %vm487_vm9, %v1043_v41, %v1125_v61  ;;  %v1174_v34 = vsel %vm487_vm9, %v1084_v8, %v1166_v17  ;;  %v1127_v18 = vpop.f32.mrb[30].mxu0  ;;  %v1168_v35 = vpop.f32.mrb[30].mxu1 }
 0x2de   :  { %v1176_v21 = vadd.f32 %v1172_v40, %v4541_v23  ;;  %v1178_v29 = vadd.f32 %v1174_v34, %v4542_v33  ;;  %v1128_v20 = vpop.f32.mrb[31].mxu0  ;;  %v1169_v7 = vpop.f32.mrb[31].mxu1 }
 0x2df   :  { %v1179_v4 = vmul.f32 0.5, %v1175_v42 }
 0x2e0   :  { %v1183_v13 = vmul.f32 0.5, %v1176_v21  ;;  %v1188_v30 = vmul.f32 0.5, %v1178_v29 }
 0x2e1   :  { %2950 = vtanh.f32 %v1179_v4 }
 0x2e2   :  { %2952 = vtanh.f32 %v1183_v13 }
 0x2e3   :  { %2954 = vtanh.f32 %v1177_v24 }
 0x2e4   :  { %2956 = vtanh.f32 %v1188_v30 }
 0x2eb   :  { %v2951_v31 = vpop.eup %2950 }
 0x2ec   :  { %v2953_v63 = vpop.eup %2952  ;;  %v1181_v41 = vmul.f32 0.5, %v2951_v31 }
 0x2ed   :  { %v1185_v61 = vmul.f32 0.5, %v2953_v63  ;;  %v2955_v16 = vpop.eup %2954 }
 0x2ee   :  { %v1182_v8 = vadd.f32 0.5, %v1181_v41  ;;  %v2957_v20 = vpop.eup %2956 }
 0x2ef   :  { %v1186_v17 = vadd.f32 0.5, %v1185_v61  ;;  %v1190_v21 = vmul.f32 0.5, %v2957_v20  ;;  %v4551_v20 = vld [vmem:[#allocation22_spill] sm:$0xff] }
 0x2f0   :  { %v1193_v18 = vmul.f32 %v2955_v16, %v1182_v8  ;;  %v4547_v16 = vld [vmem:[#allocation18_spill] sm:$0xff] }
 0x2f1   :  { %v1192_v23 = vmul.f32 %v1186_v17, %v3588_v25  ;;  %v1191_v13 = vadd.f32 0.5, %v1190_v21  ;;  %v4548_v17 = vld [vmem:[#allocation19_spill] sm:$0xff] }
 0x2f2   :  { %v4552_v21 = vld [vmem:[#allocation23_spill] sm:$0xff] }
 0x2f3   :  { %v3695_v40 = vadd.f32 %v1193_v18, %v1192_v23  ;;  %v4549_v18 = vld [vmem:[#allocation20_spill] sm:$0xff]  ;;  %v4550_v23 = vld [vmem:[#allocation21_spill] sm:$0xff] }
 0x2f5   :  { %2958 = vtanh.f32 %v3695_v40 }
 0x2ff   :  { %v2959_v24 = vpop.eup %2958 }
 0x300   :  { %v1196_v42 = vmul.f32 %v2959_v24, %v1191_v13  ;;  %v4553_v13 = vld [vmem:[#allocation24_spill] sm:$0xff]  ;;  %v4554_v24 = vld [vmem:[#allocation25_spill] sm:$0xff] }
 0x302   :  { %v2399_v34 = vrot.slane %v1196_v42, %v3592_v50  ;;  %v1201_v35 = vpack.c.bf16 %v1196_v42, %v1196_v42  ;;  %v4555_v42 = vld [vmem:[#allocation26_spill] sm:$0xff] }
 0x304   :  { %v2400_v33 = vcombine.high %v2399_v34, %v2399_v34  ;;  %v2407_v29 = vrot.slane %v2399_v34, %v3592_v50  ;;  %1235 = vmatmul.mubr.bf16.vlgmr.msra.gmra.mrb[32].mxu0 %v1201_v35  ;;  %1276 = vmatmul.mubr.bf16.vlgmr.msra.gmra.mrb[32].mxu1 %v1201_v35  ;;  %v4556_v34 = vld [vmem:[#allocation27_spill] sm:$0xff] }
 0x305   :  { %1285 = vmatpush1.bf16.msra.mxu0 %v3384_v1  ;;  %1326 = vmatpush1.bf16.msra.mxu1 %v3386_v45 }
 0x306   :  { %v2414_v25 = vrot.slane %v2400_v33, %v3592_v50  ;;  %v2556_v7 = vrot.slane %v2407_v29, %v3596_v32  ;;  %v2658_v4 = vcombine.high %v2407_v29, %v2407_v29  ;;  %1286 = vmatprep.subr.bf16.mxu0 %v3390_v46  ;;  %1327 = vmatprep.subr.bf16.mxu1 %v3392_v47  ;;  %v4558_v33 = vld [vmem:[#allocation29_spill] sm:$0xff]  ;;  %v4559_v29 = vld [vmem:[#allocation30_spill] sm:$0xff] }
 0x307   :  { %1316 = vmatprep.mubr.bf16.mxu0 %v4481_v0  ;;  %1357 = vmatprep.mubr.bf16.mxu1 %v4481_v0 }
 0x308   :  { %v2560_v30 = vrot.slane %v2414_v25, %v3596_v32  ;;  %v3711_v31 = vsel %vm2623_vm10, %v3599_v36, %v2556_v7  ;;  %v2659_v63 = vcombine.high %v2414_v25, %v2414_v25  ;;  %v3714_v41 = vrot.slane %v2658_v4, %v3596_v32  ;;  %v4545_v36 = vld [vmem:[#allocation16_spill] sm:$0xff]  ;;  %v4560_v25 = vld [vmem:[#allocation31_spill] sm:$0xff]  ;;  %v4562_v4 = vld [vmem:[#allocation33_spill] sm:$0xff] }
 0x309   :  { %1287 = vmatpush1.bf16.msra.mxu0 %v3400_v56  ;;  %1328 = vmatpush1.bf16.msra.mxu1 %v3402_v57  ;;  %v4561_v7 = vld [vmem:[#allocation32_spill] sm:$0xff] }
 0x30a   :  { %4543 = vst [vmem:[#allocation45_spill] sm:$0xff] %v3714_v41  ;;  %v3720_v61 = vsel %vm2623_vm10, %v3604_v22, %v2560_v30  ;;  %v3723_v8 = vrot.slane %v2659_v63, %v3596_v32  ;;  %1288 = vmatprep.subr.bf16.mxu0 %v3406_v58  ;;  %1329 = vmatprep.subr.bf16.mxu1 %v3408_v59  ;;  %v4546_v22 = vld [vmem:[#allocation17_spill] sm:$0xff]  ;;  %v4563_v30 = vld [vmem:[#allocation34_spill] sm:$0xff]  ;;  %v4564_v63 = vld [vmem:[#allocation35_spill] sm:$0xff] }
 0x30b   :  { %v4566_v41 = vld [vmem:[#allocation37_spill] sm:$0xff] }
 0x30c   :  { %4544 = vst [vmem:[#allocation46_spill] sm:$0xff] %v3723_v8  ;;  %v4565_v8 = vld [vmem:[#allocation36_spill] sm:$0xff] }
 0x30d   :  { %1289 = vmatpush1.bf16.msra.mxu0 %v3414_v14  ;;  %1330 = vmatpush1.bf16.msra.mxu1 %v3416_v15 }
 0x30e   :  { %1290 = vmatprep.subr.bf16.mxu0 %v4513_v19  ;;  %1331 = vmatprep.subr.bf16.mxu1 %v4514_v54 }
 0x311   :  { %1291 = vmatpush1.bf16.msra.mxu0 %v4515_v37  ;;  %1332 = vmatpush1.bf16.msra.mxu1 %v4516_v39 }
 0x312   :  { %1292 = vmatprep.subr.bf16.mxu0 %v4517_v43  ;;  %1333 = vmatprep.subr.bf16.mxu1 %v4518_v44 }
 0x315   :  { %1293 = vmatpush1.bf16.msra.mxu0 %v3438_v6  ;;  %1334 = vmatpush1.bf16.msra.mxu1 %v3440_v9 }
 0x316   :  { %1294 = vmatprep.subr.bf16.mxu0 %v3444_v10  ;;  %1335 = vmatprep.subr.bf16.mxu1 %v4519_v51 }
 0x319   :  { %1295 = vmatpush1.bf16.msra.mxu0 %v4520_v53  ;;  %1336 = vmatpush1.bf16.msra.mxu1 %v3452_v27 }
 0x31a   :  { %1296 = vmatprep.subr.bf16.mxu0 %v3456_v28  ;;  %1337 = vmatprep.subr.bf16.mxu1 %v3458_v5 }
 0x31d   :  { %1297 = vmatpush1.bf16.msra.mxu0 %v3462_v48  ;;  %1338 = vmatpush1.bf16.msra.mxu1 %v3464_v49 }
 0x31e   :  { %1298 = vmatprep.subr.bf16.mxu0 %v3468_v52  ;;  %1339 = vmatprep.subr.bf16.mxu1 %v3470_v55 }
 0x321   :  { %1299 = vmatpush1.bf16.msra.mxu0 %v3474_v11  ;;  %1340 = vmatpush1.bf16.msra.mxu1 %v3476_v26 }
 0x322   :  { %1397 = vmatprep.subr.bf16.mxu0 %v3239_v2  ;;  %1438 = vmatprep.subr.bf16.mxu1 %v3241_v3 }
 0x324   :  { %1317 = vmatmul.mubr.bf16.vlgmr.msra.gmra.mrb[36].mxu0 %v1201_v35  ;;  %1358 = vmatmul.mubr.bf16.vlgmr.msra.gmra.mrb[36].mxu1 %v1201_v35  ;;  %v4557_v35 = vld [vmem:[#allocation28_spill] sm:$0xff] }
 0x325   :  { %1398 = vmatpush1.bf16.msra.mxu0 %v3235_v60  ;;  %1439 = vmatpush1.bf16.msra.mxu1 %v3237_v62 }
 0x326   :  { %1399 = vmatprep.subr.bf16.mxu0 %v3250_v12  ;;  %1440 = vmatprep.subr.bf16.mxu1 %v4545_v36 }
 0x327   :  { %1429 = vmatprep.mubr.bf16.mxu0 %v4481_v0  ;;  %1470 = vmatprep.mubr.bf16.mxu1 %v4481_v0 }
 0x329   :  { %1400 = vmatpush1.bf16.msra.mxu0 %v4546_v22  ;;  %1441 = vmatpush1.bf16.msra.mxu1 %v4547_v16 }
 0x32a   :  { %1401 = vmatprep.subr.bf16.mxu0 %v4548_v17  ;;  %1442 = vmatprep.subr.bf16.mxu1 %v4549_v18  ;;  %v4576_v17 = vld [vmem:[#allocation59_spill] sm:$0xff] }
 0x32d   :  { %1402 = vmatpush1.bf16.msra.mxu0 %v4550_v23  ;;  %1443 = vmatpush1.bf16.msra.mxu1 %v4551_v20  ;;  %v4574_v20 = vld [vmem:[#allocation57_spill] sm:$0xff]  ;;  %v4575_v23 = vld [vmem:[#allocation58_spill] sm:$0xff] }
 0x32e   :  { %1403 = vmatprep.subr.bf16.mxu0 %v4552_v21  ;;  %1444 = vmatprep.subr.bf16.mxu1 %v4553_v13 }
 0x331   :  { %1404 = vmatpush1.bf16.msra.mxu0 %v4554_v24  ;;  %1445 = vmatpush1.bf16.msra.mxu1 %v4555_v42 }
 0x332   :  { %1405 = vmatprep.subr.bf16.mxu0 %v4556_v34  ;;  %1446 = vmatprep.subr.bf16.mxu1 %v4557_v35  ;;  %v4567_v34 = vld [vmem:[#allocation38_spill] sm:$0xff]  ;;  %v4568_v35 = vld [vmem:[#allocation39_spill] sm:$0xff] }
 0x335   :  { %1406 = vmatpush1.bf16.msra.mxu0 %v4558_v33  ;;  %1447 = vmatpush1.bf16.msra.mxu1 %v4559_v29  ;;  %v4569_v33 = vld [vmem:[#allocation40_spill] sm:$0xff]  ;;  %v4570_v29 = vld [vmem:[#allocation41_spill] sm:$0xff] }
 0x336   :  { %1407 = vmatprep.subr.bf16.mxu0 %v4560_v25  ;;  %1448 = vmatprep.subr.bf16.mxu1 %v4561_v7  ;;  %v4571_v25 = vld [vmem:[#allocation42_spill] sm:$0xff]  ;;  %v4572_v7 = vld [vmem:[#allocation43_spill] sm:$0xff] }
 0x339   :  { %1408 = vmatpush1.bf16.msra.mxu0 %v4562_v4  ;;  %1449 = vmatpush1.bf16.msra.mxu1 %v4563_v30  ;;  %v4573_v4 = vld [vmem:[#allocation44_spill] sm:$0xff] }
 0x33a   :  { %1409 = vmatprep.subr.bf16.mxu0 %v4564_v63  ;;  %1450 = vmatprep.subr.bf16.mxu1 %v4565_v8 }
 0x33d   :  { %1410 = vmatpush1.bf16.msra.mxu0 %v4566_v41  ;;  %1451 = vmatpush1.bf16.msra.mxu1 %v4567_v34 }
 0x33e   :  { %1411 = vmatprep.subr.bf16.mxu0 %v4568_v35  ;;  %1452 = vmatprep.subr.bf16.mxu1 %v4569_v33 }
 0x341   :  { %1412 = vmatpush1.bf16.msra.mxu0 %v4570_v29  ;;  %1453 = vmatpush1.bf16.msra.mxu1 %v4571_v25 }
 0x342   :  { %1479 = vmatprep.subr.bf16.mxu0 %v4572_v7  ;;  %1520 = vmatprep.subr.bf16.mxu1 %v4573_v4 }
 0x3d7   :  { %v1236_v30 = vpop.f32.mrb[32].mxu0  ;;  %v1277_v63 = vpop.f32.mrb[32].mxu1 }
 0x3d8   :  { %v1238_v42 = vpop.f32.mrb[33].mxu0  ;;  %v1279_v8 = vpop.f32.mrb[33].mxu1 }
 0x3d9   :  { %v1240_v24 = vpop.f32.mrb[34].mxu0  ;;  %v1281_v41 = vpop.f32.mrb[34].mxu1 }
 0x3da   :  { %v1241_v13 = vpop.f32.mrb[35].mxu0  ;;  %v1282_v34 = vpop.f32.mrb[35].mxu1 }
 0x3f7   :  { %v1318_v21 = vpop.f32.mrb[36].mxu0  ;;  %v1359_v35 = vpop.f32.mrb[36].mxu1 }
 0x3f8   :  { %v1366_v33 = vsel %vm487_vm9, %v1236_v30, %v1318_v21  ;;  %v1368_v25 = vsel %vm487_vm9, %v1277_v63, %v1359_v35  ;;  %v1320_v29 = vpop.f32.mrb[37].mxu0  ;;  %v1361_v7 = vpop.f32.mrb[37].mxu1  ;;  %v4577_v21 = vld [vmem:[#allocation60_spill] sm:$0xff] }
 0x3f9   :  { %v1370_v4 = vadd.f32 %v1366_v33, %v4574_v20  ;;  %v1372_v18 = vadd.f32 %v1368_v25, %v4575_v23  ;;  %v1367_v24 = vsel %vm487_vm9, %v1238_v42, %v1320_v29  ;;  %v1369_v41 = vsel %vm487_vm9, %v1279_v8, %v1361_v7  ;;  %v1322_v13 = vpop.f32.mrb[38].mxu0  ;;  %v1363_v34 = vpop.f32.mrb[38].mxu1 }
 0x3fa   :  { %v1371_v16 = vadd.f32 %v1367_v24, %v4576_v17  ;;  %v1373_v30 = vadd.f32 %v1369_v41, %v4577_v21  ;;  %v1323_v22 = vpop.f32.mrb[39].mxu0  ;;  %v1364_v35 = vpop.f32.mrb[39].mxu1 }
 0x3fb   :  { %v1374_v63 = vmul.f32 0.5, %v1370_v4 }
 0x3fc   :  { %v1378_v36 = vmul.f32 0.5, %v1371_v16  ;;  %v1383_v23 = vmul.f32 0.5, %v1373_v30 }
 0x3fd   :  { %2960 = vtanh.f32 %v1374_v63 }
 0x3fe   :  { %2962 = vtanh.f32 %v1378_v36 }
 0x3ff   :  { %2964 = vtanh.f32 %v1372_v18 }
 0x400   :  { %2966 = vtanh.f32 %v1383_v23 }
 0x407   :  { %v2961_v20 = vpop.eup %2960 }
 0x408   :  { %v2963_v33 = vpop.eup %2962  ;;  %v1376_v42 = vmul.f32 0.5, %v2961_v20 }
 0x409   :  { %v1380_v29 = vmul.f32 0.5, %v2963_v33  ;;  %v2965_v25 = vpop.eup %2964 }
 0x40a   :  { %v1377_v8 = vadd.f32 0.5, %v1376_v42  ;;  %v2967_v22 = vpop.eup %2966 }
 0x40b   :  { %v1381_v7 = vadd.f32 0.5, %v1380_v29  ;;  %v1385_v16 = vmul.f32 0.5, %v2967_v22  ;;  %v4586_v22 = vld [vmem:[#allocation22_spill] sm:$0xff] }
 0x40c   :  { %v1388_v13 = vmul.f32 %v2965_v25, %v1377_v8  ;;  %v4582_v25 = vld [vmem:[#allocation18_spill] sm:$0xff] }
 0x40d   :  { %v1387_v17 = vmul.f32 %v1381_v7, %v3695_v40  ;;  %v1386_v36 = vadd.f32 0.5, %v1385_v16  ;;  %v4583_v7 = vld [vmem:[#allocation19_spill] sm:$0xff] }
 0x40e   :  { %v4587_v16 = vld [vmem:[#allocation23_spill] sm:$0xff] }
 0x40f   :  { %v3798_v24 = vadd.f32 %v1388_v13, %v1387_v17  ;;  %v4584_v13 = vld [vmem:[#allocation20_spill] sm:$0xff]  ;;  %v4585_v17 = vld [vmem:[#allocation21_spill] sm:$0xff] }
 0x411   :  { %2968 = vtanh.f32 %v3798_v24 }
 0x41b   :  { %v2969_v18 = vpop.eup %2968 }
 0x41c   :  { %v1391_v4 = vmul.f32 %v2969_v18, %v1386_v36  ;;  %v4588_v36 = vld [vmem:[#allocation24_spill] sm:$0xff]  ;;  %v4589_v18 = vld [vmem:[#allocation25_spill] sm:$0xff] }
 0x41e   :  { %v2422_v41 = vrot.slane %v1391_v4, %v3592_v50  ;;  %v1396_v34 = vpack.c.bf16 %v1391_v4, %v1391_v4  ;;  %v4590_v4 = vld [vmem:[#allocation26_spill] sm:$0xff] }
 0x420   :  { %v2423_v21 = vcombine.high %v2422_v41, %v2422_v41  ;;  %v2430_v30 = vrot.slane %v2422_v41, %v3592_v50  ;;  %1430 = vmatmul.mubr.bf16.vlgmr.msra.gmra.mrb[40].mxu0 %v1396_v34  ;;  %1471 = vmatmul.mubr.bf16.vlgmr.msra.gmra.mrb[40].mxu1 %v1396_v34  ;;  %v4591_v41 = vld [vmem:[#allocation27_spill] sm:$0xff] }
 0x421   :  { %1480 = vmatpush1.bf16.msra.mxu0 %v3384_v1  ;;  %1521 = vmatpush1.bf16.msra.mxu1 %v3386_v45 }
 0x422   :  { %v2437_v40 = vrot.slane %v2423_v21, %v3592_v50  ;;  %v2566_v35 = vrot.slane %v2430_v30, %v3596_v32  ;;  %v2656_v63 = vcombine.high %v2430_v30, %v2430_v30  ;;  %1481 = vmatprep.subr.bf16.mxu0 %v3390_v46  ;;  %1522 = vmatprep.subr.bf16.mxu1 %v3392_v47  ;;  %v4593_v21 = vld [vmem:[#allocation29_spill] sm:$0xff]  ;;  %v4594_v30 = vld [vmem:[#allocation30_spill] sm:$0xff] }
 0x423   :  { %1511 = vmatprep.mubr.bf16.mxu0 %v4481_v0  ;;  %1552 = vmatprep.mubr.bf16.mxu1 %v4481_v0 }
 0x424   :  { %v2570_v23 = vrot.slane %v2437_v40, %v3596_v32  ;;  %v3814_v20 = vsel %vm2626_vm11, %v3711_v31, %v2566_v35  ;;  %v2657_v33 = vcombine.high %v2437_v40, %v2437_v40  ;;  %v3817_v42 = vrot.slane %v2656_v63, %v3596_v32  ;;  %v4580_v31 = vld [vmem:[#allocation16_spill] sm:$0xff]  ;;  %v4595_v40 = vld [vmem:[#allocation31_spill] sm:$0xff]  ;;  %v4597_v63 = vld [vmem:[#allocation33_spill] sm:$0xff] }
 0x425   :  { %1482 = vmatpush1.bf16.msra.mxu0 %v3400_v56  ;;  %1523 = vmatpush1.bf16.msra.mxu1 %v3402_v57  ;;  %v4596_v35 = vld [vmem:[#allocation32_spill] sm:$0xff] }
 0x426   :  { %4578 = vst [vmem:[#allocation47_spill] sm:$0xff] %v3817_v42  ;;  %v3823_v29 = vsel %vm2626_vm11, %v3720_v61, %v2570_v23  ;;  %v3826_v8 = vrot.slane %v2657_v33, %v3596_v32  ;;  %1483 = vmatprep.subr.bf16.mxu0 %v3406_v58  ;;  %1524 = vmatprep.subr.bf16.mxu1 %v3408_v59  ;;  %v4581_v61 = vld [vmem:[#allocation17_spill] sm:$0xff]  ;;  %v4598_v23 = vld [vmem:[#allocation34_spill] sm:$0xff]  ;;  %v4599_v33 = vld [vmem:[#allocation35_spill] sm:$0xff] }
 0x427   :  { %v4601_v42 = vld [vmem:[#allocation37_spill] sm:$0xff] }
 0x428   :  { %4579 = vst [vmem:[#allocation48_spill] sm:$0xff] %v3826_v8  ;;  %v4600_v8 = vld [vmem:[#allocation36_spill] sm:$0xff] }
 0x429   :  { %1484 = vmatpush1.bf16.msra.mxu0 %v3414_v14  ;;  %1525 = vmatpush1.bf16.msra.mxu1 %v3416_v15 }
 0x42a   :  { %1485 = vmatprep.subr.bf16.mxu0 %v4513_v19  ;;  %1526 = vmatprep.subr.bf16.mxu1 %v4514_v54 }
 0x42d   :  { %1486 = vmatpush1.bf16.msra.mxu0 %v4515_v37  ;;  %1527 = vmatpush1.bf16.msra.mxu1 %v4516_v39 }
 0x42e   :  { %1487 = vmatprep.subr.bf16.mxu0 %v4517_v43  ;;  %1528 = vmatprep.subr.bf16.mxu1 %v4518_v44 }
 0x431   :  { %1488 = vmatpush1.bf16.msra.mxu0 %v3438_v6  ;;  %1529 = vmatpush1.bf16.msra.mxu1 %v3440_v9 }
 0x432   :  { %1489 = vmatprep.subr.bf16.mxu0 %v3444_v10  ;;  %1530 = vmatprep.subr.bf16.mxu1 %v4519_v51 }
 0x435   :  { %1490 = vmatpush1.bf16.msra.mxu0 %v4520_v53  ;;  %1531 = vmatpush1.bf16.msra.mxu1 %v3452_v27 }
 0x436   :  { %1491 = vmatprep.subr.bf16.mxu0 %v3456_v28  ;;  %1532 = vmatprep.subr.bf16.mxu1 %v3458_v5 }
 0x439   :  { %1492 = vmatpush1.bf16.msra.mxu0 %v3462_v48  ;;  %1533 = vmatpush1.bf16.msra.mxu1 %v3464_v49 }
 0x43a   :  { %1493 = vmatprep.subr.bf16.mxu0 %v3468_v52  ;;  %1534 = vmatprep.subr.bf16.mxu1 %v3470_v55 }
 0x43d   :  { %1494 = vmatpush1.bf16.msra.mxu0 %v3474_v11  ;;  %1535 = vmatpush1.bf16.msra.mxu1 %v3476_v26 }
 0x43e   :  { %1592 = vmatprep.subr.bf16.mxu0 %v3239_v2  ;;  %1633 = vmatprep.subr.bf16.mxu1 %v3241_v3 }
 0x440   :  { %1512 = vmatmul.mubr.bf16.vlgmr.msra.gmra.mrb[44].mxu0 %v1396_v34  ;;  %1553 = vmatmul.mubr.bf16.vlgmr.msra.gmra.mrb[44].mxu1 %v1396_v34  ;;  %v4592_v34 = vld [vmem:[#allocation28_spill] sm:$0xff] }
 0x441   :  { %1593 = vmatpush1.bf16.msra.mxu0 %v3235_v60  ;;  %1634 = vmatpush1.bf16.msra.mxu1 %v3237_v62 }
 0x442   :  { %1594 = vmatprep.subr.bf16.mxu0 %v3250_v12  ;;  %1635 = vmatprep.subr.bf16.mxu1 %v4580_v31 }
 0x443   :  { %1624 = vmatprep.mubr.bf16.mxu0 %v4481_v0  ;;  %1665 = vmatprep.mubr.bf16.mxu1 %v4481_v0 }
 0x445   :  { %1595 = vmatpush1.bf16.msra.mxu0 %v4581_v61  ;;  %1636 = vmatpush1.bf16.msra.mxu1 %v4582_v25 }
 0x446   :  { %1596 = vmatprep.subr.bf16.mxu0 %v4583_v7  ;;  %1637 = vmatprep.subr.bf16.mxu1 %v4584_v13  ;;  %v4611_v7 = vld [vmem:[#allocation63_spill] sm:$0xff] }
 0x449   :  { %1597 = vmatpush1.bf16.msra.mxu0 %v4585_v17  ;;  %1638 = vmatpush1.bf16.msra.mxu1 %v4586_v22  ;;  %v4609_v22 = vld [vmem:[#allocation61_spill] sm:$0xff]  ;;  %v4610_v17 = vld [vmem:[#allocation62_spill] sm:$0xff] }
 0x44a   :  { %1598 = vmatprep.subr.bf16.mxu0 %v4587_v16  ;;  %1639 = vmatprep.subr.bf16.mxu1 %v4588_v36 }
 0x44d   :  { %1599 = vmatpush1.bf16.msra.mxu0 %v4589_v18  ;;  %1640 = vmatpush1.bf16.msra.mxu1 %v4590_v4 }
 0x44e   :  { %1600 = vmatprep.subr.bf16.mxu0 %v4591_v41  ;;  %1641 = vmatprep.subr.bf16.mxu1 %v4592_v34  ;;  %v4602_v41 = vld [vmem:[#allocation38_spill] sm:$0xff]  ;;  %v4603_v34 = vld [vmem:[#allocation39_spill] sm:$0xff] }
 0x451   :  { %1601 = vmatpush1.bf16.msra.mxu0 %v4593_v21  ;;  %1642 = vmatpush1.bf16.msra.mxu1 %v4594_v30  ;;  %v4604_v21 = vld [vmem:[#allocation40_spill] sm:$0xff]  ;;  %v4605_v30 = vld [vmem:[#allocation41_spill] sm:$0xff] }
 0x452   :  { %1602 = vmatprep.subr.bf16.mxu0 %v4595_v40  ;;  %1643 = vmatprep.subr.bf16.mxu1 %v4596_v35  ;;  %v4606_v40 = vld [vmem:[#allocation42_spill] sm:$0xff]  ;;  %v4607_v35 = vld [vmem:[#allocation43_spill] sm:$0xff] }
 0x455   :  { %1603 = vmatpush1.bf16.msra.mxu0 %v4597_v63  ;;  %1644 = vmatpush1.bf16.msra.mxu1 %v4598_v23  ;;  %v4608_v63 = vld [vmem:[#allocation44_spill] sm:$0xff] }
 0x456   :  { %1604 = vmatprep.subr.bf16.mxu0 %v4599_v33  ;;  %1645 = vmatprep.subr.bf16.mxu1 %v4600_v8 }
 0x459   :  { %1605 = vmatpush1.bf16.msra.mxu0 %v4601_v42  ;;  %1646 = vmatpush1.bf16.msra.mxu1 %v4602_v41 }
 0x45a   :  { %1606 = vmatprep.subr.bf16.mxu0 %v4603_v34  ;;  %1647 = vmatprep.subr.bf16.mxu1 %v4604_v21 }
 0x45d   :  { %1607 = vmatpush1.bf16.msra.mxu0 %v4605_v30  ;;  %1648 = vmatpush1.bf16.msra.mxu1 %v4606_v40 }
 0x45e   :  { %1674 = vmatprep.subr.bf16.mxu0 %v4607_v35  ;;  %1715 = vmatprep.subr.bf16.mxu1 %v4608_v63 }
 0x4f3   :  { %v1431_v23 = vpop.f32.mrb[40].mxu0  ;;  %v1472_v33 = vpop.f32.mrb[40].mxu1 }
 0x4f4   :  { %v1433_v4 = vpop.f32.mrb[41].mxu0  ;;  %v1474_v8 = vpop.f32.mrb[41].mxu1 }
 0x4f5   :  { %v1435_v18 = vpop.f32.mrb[42].mxu0  ;;  %v1476_v42 = vpop.f32.mrb[42].mxu1 }
 0x4f6   :  { %v1436_v36 = vpop.f32.mrb[43].mxu0  ;;  %v1477_v41 = vpop.f32.mrb[43].mxu1 }
 0x513   :  { %v1513_v16 = vpop.f32.mrb[44].mxu0  ;;  %v1554_v34 = vpop.f32.mrb[44].mxu1 }
 0x514   :  { %v1561_v21 = vsel %vm487_vm9, %v1431_v23, %v1513_v16  ;;  %v1563_v40 = vsel %vm487_vm9, %v1472_v33, %v1554_v34  ;;  %v1515_v30 = vpop.f32.mrb[45].mxu0  ;;  %v1556_v35 = vpop.f32.mrb[45].mxu1  ;;  %v4612_v16 = vld [vmem:[#allocation64_spill] sm:$0xff] }
 0x515   :  { %v1565_v63 = vadd.f32 %v1561_v21, %v4609_v22  ;;  %v1567_v13 = vadd.f32 %v1563_v40, %v4610_v17  ;;  %v1562_v18 = vsel %vm487_vm9, %v1433_v4, %v1515_v30  ;;  %v1564_v42 = vsel %vm487_vm9, %v1474_v8, %v1556_v35  ;;  %v1517_v36 = vpop.f32.mrb[46].mxu0  ;;  %v1558_v41 = vpop.f32.mrb[46].mxu1 }
 0x516   :  { %v1566_v25 = vadd.f32 %v1562_v18, %v4611_v7  ;;  %v1568_v23 = vadd.f32 %v1564_v42, %v4612_v16  ;;  %v1518_v61 = vpop.f32.mrb[47].mxu0  ;;  %v1559_v34 = vpop.f32.mrb[47].mxu1 }
 0x517   :  { %v1569_v33 = vmul.f32 0.5, %v1565_v63 }
 0x518   :  { %v1573_v31 = vmul.f32 0.5, %v1566_v25  ;;  %v1578_v17 = vmul.f32 0.5, %v1568_v23 }
 0x519   :  { %2970 = vtanh.f32 %v1569_v33 }
 0x51a   :  { %2972 = vtanh.f32 %v1573_v31 }
 0x51b   :  { %2974 = vtanh.f32 %v1567_v13 }
 0x51c   :  { %2976 = vtanh.f32 %v1578_v17 }
 0x523   :  { %v2971_v22 = vpop.eup %2970 }
 0x524   :  { %v2973_v21 = vpop.eup %2972  ;;  %v1571_v4 = vmul.f32 0.5, %v2971_v22 }
 0x525   :  { %v1575_v30 = vmul.f32 0.5, %v2973_v21  ;;  %v2975_v40 = vpop.eup %2974 }
 0x526   :  { %v1572_v8 = vadd.f32 0.5, %v1571_v4  ;;  %v2977_v61 = vpop.eup %2976 }
 0x527   :  { %v1576_v35 = vadd.f32 0.5, %v1575_v30  ;;  %v1580_v25 = vmul.f32 0.5, %v2977_v61  ;;  %v4621_v61 = vld [vmem:[#allocation22_spill] sm:$0xff] }
 0x528   :  { %v1583_v36 = vmul.f32 %v2975_v40, %v1572_v8  ;;  %v4617_v40 = vld [vmem:[#allocation18_spill] sm:$0xff] }
 0x529   :  { %v1582_v7 = vmul.f32 %v1576_v35, %v3798_v24  ;;  %v1581_v31 = vadd.f32 0.5, %v1580_v25  ;;  %v4618_v35 = vld [vmem:[#allocation19_spill] sm:$0xff] }
 0x52a   :  { %v4622_v25 = vld [vmem:[#allocation23_spill] sm:$0xff] }
 0x52b   :  { %v3901_v18 = vadd.f32 %v1583_v36, %v1582_v7  ;;  %v4619_v36 = vld [vmem:[#allocation20_spill] sm:$0xff]  ;;  %v4620_v7 = vld [vmem:[#allocation21_spill] sm:$0xff] }
 0x52d   :  { %2978 = vtanh.f32 %v3901_v18 }
 0x537   :  { %v2979_v13 = vpop.eup %2978 }
 0x538   :  { %v1586_v63 = vmul.f32 %v2979_v13, %v1581_v31  ;;  %v4623_v31 = vld [vmem:[#allocation24_spill] sm:$0xff]  ;;  %v4624_v13 = vld [vmem:[#allocation25_spill] sm:$0xff] }
 0x53a   :  { %v2445_v42 = vrot.slane %v1586_v63, %v3592_v50  ;;  %v1591_v41 = vpack.c.bf16 %v1586_v63, %v1586_v63  ;;  %v4625_v63 = vld [vmem:[#allocation26_spill] sm:$0xff] }
 0x53c   :  { %v2446_v16 = vcombine.high %v2445_v42, %v2445_v42  ;;  %v2453_v23 = vrot.slane %v2445_v42, %v3592_v50  ;;  %1625 = vmatmul.mubr.bf16.vlgmr.msra.gmra.mrb[48].mxu0 %v1591_v41  ;;  %1666 = vmatmul.mubr.bf16.vlgmr.msra.gmra.mrb[48].mxu1 %v1591_v41  ;;  %v4626_v42 = vld [vmem:[#allocation27_spill] sm:$0xff] }
 0x53d   :  { %1675 = vmatpush1.bf16.msra.mxu0 %v3384_v1  ;;  %1716 = vmatpush1.bf16.msra.mxu1 %v3386_v45 }
 0x53e   :  { %v2460_v24 = vrot.slane %v2446_v16, %v3592_v50  ;;  %v2576_v34 = vrot.slane %v2453_v23, %v3596_v32  ;;  %v2654_v33 = vcombine.high %v2453_v23, %v2453_v23  ;;  %1676 = vmatprep.subr.bf16.mxu0 %v3390_v46  ;;  %1717 = vmatprep.subr.bf16.mxu1 %v3392_v47  ;;  %v4628_v16 = vld [vmem:[#allocation29_spill] sm:$0xff]  ;;  %v4629_v23 = vld [vmem:[#allocation30_spill] sm:$0xff] }
 0x53f   :  { %1706 = vmatprep.mubr.bf16.mxu0 %v4481_v0  ;;  %1747 = vmatprep.mubr.bf16.mxu1 %v4481_v0 }
 0x540   :  { %v2580_v17 = vrot.slane %v2460_v24, %v3596_v32  ;;  %v3917_v22 = vsel %vm2629_vm12, %v3814_v20, %v2576_v34  ;;  %v2655_v21 = vcombine.high %v2460_v24, %v2460_v24  ;;  %v3920_v4 = vrot.slane %v2654_v33, %v3596_v32  ;;  %v4615_v20 = vld [vmem:[#allocation16_spill] sm:$0xff]  ;;  %v4630_v24 = vld [vmem:[#allocation31_spill] sm:$0xff]  ;;  %v4632_v33 = vld [vmem:[#allocation33_spill] sm:$0xff] }
 0x541   :  { %1677 = vmatpush1.bf16.msra.mxu0 %v3400_v56  ;;  %1718 = vmatpush1.bf16.msra.mxu1 %v3402_v57  ;;  %v4631_v34 = vld [vmem:[#allocation32_spill] sm:$0xff] }
 0x542   :  { %4613 = vst [vmem:[#allocation49_spill] sm:$0xff] %v3920_v4  ;;  %v3926_v30 = vsel %vm2629_vm12, %v3823_v29, %v2580_v17  ;;  %v3929_v8 = vrot.slane %v2655_v21, %v3596_v32  ;;  %1678 = vmatprep.subr.bf16.mxu0 %v3406_v58  ;;  %1719 = vmatprep.subr.bf16.mxu1 %v3408_v59  ;;  %v4616_v29 = vld [vmem:[#allocation17_spill] sm:$0xff]  ;;  %v4633_v17 = vld [vmem:[#allocation34_spill] sm:$0xff]  ;;  %v4634_v21 = vld [vmem:[#allocation35_spill] sm:$0xff] }
 0x543   :  { %v4636_v4 = vld [vmem:[#allocation37_spill] sm:$0xff] }
 0x544   :  { %4614 = vst [vmem:[#allocation50_spill] sm:$0xff] %v3929_v8  ;;  %v4635_v8 = vld [vmem:[#allocation36_spill] sm:$0xff] }
 0x545   :  { %1679 = vmatpush1.bf16.msra.mxu0 %v3414_v14  ;;  %1720 = vmatpush1.bf16.msra.mxu1 %v3416_v15 }
 0x546   :  { %1680 = vmatprep.subr.bf16.mxu0 %v4513_v19  ;;  %1721 = vmatprep.subr.bf16.mxu1 %v4514_v54 }
 0x549   :  { %1681 = vmatpush1.bf16.msra.mxu0 %v4515_v37  ;;  %1722 = vmatpush1.bf16.msra.mxu1 %v4516_v39 }
 0x54a   :  { %1682 = vmatprep.subr.bf16.mxu0 %v4517_v43  ;;  %1723 = vmatprep.subr.bf16.mxu1 %v4518_v44 }
 0x54d   :  { %1683 = vmatpush1.bf16.msra.mxu0 %v3438_v6  ;;  %1724 = vmatpush1.bf16.msra.mxu1 %v3440_v9 }
 0x54e   :  { %1684 = vmatprep.subr.bf16.mxu0 %v3444_v10  ;;  %1725 = vmatprep.subr.bf16.mxu1 %v4519_v51 }
 0x551   :  { %1685 = vmatpush1.bf16.msra.mxu0 %v4520_v53  ;;  %1726 = vmatpush1.bf16.msra.mxu1 %v3452_v27 }
 0x552   :  { %1686 = vmatprep.subr.bf16.mxu0 %v3456_v28  ;;  %1727 = vmatprep.subr.bf16.mxu1 %v3458_v5 }
 0x555   :  { %1687 = vmatpush1.bf16.msra.mxu0 %v3462_v48  ;;  %1728 = vmatpush1.bf16.msra.mxu1 %v3464_v49 }
 0x556   :  { %1688 = vmatprep.subr.bf16.mxu0 %v3468_v52  ;;  %1729 = vmatprep.subr.bf16.mxu1 %v3470_v55 }
 0x559   :  { %1689 = vmatpush1.bf16.msra.mxu0 %v3474_v11  ;;  %1730 = vmatpush1.bf16.msra.mxu1 %v3476_v26 }
 0x55a   :  { %1787 = vmatprep.subr.bf16.mxu0 %v3239_v2  ;;  %1828 = vmatprep.subr.bf16.mxu1 %v3241_v3 }
 0x55c   :  { %1707 = vmatmul.mubr.bf16.vlgmr.msra.gmra.mrb[52].mxu0 %v1591_v41  ;;  %1748 = vmatmul.mubr.bf16.vlgmr.msra.gmra.mrb[52].mxu1 %v1591_v41  ;;  %v4627_v41 = vld [vmem:[#allocation28_spill] sm:$0xff] }
 0x55d   :  { %1788 = vmatpush1.bf16.msra.mxu0 %v3235_v60  ;;  %1829 = vmatpush1.bf16.msra.mxu1 %v3237_v62 }
 0x55e   :  { %1789 = vmatprep.subr.bf16.mxu0 %v3250_v12  ;;  %1830 = vmatprep.subr.bf16.mxu1 %v4615_v20 }
 0x55f   :  { %1819 = vmatprep.mubr.bf16.mxu0 %v4481_v0  ;;  %1860 = vmatprep.mubr.bf16.mxu1 %v4481_v0 }
 0x561   :  { %1790 = vmatpush1.bf16.msra.mxu0 %v4616_v29  ;;  %1831 = vmatpush1.bf16.msra.mxu1 %v4617_v40 }
 0x562   :  { %1791 = vmatprep.subr.bf16.mxu0 %v4618_v35  ;;  %1832 = vmatprep.subr.bf16.mxu1 %v4619_v36  ;;  %v4646_v35 = vld [vmem:[#allocation67_spill] sm:$0xff] }
 0x565   :  { %1792 = vmatpush1.bf16.msra.mxu0 %v4620_v7  ;;  %1833 = vmatpush1.bf16.msra.mxu1 %v4621_v61  ;;  %v4644_v61 = vld [vmem:[#allocation65_spill] sm:$0xff]  ;;  %v4645_v7 = vld [vmem:[#allocation66_spill] sm:$0xff] }
 0x566   :  { %1793 = vmatprep.subr.bf16.mxu0 %v4622_v25  ;;  %1834 = vmatprep.subr.bf16.mxu1 %v4623_v31 }
 0x569   :  { %1794 = vmatpush1.bf16.msra.mxu0 %v4624_v13  ;;  %1835 = vmatpush1.bf16.msra.mxu1 %v4625_v63 }
 0x56a   :  { %1795 = vmatprep.subr.bf16.mxu0 %v4626_v42  ;;  %1836 = vmatprep.subr.bf16.mxu1 %v4627_v41  ;;  %v4637_v42 = vld [vmem:[#allocation38_spill] sm:$0xff]  ;;  %v4638_v41 = vld [vmem:[#allocation39_spill] sm:$0xff] }
 0x56d   :  { %1796 = vmatpush1.bf16.msra.mxu0 %v4628_v16  ;;  %1837 = vmatpush1.bf16.msra.mxu1 %v4629_v23  ;;  %v4639_v16 = vld [vmem:[#allocation40_spill] sm:$0xff]  ;;  %v4640_v23 = vld [vmem:[#allocation41_spill] sm:$0xff] }
 0x56e   :  { %1797 = vmatprep.subr.bf16.mxu0 %v4630_v24  ;;  %1838 = vmatprep.subr.bf16.mxu1 %v4631_v34  ;;  %v4641_v24 = vld [vmem:[#allocation42_spill] sm:$0xff]  ;;  %v4642_v34 = vld [vmem:[#allocation43_spill] sm:$0xff] }
 0x571   :  { %1798 = vmatpush1.bf16.msra.mxu0 %v4632_v33  ;;  %1839 = vmatpush1.bf16.msra.mxu1 %v4633_v17  ;;  %v4643_v33 = vld [vmem:[#allocation44_spill] sm:$0xff] }
 0x572   :  { %1799 = vmatprep.subr.bf16.mxu0 %v4634_v21  ;;  %1840 = vmatprep.subr.bf16.mxu1 %v4635_v8 }
 0x575   :  { %1800 = vmatpush1.bf16.msra.mxu0 %v4636_v4  ;;  %1841 = vmatpush1.bf16.msra.mxu1 %v4637_v42 }
 0x576   :  { %1801 = vmatprep.subr.bf16.mxu0 %v4638_v41  ;;  %1842 = vmatprep.subr.bf16.mxu1 %v4639_v16 }
 0x579   :  { %1802 = vmatpush1.bf16.msra.mxu0 %v4640_v23  ;;  %1843 = vmatpush1.bf16.msra.mxu1 %v4641_v24 }
 0x57a   :  { %1869 = vmatprep.subr.bf16.mxu0 %v4642_v34  ;;  %1910 = vmatprep.subr.bf16.mxu1 %v4643_v33 }
 0x60f   :  { %v1626_v17 = vpop.f32.mrb[48].mxu0  ;;  %v1667_v21 = vpop.f32.mrb[48].mxu1 }
 0x610   :  { %v1628_v63 = vpop.f32.mrb[49].mxu0  ;;  %v1669_v8 = vpop.f32.mrb[49].mxu1 }
 0x611   :  { %v1630_v13 = vpop.f32.mrb[50].mxu0  ;;  %v1671_v4 = vpop.f32.mrb[50].mxu1 }
 0x612   :  { %v1631_v31 = vpop.f32.mrb[51].mxu0  ;;  %v1672_v42 = vpop.f32.mrb[51].mxu1 }
 0x62f   :  { %v1708_v25 = vpop.f32.mrb[52].mxu0  ;;  %v1749_v41 = vpop.f32.mrb[52].mxu1 }
 0x630   :  { %v1756_v16 = vsel %vm487_vm9, %v1626_v17, %v1708_v25  ;;  %v1758_v24 = vsel %vm487_vm9, %v1667_v21, %v1749_v41  ;;  %v1710_v23 = vpop.f32.mrb[53].mxu0  ;;  %v1751_v34 = vpop.f32.mrb[53].mxu1  ;;  %v4647_v25 = vld [vmem:[#allocation68_spill] sm:$0xff] }
 0x631   :  { %v1760_v33 = vadd.f32 %v1756_v16, %v4644_v61  ;;  %v1762_v36 = vadd.f32 %v1758_v24, %v4645_v7  ;;  %v1757_v13 = vsel %vm487_vm9, %v1628_v63, %v1710_v23  ;;  %v1759_v4 = vsel %vm487_vm9, %v1669_v8, %v1751_v34  ;;  %v1712_v31 = vpop.f32.mrb[54].mxu0  ;;  %v1753_v42 = vpop.f32.mrb[54].mxu1 }
 0x632   :  { %v1761_v40 = vadd.f32 %v1757_v13, %v4646_v35  ;;  %v1763_v17 = vadd.f32 %v1759_v4, %v4647_v25  ;;  %v1713_v29 = vpop.f32.mrb[55].mxu0  ;;  %v1754_v41 = vpop.f32.mrb[55].mxu1 }
 0x633   :  { %v1764_v21 = vmul.f32 0.5, %v1760_v33 }
 0x634   :  { %v1768_v20 = vmul.f32 0.5, %v1761_v40  ;;  %v1773_v7 = vmul.f32 0.5, %v1763_v17 }
 0x635   :  { %2980 = vtanh.f32 %v1764_v21 }
 0x636   :  { %2982 = vtanh.f32 %v1768_v20 }
 0x637   :  { %2984 = vtanh.f32 %v1762_v36 }
 0x638   :  { %2986 = vtanh.f32 %v1773_v7 }
 0x63f   :  { %v2981_v61 = vpop.eup %2980 }
 0x640   :  { %v2983_v16 = vpop.eup %2982  ;;  %v1766_v63 = vmul.f32 0.5, %v2981_v61 }
 0x641   :  { %v1770_v23 = vmul.f32 0.5, %v2983_v16  ;;  %v2985_v24 = vpop.eup %2984 }
 0x642   :  { %v1767_v8 = vadd.f32 0.5, %v1766_v63  ;;  %v2987_v29 = vpop.eup %2986 }
 0x643   :  { %v1771_v34 = vadd.f32 0.5, %v1770_v23  ;;  %v1775_v40 = vmul.f32 0.5, %v2987_v29  ;;  %v4656_v29 = vld [vmem:[#allocation22_spill] sm:$0xff] }
 0x644   :  { %v1778_v31 = vmul.f32 %v2985_v24, %v1767_v8  ;;  %v4652_v24 = vld [vmem:[#allocation18_spill] sm:$0xff] }
 0x645   :  { %v1777_v35 = vmul.f32 %v1771_v34, %v3901_v18  ;;  %v1776_v20 = vadd.f32 0.5, %v1775_v40  ;;  %v4653_v34 = vld [vmem:[#allocation19_spill] sm:$0xff] }
 0x646   :  { %v4657_v40 = vld [vmem:[#allocation23_spill] sm:$0xff] }
 0x647   :  { %v4004_v13 = vadd.f32 %v1778_v31, %v1777_v35  ;;  %v4654_v31 = vld [vmem:[#allocation20_spill] sm:$0xff]  ;;  %v4655_v35 = vld [vmem:[#allocation21_spill] sm:$0xff] }
 0x649   :  { %2988 = vtanh.f32 %v4004_v13 }
 0x653   :  { %v2989_v36 = vpop.eup %2988 }
 0x654   :  { %v1781_v33 = vmul.f32 %v2989_v36, %v1776_v20  ;;  %v4658_v20 = vld [vmem:[#allocation24_spill] sm:$0xff]  ;;  %v4659_v36 = vld [vmem:[#allocation25_spill] sm:$0xff] }
 0x656   :  { %v2468_v4 = vrot.slane %v1781_v33, %v3592_v50  ;;  %v1786_v42 = vpack.c.bf16 %v1781_v33, %v1781_v33  ;;  %v4660_v33 = vld [vmem:[#allocation26_spill] sm:$0xff] }
 0x658   :  { %v2469_v25 = vcombine.high %v2468_v4, %v2468_v4  ;;  %v2476_v17 = vrot.slane %v2468_v4, %v3592_v50  ;;  %1820 = vmatmul.mubr.bf16.vlgmr.msra.gmra.mrb[56].mxu0 %v1786_v42  ;;  %1861 = vmatmul.mubr.bf16.vlgmr.msra.gmra.mrb[56].mxu1 %v1786_v42  ;;  %v4661_v4 = vld [vmem:[#allocation27_spill] sm:$0xff] }
 0x659   :  { %1870 = vmatpush1.bf16.msra.mxu0 %v3384_v1  ;;  %1911 = vmatpush1.bf16.msra.mxu1 %v3386_v45 }
 0x65a   :  { %v2483_v18 = vrot.slane %v2469_v25, %v3592_v50  ;;  %v2586_v41 = vrot.slane %v2476_v17, %v3596_v32  ;;  %v2652_v21 = vcombine.high %v2476_v17, %v2476_v17  ;;  %1871 = vmatprep.subr.bf16.mxu0 %v3390_v46  ;;  %1912 = vmatprep.subr.bf16.mxu1 %v3392_v47  ;;  %v4663_v25 = vld [vmem:[#allocation29_spill] sm:$0xff]  ;;  %v4664_v17 = vld [vmem:[#allocation30_spill] sm:$0xff] }
 0x65b   :  { %1901 = vmatprep.mubr.bf16.mxu0 %v4481_v0  ;;  %1942 = vmatprep.mubr.bf16.mxu1 %v4481_v0 }
 0x65c   :  { %v2590_v7 = vrot.slane %v2483_v18, %v3596_v32  ;;  %v4020_v61 = vsel %vm2632_vm13, %v3917_v22, %v2586_v41  ;;  %v2653_v16 = vcombine.high %v2483_v18, %v2483_v18  ;;  %v4023_v63 = vrot.slane %v2652_v21, %v3596_v32  ;;  %v4650_v22 = vld [vmem:[#allocation16_spill] sm:$0xff]  ;;  %v4665_v18 = vld [vmem:[#allocation31_spill] sm:$0xff]  ;;  %v4667_v21 = vld [vmem:[#allocation33_spill] sm:$0xff] }
 0x65d   :  { %1872 = vmatpush1.bf16.msra.mxu0 %v3400_v56  ;;  %1913 = vmatpush1.bf16.msra.mxu1 %v3402_v57  ;;  %v4666_v41 = vld [vmem:[#allocation32_spill] sm:$0xff] }
 0x65e   :  { %4648 = vst [vmem:[#allocation51_spill] sm:$0xff] %v4023_v63  ;;  %v4029_v23 = vsel %vm2632_vm13, %v3926_v30, %v2590_v7  ;;  %v4032_v8 = vrot.slane %v2653_v16, %v3596_v32  ;;  %1873 = vmatprep.subr.bf16.mxu0 %v3406_v58  ;;  %1914 = vmatprep.subr.bf16.mxu1 %v3408_v59  ;;  %v4651_v30 = vld [vmem:[#allocation17_spill] sm:$0xff]  ;;  %v4668_v7 = vld [vmem:[#allocation34_spill] sm:$0xff]  ;;  %v4669_v16 = vld [vmem:[#allocation35_spill] sm:$0xff] }
 0x65f   :  { %v4671_v63 = vld [vmem:[#allocation37_spill] sm:$0xff] }
 0x660   :  { %4649 = vst [vmem:[#allocation52_spill] sm:$0xff] %v4032_v8  ;;  %v4670_v8 = vld [vmem:[#allocation36_spill] sm:$0xff] }
 0x661   :  { %1874 = vmatpush1.bf16.msra.mxu0 %v3414_v14  ;;  %1915 = vmatpush1.bf16.msra.mxu1 %v3416_v15 }
 0x662   :  { %1875 = vmatprep.subr.bf16.mxu0 %v4513_v19  ;;  %1916 = vmatprep.subr.bf16.mxu1 %v4514_v54 }
 0x665   :  { %1876 = vmatpush1.bf16.msra.mxu0 %v4515_v37  ;;  %1917 = vmatpush1.bf16.msra.mxu1 %v4516_v39 }
 0x666   :  { %1877 = vmatprep.subr.bf16.mxu0 %v4517_v43  ;;  %1918 = vmatprep.subr.bf16.mxu1 %v4518_v44 }
 0x669   :  { %1878 = vmatpush1.bf16.msra.mxu0 %v3438_v6  ;;  %1919 = vmatpush1.bf16.msra.mxu1 %v3440_v9 }
 0x66a   :  { %1879 = vmatprep.subr.bf16.mxu0 %v3444_v10  ;;  %1920 = vmatprep.subr.bf16.mxu1 %v4519_v51 }
 0x66d   :  { %1880 = vmatpush1.bf16.msra.mxu0 %v4520_v53  ;;  %1921 = vmatpush1.bf16.msra.mxu1 %v3452_v27 }
 0x66e   :  { %1881 = vmatprep.subr.bf16.mxu0 %v3456_v28  ;;  %1922 = vmatprep.subr.bf16.mxu1 %v3458_v5 }
 0x671   :  { %1882 = vmatpush1.bf16.msra.mxu0 %v3462_v48  ;;  %1923 = vmatpush1.bf16.msra.mxu1 %v3464_v49 }
 0x672   :  { %1883 = vmatprep.subr.bf16.mxu0 %v3468_v52  ;;  %1924 = vmatprep.subr.bf16.mxu1 %v3470_v55 }
 0x675   :  { %1884 = vmatpush1.bf16.msra.mxu0 %v3474_v11  ;;  %1925 = vmatpush1.bf16.msra.mxu1 %v3476_v26 }
 0x676   :  { %1982 = vmatprep.subr.bf16.mxu0 %v3239_v2  ;;  %2023 = vmatprep.subr.bf16.mxu1 %v3241_v3 }
 0x678   :  { %1902 = vmatmul.mubr.bf16.vlgmr.msra.gmra.mrb[60].mxu0 %v1786_v42  ;;  %1943 = vmatmul.mubr.bf16.vlgmr.msra.gmra.mrb[60].mxu1 %v1786_v42  ;;  %v4662_v42 = vld [vmem:[#allocation28_spill] sm:$0xff] }
 0x679   :  { %1983 = vmatpush1.bf16.msra.mxu0 %v3235_v60  ;;  %2024 = vmatpush1.bf16.msra.mxu1 %v3237_v62 }
 0x67a   :  { %1984 = vmatprep.subr.bf16.mxu0 %v3250_v12  ;;  %2025 = vmatprep.subr.bf16.mxu1 %v4650_v22 }
 0x67b   :  { %2014 = vmatprep.mubr.bf16.mxu0 %v4481_v0  ;;  %2055 = vmatprep.mubr.bf16.mxu1 %v4481_v0 }
 0x67d   :  { %1985 = vmatpush1.bf16.msra.mxu0 %v4651_v30  ;;  %2026 = vmatpush1.bf16.msra.mxu1 %v4652_v24 }
 0x67e   :  { %1986 = vmatprep.subr.bf16.mxu0 %v4653_v34  ;;  %2027 = vmatprep.subr.bf16.mxu1 %v4654_v31  ;;  %v4681_v34 = vld [vmem:[#allocation71_spill] sm:$0xff] }
 0x681   :  { %1987 = vmatpush1.bf16.msra.mxu0 %v4655_v35  ;;  %2028 = vmatpush1.bf16.msra.mxu1 %v4656_v29  ;;  %v4679_v29 = vld [vmem:[#allocation69_spill] sm:$0xff]  ;;  %v4680_v35 = vld [vmem:[#allocation70_spill] sm:$0xff] }
 0x682   :  { %1988 = vmatprep.subr.bf16.mxu0 %v4657_v40  ;;  %2029 = vmatprep.subr.bf16.mxu1 %v4658_v20 }
 0x685   :  { %1989 = vmatpush1.bf16.msra.mxu0 %v4659_v36  ;;  %2030 = vmatpush1.bf16.msra.mxu1 %v4660_v33 }
 0x686   :  { %1990 = vmatprep.subr.bf16.mxu0 %v4661_v4  ;;  %2031 = vmatprep.subr.bf16.mxu1 %v4662_v42  ;;  %v4672_v4 = vld [vmem:[#allocation38_spill] sm:$0xff]  ;;  %v4673_v42 = vld [vmem:[#allocation39_spill] sm:$0xff] }
 0x689   :  { %1991 = vmatpush1.bf16.msra.mxu0 %v4663_v25  ;;  %2032 = vmatpush1.bf16.msra.mxu1 %v4664_v17  ;;  %v4674_v25 = vld [vmem:[#allocation40_spill] sm:$0xff]  ;;  %v4675_v17 = vld [vmem:[#allocation41_spill] sm:$0xff] }
 0x68a   :  { %1992 = vmatprep.subr.bf16.mxu0 %v4665_v18  ;;  %2033 = vmatprep.subr.bf16.mxu1 %v4666_v41  ;;  %v4676_v18 = vld [vmem:[#allocation42_spill] sm:$0xff]  ;;  %v4677_v41 = vld [vmem:[#allocation43_spill] sm:$0xff] }
 0x68d   :  { %1993 = vmatpush1.bf16.msra.mxu0 %v4667_v21  ;;  %2034 = vmatpush1.bf16.msra.mxu1 %v4668_v7  ;;  %v4678_v21 = vld [vmem:[#allocation44_spill] sm:$0xff] }
 0x68e   :  { %1994 = vmatprep.subr.bf16.mxu0 %v4669_v16  ;;  %2035 = vmatprep.subr.bf16.mxu1 %v4670_v8 }
 0x691   :  { %1995 = vmatpush1.bf16.msra.mxu0 %v4671_v63  ;;  %2036 = vmatpush1.bf16.msra.mxu1 %v4672_v4 }
 0x692   :  { %1996 = vmatprep.subr.bf16.mxu0 %v4673_v42  ;;  %2037 = vmatprep.subr.bf16.mxu1 %v4674_v25 }
 0x695   :  { %1997 = vmatpush1.bf16.msra.mxu0 %v4675_v17  ;;  %2038 = vmatpush1.bf16.msra.mxu1 %v4676_v18 }
 0x696   :  { %2064 = vmatprep.subr.bf16.mxu0 %v4677_v41  ;;  %2105 = vmatprep.subr.bf16.mxu1 %v4678_v21 }
 0x72b   :  { %v1821_v7 = vpop.f32.mrb[56].mxu0  ;;  %v1862_v16 = vpop.f32.mrb[56].mxu1 }
 0x72c   :  { %v1823_v33 = vpop.f32.mrb[57].mxu0  ;;  %v1864_v8 = vpop.f32.mrb[57].mxu1 }
 0x72d   :  { %v1825_v36 = vpop.f32.mrb[58].mxu0  ;;  %v1866_v63 = vpop.f32.mrb[58].mxu1 }
 0x72e   :  { %v1826_v20 = vpop.f32.mrb[59].mxu0  ;;  %v1867_v4 = vpop.f32.mrb[59].mxu1 }
 0x74b   :  { %v1903_v40 = vpop.f32.mrb[60].mxu0  ;;  %v1944_v42 = vpop.f32.mrb[60].mxu1 }
 0x74c   :  { %v1951_v25 = vsel %vm487_vm9, %v1821_v7, %v1903_v40  ;;  %v1953_v18 = vsel %vm487_vm9, %v1862_v16, %v1944_v42  ;;  %v1905_v17 = vpop.f32.mrb[61].mxu0  ;;  %v1946_v41 = vpop.f32.mrb[61].mxu1  ;;  %v4682_v40 = vld [vmem:[#allocation72_spill] sm:$0xff] }
 0x74d   :  { %v1955_v21 = vadd.f32 %v1951_v25, %v4679_v29  ;;  %v1957_v31 = vadd.f32 %v1953_v18, %v4680_v35  ;;  %v1952_v36 = vsel %vm487_vm9, %v1823_v33, %v1905_v17  ;;  %v1954_v63 = vsel %vm487_vm9, %v1864_v8, %v1946_v41  ;;  %v1907_v20 = vpop.f32.mrb[62].mxu0  ;;  %v1948_v4 = vpop.f32.mrb[62].mxu1 }
 0x74e   :  { %v1956_v24 = vadd.f32 %v1952_v36, %v4681_v34  ;;  %v1958_v7 = vadd.f32 %v1954_v63, %v4682_v40  ;;  %v1908_v30 = vpop.f32.mrb[63].mxu0  ;;  %v1949_v42 = vpop.f32.mrb[63].mxu1 }
 0x74f   :  { %v1959_v16 = vmul.f32 0.5, %v1955_v21 }
 0x750   :  { %v1963_v22 = vmul.f32 0.5, %v1956_v24  ;;  %v1968_v35 = vmul.f32 0.5, %v1958_v7 }
 0x751   :  { %2990 = vtanh.f32 %v1959_v16 }
 0x752   :  { %2992 = vtanh.f32 %v1963_v22 }
 0x753   :  { %2994 = vtanh.f32 %v1957_v31 }
 0x754   :  { %2996 = vtanh.f32 %v1968_v35 }
 0x75b   :  { %v2991_v29 = vpop.eup %2990 }
 0x75c   :  { %v2993_v25 = vpop.eup %2992  ;;  %v1961_v33 = vmul.f32 0.5, %v2991_v29 }
 0x75d   :  { %v1965_v17 = vmul.f32 0.5, %v2993_v25  ;;  %v2995_v18 = vpop.eup %2994 }
 0x75e   :  { %v1962_v8 = vadd.f32 0.5, %v1961_v33  ;;  %v2997_v30 = vpop.eup %2996 }
 0x75f   :  { %v1966_v41 = vadd.f32 0.5, %v1965_v17  ;;  %v1970_v24 = vmul.f32 0.5, %v2997_v30  ;;  %v4694_v30 = vld [vmem:[#allocation27_spill] sm:$0xff] }
 0x760   :  { %v1973_v20 = vmul.f32 %v2995_v18, %v1962_v8  ;;  %v4685_v18 = vld [vmem:[#allocation18_spill] sm:$0xff] }
 0x761   :  { %v1972_v34 = vmul.f32 %v1966_v41, %v4004_v13  ;;  %v1971_v22 = vadd.f32 0.5, %v1970_v24  ;;  %v4688_v41 = vld [vmem:[#allocation21_spill] sm:$0xff]  ;;  %v4695_v24 = vld [vmem:[#allocation28_spill] sm:$0xff] }
 0x763   :  { %v4107_v36 = vadd.f32 %v1973_v20, %v1972_v34  ;;  %v4692_v20 = vld [vmem:[#allocation25_spill] sm:$0xff]  ;;  %v4693_v34 = vld [vmem:[#allocation26_spill] sm:$0xff] }
 0x765   :  { %2998 = vtanh.f32 %v4107_v36 }
 0x76f   :  { %v2999_v31 = vpop.eup %2998 }
 0x770   :  { %v1976_v21 = vmul.f32 %v2999_v31, %v1971_v22  ;;  %v4696_v22 = vld [vmem:[#allocation29_spill] sm:$0xff]  ;;  %v4697_v31 = vld [vmem:[#allocation30_spill] sm:$0xff] }
 0x772   :  { %v2491_v63 = vrot.slane %v1976_v21, %v3592_v50  ;;  %v1981_v4 = vpack.c.bf16 %v1976_v21, %v1976_v21  ;;  %v4698_v21 = vld [vmem:[#allocation31_spill] sm:$0xff] }
 0x774   :  { %v2492_v40 = vcombine.high %v2491_v63, %v2491_v63  ;;  %v2499_v7 = vrot.slane %v2491_v63, %v3592_v50  ;;  %2015 = vmatmul.mubr.bf16.vlgmr.msra.gmra.mrb[64].mxu0 %v1981_v4  ;;  %2056 = vmatmul.mubr.bf16.vlgmr.msra.gmra.mrb[64].mxu1 %v1981_v4  ;;  %v4699_v63 = vld [vmem:[#allocation32_spill] sm:$0xff] }
 0x775   :  { %2065 = vmatpush1.bf16.msra.mxu0 %v3384_v1  ;;  %2106 = vmatpush1.bf16.msra.mxu1 %v3386_v45 }
 0x776   :  { %v2506_v13 = vrot.slane %v2492_v40, %v3592_v50  ;;  %v2596_v42 = vrot.slane %v2499_v7, %v3596_v32  ;;  %v2650_v16 = vcombine.high %v2499_v7, %v2499_v7  ;;  %2066 = vmatprep.subr.bf16.mxu0 %v3390_v46  ;;  %2107 = vmatprep.subr.bf16.mxu1 %v3392_v47  ;;  %v4701_v40 = vld [vmem:[#allocation34_spill] sm:$0xff]  ;;  %v4702_v7 = vld [vmem:[#allocation35_spill] sm:$0xff] }
 0x777   :  { %2096 = vmatprep.mubr.bf16.mxu0 %v4481_v0  ;;  %2137 = vmatprep.mubr.bf16.mxu1 %v4481_v0 }
 0x778   :  { %v2600_v35 = vrot.slane %v2506_v13, %v3596_v32  ;;  %v4123_v29 = vsel %vm2635_vm14, %v4020_v61, %v2596_v42  ;;  %v2651_v25 = vcombine.high %v2506_v13, %v2506_v13  ;;  %v4126_v33 = vrot.slane %v2650_v16, %v3596_v32  ;;  %v4683_v61 = vld [vmem:[#allocation16_spill] sm:$0xff]  ;;  %v4704_v42 = vld [vmem:[#allocation37_spill] sm:$0xff]  ;;  %v4705_v16 = vld [vmem:[#allocation38_spill] sm:$0xff] }
 0x779   :  { %2067 = vmatpush1.bf16.msra.mxu0 %v3400_v56  ;;  %2108 = vmatpush1.bf16.msra.mxu1 %v3402_v57  ;;  %v4703_v13 = vld [vmem:[#allocation36_spill] sm:$0xff] }
 0x77a   :  { %v4131_v17 = vrot.slane %v2651_v25, %v3596_v32  ;;  %2068 = vmatprep.subr.bf16.mxu0 %v3406_v58  ;;  %2109 = vmatprep.subr.bf16.mxu1 %v3408_v59  ;;  %v4137_v8 = vsel %vm2635_vm14, %v4029_v23, %v2600_v35  ;;  %v4684_v23 = vld [vmem:[#allocation17_spill] sm:$0xff]  ;;  %v4706_v35 = vld [vmem:[#allocation39_spill] sm:$0xff]  ;;  %v4707_v25 = vld [vmem:[#allocation40_spill] sm:$0xff] }
 0x77d   :  { %2069 = vmatpush1.bf16.msra.mxu0 %v3414_v14  ;;  %2110 = vmatpush1.bf16.msra.mxu1 %v3416_v15 }
 0x77e   :  { %2070 = vmatprep.subr.bf16.mxu0 %v4513_v19  ;;  %2111 = vmatprep.subr.bf16.mxu1 %v4514_v54 }
 0x781   :  { %2071 = vmatpush1.bf16.msra.mxu0 %v4515_v37  ;;  %2112 = vmatpush1.bf16.msra.mxu1 %v4516_v39 }
 0x782   :  { %2072 = vmatprep.subr.bf16.mxu0 %v4517_v43  ;;  %2113 = vmatprep.subr.bf16.mxu1 %v4518_v44 }
 0x785   :  { %2073 = vmatpush1.bf16.msra.mxu0 %v3438_v6  ;;  %2114 = vmatpush1.bf16.msra.mxu1 %v3440_v9 }
 0x786   :  { %2074 = vmatprep.subr.bf16.mxu0 %v3444_v10  ;;  %2115 = vmatprep.subr.bf16.mxu1 %v4519_v51 }
 0x789   :  { %2075 = vmatpush1.bf16.msra.mxu0 %v4520_v53  ;;  %2116 = vmatpush1.bf16.msra.mxu1 %v3452_v27 }
 0x78a   :  { %2076 = vmatprep.subr.bf16.mxu0 %v3456_v28  ;;  %2117 = vmatprep.subr.bf16.mxu1 %v3458_v5 }
 0x78d   :  { %2077 = vmatpush1.bf16.msra.mxu0 %v3462_v48  ;;  %2118 = vmatpush1.bf16.msra.mxu1 %v3464_v49 }
 0x78e   :  { %2078 = vmatprep.subr.bf16.mxu0 %v3468_v52  ;;  %2119 = vmatprep.subr.bf16.mxu1 %v3470_v55 }
 0x791   :  { %2079 = vmatpush1.bf16.msra.mxu0 %v3474_v11  ;;  %2120 = vmatpush1.bf16.msra.mxu1 %v3476_v26 }
 0x792   :  { %2177 = vmatprep.subr.bf16.mxu0 %v3239_v2  ;;  %2218 = vmatprep.subr.bf16.mxu1 %v3241_v3  ;;  %v4686_v2 = vld [vmem:[#allocation19_spill] sm:$0xff]  ;;  %v4687_v3 = vld [vmem:[#allocation20_spill] sm:$0xff] }
 0x794   :  { %2097 = vmatmul.mubr.bf16.vlgmr.msra.gmra.mrb[68].mxu0 %v1981_v4  ;;  %2138 = vmatmul.mubr.bf16.vlgmr.msra.gmra.mrb[68].mxu1 %v1981_v4  ;;  %v4700_v4 = vld [vmem:[#allocation33_spill] sm:$0xff] }
 0x795   :  { %2178 = vmatpush1.bf16.msra.mxu0 %v3235_v60  ;;  %2219 = vmatpush1.bf16.msra.mxu1 %v3237_v62  ;;  %v4689_v60 = vld [vmem:[#allocation22_spill] sm:$0xff]  ;;  %v4690_v62 = vld [vmem:[#allocation23_spill] sm:$0xff] }
 0x796   :  { %2179 = vmatprep.subr.bf16.mxu0 %v3250_v12  ;;  %2220 = vmatprep.subr.bf16.mxu1 %v4683_v61  ;;  %v4691_v12 = vld [vmem:[#allocation24_spill] sm:$0xff]  ;;  %v4708_v61 = vld [vmem:[#allocation41_spill] sm:$0xff] }
 0x797   :  { %2209 = vmatprep.mubr.bf16.mxu0 %v4481_v0  ;;  %2250 = vmatprep.mubr.bf16.mxu1 %v4481_v0 }
 0x799   :  { %2180 = vmatpush1.bf16.msra.mxu0 %v4684_v23  ;;  %2221 = vmatpush1.bf16.msra.mxu1 %v4685_v18  ;;  %v4709_v23 = vld [vmem:[#allocation42_spill] sm:$0xff]  ;;  %v4710_v18 = vld [vmem:[#allocation43_spill] sm:$0xff] }
 0x79a   :  { %2181 = vmatprep.subr.bf16.mxu0 %v4686_v2  ;;  %2222 = vmatprep.subr.bf16.mxu1 %v4687_v3  ;;  %v4711_v2 = vld [vmem:[#allocation44_spill] sm:$0xff] }
 0x79d   :  { %2182 = vmatpush1.bf16.msra.mxu0 %v4688_v41  ;;  %2223 = vmatpush1.bf16.msra.mxu1 %v4689_v60 }
 0x79e   :  { %2183 = vmatprep.subr.bf16.mxu0 %v4690_v62  ;;  %2224 = vmatprep.subr.bf16.mxu1 %v4691_v12 }
 0x7a1   :  { %2184 = vmatpush1.bf16.msra.mxu0 %v4692_v20  ;;  %2225 = vmatpush1.bf16.msra.mxu1 %v4693_v34 }
 0x7a2   :  { %2185 = vmatprep.subr.bf16.mxu0 %v4694_v30  ;;  %2226 = vmatprep.subr.bf16.mxu1 %v4695_v24 }
 0x7a5   :  { %2186 = vmatpush1.bf16.msra.mxu0 %v4696_v22  ;;  %2227 = vmatpush1.bf16.msra.mxu1 %v4697_v31 }
 0x7a6   :  { %2187 = vmatprep.subr.bf16.mxu0 %v4698_v21  ;;  %2228 = vmatprep.subr.bf16.mxu1 %v4699_v63 }
 0x7a9   :  { %2188 = vmatpush1.bf16.msra.mxu0 %v4700_v4  ;;  %2229 = vmatpush1.bf16.msra.mxu1 %v4701_v40  ;;  %v4712_v40 = vld [vmem:[#allocation73_spill] sm:$0xff] }
 0x7aa   :  { %2189 = vmatprep.subr.bf16.mxu0 %v4702_v7  ;;  %2230 = vmatprep.subr.bf16.mxu1 %v4703_v13  ;;  %v4713_v13 = vld [vmem:[#allocation74_spill] sm:$0xff] }
 0x7ad   :  { %2190 = vmatpush1.bf16.msra.mxu0 %v4704_v42  ;;  %2231 = vmatpush1.bf16.msra.mxu1 %v4705_v16 }
 0x7ae   :  { %2191 = vmatprep.subr.bf16.mxu0 %v4706_v35  ;;  %2232 = vmatprep.subr.bf16.mxu1 %v4707_v25 }
 0x7b1   :  { %2192 = vmatpush1.bf16.msra.mxu0 %v4708_v61  ;;  %2233 = vmatpush1.bf16.msra.mxu1 %v4709_v23  ;;  %v4714_v23 = vld [vmem:[#allocation75_spill] sm:$0xff] }
 0x7b2   :  { %2259 = vmatprep.subr.bf16.mxu0 %v4710_v18  ;;  %2300 = vmatprep.subr.bf16.mxu1 %v4711_v2  ;;  %v4715_v2 = vld [vmem:[#allocation76_spill] sm:$0xff] }
 0x847   :  { %v2016_v3 = vpop.f32.mrb[64].mxu0  ;;  %v2057_v41 = vpop.f32.mrb[64].mxu1 }
 0x848   :  { %v2018_v60 = vpop.f32.mrb[65].mxu0  ;;  %v2059_v62 = vpop.f32.mrb[65].mxu1 }
 0x849   :  { %v2020_v12 = vpop.f32.mrb[66].mxu0  ;;  %v2061_v20 = vpop.f32.mrb[66].mxu1 }
 0x84a   :  { %v2021_v34 = vpop.f32.mrb[67].mxu0  ;;  %v2062_v30 = vpop.f32.mrb[67].mxu1 }
 0x867   :  { %v2098_v24 = vpop.f32.mrb[68].mxu0  ;;  %v2139_v22 = vpop.f32.mrb[68].mxu1 }
 0x868   :  { %v2146_v31 = vsel %vm487_vm9, %v2016_v3, %v2098_v24  ;;  %v2148_v21 = vsel %vm487_vm9, %v2057_v41, %v2139_v22  ;;  %v2100_v63 = vpop.f32.mrb[69].mxu0  ;;  %v2141_v4 = vpop.f32.mrb[69].mxu1 }
 0x869   :  { %v2150_v7 = vadd.f32 %v2146_v31, %v4712_v40  ;;  %v2152_v42 = vadd.f32 %v2148_v21, %v4713_v13  ;;  %v2147_v16 = vsel %vm487_vm9, %v2018_v60, %v2100_v63  ;;  %v2149_v35 = vsel %vm487_vm9, %v2059_v62, %v2141_v4  ;;  %v2102_v25 = vpop.f32.mrb[70].mxu0  ;;  %v2143_v61 = vpop.f32.mrb[70].mxu1 }
 0x86a   :  { %v2151_v18 = vadd.f32 %v2147_v16, %v4714_v23  ;;  %v2153_v3 = vadd.f32 %v2149_v35, %v4715_v2  ;;  %v2103_v12 = vpop.f32.mrb[71].mxu0  ;;  %v2144_v41 = vpop.f32.mrb[71].mxu1 }
 0x86b   :  { %v2154_v20 = vmul.f32 0.5, %v2150_v7 }
 0x86c   :  { %v2158_v34 = vmul.f32 0.5, %v2151_v18  ;;  %v2163_v30 = vmul.f32 0.5, %v2153_v3 }
 0x86d   :  { %3000 = vtanh.f32 %v2154_v20 }
 0x86e   :  { %3002 = vtanh.f32 %v2158_v34 }
 0x86f   :  { %3004 = vtanh.f32 %v2152_v42 }
 0x870   :  { %3006 = vtanh.f32 %v2163_v30 }
 0x877   :  { %v3001_v24 = vpop.eup %3000 }
 0x878   :  { %v3003_v22 = vpop.eup %3002  ;;  %v2156_v60 = vmul.f32 0.5, %v3001_v24 }
 0x879   :  { %v2160_v31 = vmul.f32 0.5, %v3003_v22  ;;  %v3005_v21 = vpop.eup %3004 }
 0x87a   :  { %v2157_v62 = vadd.f32 0.5, %v2156_v60  ;;  %v3007_v7 = vpop.eup %3006 }
 0x87b   :  { %v2161_v63 = vadd.f32 0.5, %v2160_v31  ;;  %v2165_v16 = vmul.f32 0.5, %v3007_v7 }
 0x87c   :  { %v2168_v4 = vmul.f32 %v3005_v21, %v2157_v62 }
 0x87d   :  { %v2167_v40 = vmul.f32 %v2161_v63, %v4107_v36  ;;  %v2166_v35 = vadd.f32 0.5, %v2165_v16 }
 0x87f   :  { %v4210_v13 = vadd.f32 %v2168_v4, %v2167_v40 }
 0x881   :  { %3008 = vtanh.f32 %v4210_v13 }
 0x88b   :  { %v3009_v42 = vpop.eup %3008 }
 0x88c   :  { %v2171_v25 = vmul.f32 %v3009_v42, %v2166_v35 }
 0x88e   :  { %v2514_v61 = vrot.slane %v2171_v25, %v3592_v50  ;;  %v2176_v23 = vpack.c.bf16 %v2171_v25, %v2171_v25 }
 0x890   :  { %v2515_v18 = vcombine.high %v2514_v61, %v2514_v61  ;;  %v2522_v2 = vrot.slane %v2514_v61, %v3592_v50  ;;  %2210 = vmatmul.mubr.bf16.vlgmr.msra.gmra.mrb[72].mxu0 %v2176_v23  ;;  %2251 = vmatmul.mubr.bf16.vlgmr.msra.gmra.mrb[72].mxu1 %v2176_v23 }
 0x891   :  { %2260 = vmatpush1.bf16.msra.mxu0 %v3384_v1  ;;  %2301 = vmatpush1.bf16.msra.mxu1 %v3386_v45 }
 0x892   :  { %v2529_v36 = vrot.slane %v2515_v18, %v3592_v50  ;;  %v2606_v3 = vrot.slane %v2522_v2, %v3596_v32  ;;  %v2648_v12 = vcombine.high %v2522_v2, %v2522_v2  ;;  %2261 = vmatprep.subr.bf16.mxu0 %v3390_v46  ;;  %2302 = vmatprep.subr.bf16.mxu1 %v3392_v47 }
 0x893   :  { %2291 = vmatprep.mubr.bf16.mxu0 %v4481_v0  ;;  %2332 = vmatprep.mubr.bf16.mxu1 %v4481_v0 }
 0x894   :  { %v2610_v41 = vrot.slane %v2529_v36, %v3596_v32  ;;  %v2649_v20 = vcombine.high %v2529_v36, %v2529_v36  ;;  %v4225_v1 = vrot.slane %v2648_v12, %v3596_v32  ;;  %v4229_v45 = vsel %vm2638_vm15, %v4123_v29, %v2606_v3 }
 0x895   :  { %2262 = vmatpush1.bf16.msra.mxu0 %v3400_v56  ;;  %2303 = vmatpush1.bf16.msra.mxu1 %v3402_v57 }
 0x896   :  { %v4234_v46 = vrot.slane %v2649_v20, %v3596_v32  ;;  %2263 = vmatprep.subr.bf16.mxu0 %v3406_v58  ;;  %2304 = vmatprep.subr.bf16.mxu1 %v3408_v59  ;;  %v4240_v47 = vsel %vm2638_vm15, %v4137_v8, %v2610_v41 }
 0x899   :  { %2264 = vmatpush1.bf16.msra.mxu0 %v3414_v14  ;;  %2305 = vmatpush1.bf16.msra.mxu1 %v3416_v15 }
 0x89a   :  { %2265 = vmatprep.subr.bf16.mxu0 %v4513_v19  ;;  %2306 = vmatprep.subr.bf16.mxu1 %v4514_v54 }
 0x89d   :  { %2266 = vmatpush1.bf16.msra.mxu0 %v4515_v37  ;;  %2307 = vmatpush1.bf16.msra.mxu1 %v4516_v39  ;;  %v4718_v39 = vld [vmem:[#allocation79_spill] sm:$0xff] }
 0x89e   :  { %2267 = vmatprep.subr.bf16.mxu0 %v4517_v43  ;;  %2308 = vmatprep.subr.bf16.mxu1 %v4518_v44  ;;  %v4719_v44 = vld [vmem:[#allocation80_spill] sm:$0xff] }
 0x8a1   :  { %2268 = vmatpush1.bf16.msra.mxu0 %v3438_v6  ;;  %2309 = vmatpush1.bf16.msra.mxu1 %v3440_v9 }
 0x8a2   :  { %2269 = vmatprep.subr.bf16.mxu0 %v3444_v10  ;;  %2310 = vmatprep.subr.bf16.mxu1 %v4519_v51 }
 0x8a5   :  { %2270 = vmatpush1.bf16.msra.mxu0 %v4520_v53  ;;  %2311 = vmatpush1.bf16.msra.mxu1 %v3452_v27 }
 0x8a6   :  { %2271 = vmatprep.subr.bf16.mxu0 %v3456_v28  ;;  %2312 = vmatprep.subr.bf16.mxu1 %v3458_v5 }
 0x8a9   :  { %2272 = vmatpush1.bf16.msra.mxu0 %v3462_v48  ;;  %2313 = vmatpush1.bf16.msra.mxu1 %v3464_v49  ;;  %v4716_v48 = vld [vmem:[#allocation77_spill] sm:$0xff] }
 0x8aa   :  { %2273 = vmatprep.subr.bf16.mxu0 %v3468_v52  ;;  %2314 = vmatprep.subr.bf16.mxu1 %v3470_v55  ;;  %v4717_v52 = vld [vmem:[#allocation78_spill] sm:$0xff] }
 0x8ad   :  { %2274 = vmatpush1.bf16.msra.mxu0 %v3474_v11  ;;  %2315 = vmatpush1.bf16.msra.mxu1 %v3476_v26 }
 0x8b0   :  { %2292 = vmatmul.mubr.bf16.vlgmr.msra.gmra.mrb[76].mxu0 %v2176_v23  ;;  %2333 = vmatmul.mubr.bf16.vlgmr.msra.gmra.mrb[76].mxu1 %v2176_v23 }
 0x963   :  { %v2211_v56 = vpop.f32.mrb[72].mxu0  ;;  %v2252_v57 = vpop.f32.mrb[72].mxu1 }
 0x964   :  { %v2213_v58 = vpop.f32.mrb[73].mxu0  ;;  %v2254_v59 = vpop.f32.mrb[73].mxu1 }
 0x965   :  { %v2215_v14 = vpop.f32.mrb[74].mxu0  ;;  %v2256_v15 = vpop.f32.mrb[74].mxu1 }
 0x966   :  { %v2216_v6 = vpop.f32.mrb[75].mxu0  ;;  %v2257_v9 = vpop.f32.mrb[75].mxu1 }
 0x983   :  { %v2293_v10 = vpop.f32.mrb[76].mxu0  ;;  %v2334_v27 = vpop.f32.mrb[76].mxu1 }
 0x984   :  { %v2341_v28 = vsel %vm487_vm9, %v2211_v56, %v2293_v10  ;;  %v2343_v11 = vsel %vm487_vm9, %v2252_v57, %v2334_v27  ;;  %v2295_v5 = vpop.f32.mrb[77].mxu0  ;;  %v2336_v26 = vpop.f32.mrb[77].mxu1 }
 0x985   :  { %v2345_v49 = vadd.f32 %v2341_v28, %v4716_v48  ;;  %v2347_v55 = vadd.f32 %v2343_v11, %v4717_v52  ;;  %v2342_v0 = vsel %vm487_vm9, %v2213_v58, %v2295_v5  ;;  %v2344_v19 = vsel %vm487_vm9, %v2254_v59, %v2336_v26  ;;  %v2297_v54 = vpop.f32.mrb[78].mxu0  ;;  %v2338_v37 = vpop.f32.mrb[78].mxu1 }
 0x986   :  { %v2346_v43 = vadd.f32 %v2342_v0, %v4718_v39  ;;  %v2348_v51 = vadd.f32 %v2344_v19, %v4719_v44  ;;  %v2298_v53 = vpop.f32.mrb[79].mxu0  ;;  %v2339_v29 = vpop.f32.mrb[79].mxu1 }
 0x987   :  { %v2349_v8 = vmul.f32 0.5, %v2345_v49 }
 0x988   :  { %v2353_v34 = vmul.f32 0.5, %v2346_v43  ;;  %v2358_v30 = vmul.f32 0.5, %v2348_v51 }
 0x989   :  { %3010 = vtanh.f32 %v2349_v8 }
 0x98a   :  { %3012 = vtanh.f32 %v2353_v34 }
 0x98b   :  { %3014 = vtanh.f32 %v2347_v55 }
 0x98c   :  { %3016 = vtanh.f32 %v2358_v30 }
 0x993   :  { %v3011_v24 = vpop.eup %3010 }
 0x994   :  { %v3013_v22 = vpop.eup %3012  ;;  %v2351_v60 = vmul.f32 0.5, %v3011_v24 }
 0x995   :  { %v2355_v31 = vmul.f32 0.5, %v3013_v22  ;;  %v3015_v62 = vpop.eup %3014 }
 0x996   :  { %v2352_v38 = vadd.f32 0.5, %v2351_v60  ;;  %v3017_v7 = vpop.eup %3016 }
 0x997   :  { %v2356_v21 = vadd.f32 0.5, %v2355_v31  ;;  %v2360_v16 = vmul.f32 0.5, %v3017_v7 }
 0x998   :  { %v2363_v63 = vmul.f32 %v3015_v62, %v2352_v38 }
 0x999   :  { %v2362_v4 = vmul.f32 %v2356_v21, %v4210_v13  ;;  %v2361_v35 = vadd.f32 0.5, %v2360_v16 }
 0x99b   :  { %v2364_v40 = vadd.f32 %v2363_v63, %v2362_v4 }
 0x99d   :  { %3018 = vtanh.f32 %v2364_v40  ;;  %2753 = vst [vmem:[#allocation11] sm:$0xf] %v2364_v40  }
 0x9a7   :  { %v3019_v42 = vpop.eup %3018 }
 0x9a8   :  { %v2366_v25 = vmul.f32 %v3019_v42, %v2361_v35 }
 0x9aa   :  { %v2537_v61 = vrot.slane %v2366_v25, %v3592_v50  ;;  %2750 = vst [vmem:[#allocation9] sm:$0xf] %v2366_v25  }
 0x9ab   :  { %3075 = shalt.err (!%p3072_p6)
}
 0x9ac   :  { %s3076_s15 = scalar_lea.hbm %s4365_s4, 64 }
 0x9ad   :  { %p3077_p7 = scmp.ne.s32.totalorder %s4365_s4, %s3076_s15  ;;  %p3080_p8 = scmp.lt.u32.totalorder %s3076_s15, %s4365_s4 }
 0x9af   :  { %p3082_p9 = pnand %p3080_p8, %p3077_p7 }
 0x9b1   :  { %3085 = shalt.err (!%p3082_p9)
}
 0x9b2   :  { %s3147_s19 = smov 2   ;;  %v2538_v13 = vcombine.high %v2537_v61, %v2537_v61  ;;  %v2545_v23 = vrot.slane %v2537_v61, %v3592_v50  ;;  %s3086_s21 = scalar_lea.vmem %s4277_s11, 64 }
 0x9b3   :  { %2779 = dma.vmem_to_hbm [thread:$0]  %s2774_s9, 64, %s4365_s4, [#allocation10], %s3140_s29, %s3140_s29, %s3147_s19  }
 0x9b4   :  { %p3087_p10 = scmp.ne.s32.totalorder %s4277_s11, %s3086_s21  ;;  %p3091_p11 = scmp.lt.s32.totalorder %s4277_s11, %s4277_s11 }
 0x9b5   :  { %p3092_p12 = scmp.lt.s32.totalorder %s3086_s21, %s3086_s21 }
 0x9b7   :  { %p3093_p13 = por %p3092_p12, %p3091_p11 }
 0x9b9   :  { %p3094_p0 = pnand %p3093_p13, %p3087_p10 }
 0x9bb   :  { %3097 = shalt.err (!%p3094_p0)
}
 0x9bc   :  { %s3098_s24 = scalar_lea.hbm %s4366_s5, 64 }
 0x9bd   :  { %p3099_p1 = scmp.ne.s32.totalorder %s4366_s5, %s3098_s24  ;;  %p3102_p2 = scmp.lt.u32.totalorder %s3098_s24, %s4366_s5 }
 0x9bf   :  { %p3104_p3 = pnand %p3102_p2, %p3099_p1 }
 0x9c1   :  { %3107 = shalt.err (!%p3104_p3)
}
 0x9c2   :  { %2791 = dma.vmem_to_hbm [thread:$0]  %s4277_s11, 64, %s4366_s5, [#allocation10], %s3140_s29, %s3140_s29, %s3147_s19   ;;  %vm2641_vm0 = vcmask 1046528   ;;  %v2552_v18 = vrot.slane %v2538_v13, %v3592_v50  ;;  %v2616_v2 = vrot.slane %v2545_v23, %v3596_v32  ;;  %v2644_v36 = vcombine.high %v2545_v23, %v2545_v23  ;;  %v4720_v58 = vld [vmem:[#allocation51_spill] sm:$0xff]  ;;  %v4725_v9 = vld [vmem:[#allocation45_spill] sm:$0xff]  ;;  %v4726_v27 = vld [vmem:[#allocation48_spill] sm:$0xff] }
 0x9c3   :  { %v4723_v15 = vld [vmem:[#allocation47_spill] sm:$0xff]  ;;  %s3148_s5 = smov [#allocation8]   ;;  %v4727_v28 = vld [vmem:[#allocation81_spill] sm:$0xff]  ;;  %v4728_v5 = vld [vmem:[#allocation46_spill] sm:$0xff] }
 0x9c4   :  { %v2620_v3 = vrot.slane %v2552_v18, %v3596_v32  ;;  %v2645_v12 = vcombine.high %v2552_v18, %v2552_v18  ;;  %v2732_v41 = vsel %vm2623_vm10, %v2644_v36, %v4225_v1  ;;  %v2642_v20 = vsel %vm2641_vm0, %v4229_v45, %v2616_v2  ;;  %v4721_v1 = vld [vmem:[#allocation49_spill] sm:$0xff]  ;;  %v4722_v45 = vld [vmem:[#allocation52_spill] sm:$0xff]  ;;  %s2761_s29 = sshll.u32 %s3148_s5, 4  ;;  %v4729_v48 = vld [vmem:[#allocation82_spill] sm:$0xff]  ;;  %s2762_s29 = int_to_ptr.vmem [resolvable:$true] %s2761_s29 }
 0x9c5   :  { %v2734_v56 = vsel %vm2626_vm11, %v2732_v41, %v4126_v33  ;;  %2746 = vst [vmem:[#allocation8] sm:$0xff] %v2642_v20  ;;  %s3108_s6 = scalar_lea.vmem %s2762_s29, 512  ;;  %p3113_p5 = scmp.lt.s32.totalorder %s2762_s29, %s2762_s29 }
 0x9c6   :  { %v2733_v57 = vsel %vm2623_vm10, %v2645_v12, %v4234_v46  ;;  %v2643_v50 = vsel %vm2641_vm0, %v4240_v47, %v2620_v3  ;;  %v2736_v32 = vsel %vm2629_vm12, %v2734_v56, %v4720_v58  ;;  %v4724_v46 = vld [vmem:[#allocation50_spill] sm:$0xff]  ;;  %p3109_p4 = scmp.ne.s32.totalorder %s2762_s29, %s3108_s6  ;;  %p3114_p6 = scmp.lt.s32.totalorder %s3108_s6, %s3108_s6 }
 0x9c7   :  { %v2735_v59 = vsel %vm2626_vm11, %v2733_v57, %v4131_v17  ;;  %v2738_v14 = vsel %vm2632_vm13, %v2736_v32, %v4721_v1  ;;  %2748 = vst [vmem:[#allocation8 + $0x10] sm:$0xff] %v2643_v50 }
 0x9c8   :  { %v2737_v33 = vsel %vm2629_vm12, %v2735_v59, %v4722_v45  ;;  %v2740_v6 = vsel %vm2635_vm14, %v2738_v14, %v4723_v15  ;;  %p3115_p7 = por %p3114_p6, %p3113_p5 }
 0x9c9   :  { %v2739_v47 = vsel %vm2632_vm13, %v2737_v33, %v4724_v46  ;;  %v2742_v10 = vsel %vm2638_vm15, %v2740_v6, %v4725_v9 }
 0x9ca   :  { %v2741_v17 = vsel %vm2635_vm14, %v2739_v47, %v4726_v27  ;;  %v2744_v11 = vsel %vm2641_vm0, %v2742_v10, %v4727_v28  ;;  %p3116_p8 = pnand %p3115_p7, %p3109_p4 }
 0x9cb   :  { %v2743_v26 = vsel %vm2638_vm15, %v2741_v17, %v4728_v5  ;;  %2747 = vst [vmem:[#allocation8 + $0x8] sm:$0xff] %v2744_v11 }
 0x9cc   :  { %v2745_v49 = vsel %vm2641_vm0, %v2743_v26, %v4729_v48 }
 0x9cd   :  { %2749 = vst [vmem:[#allocation8 + $0x18] sm:$0xff] %v2745_v49 }
 0x9ce   :  { %3119 = shalt.err (!%p3116_p8)
}
 0x9cf   :  { %s3120_s0 = scalar_lea.hbm %s4364_s3, 512 }
 0x9d0   :  { %p3121_p9 = scmp.ne.s32.totalorder %s4364_s3, %s3120_s0  ;;  %p3124_p10 = scmp.lt.u32.totalorder %s3120_s0, %s4364_s3 }
 0x9d2   :  { %p3126_p11 = pnand %p3124_p10, %p3121_p9 }
 0x9d4   :  { %3129 = shalt.err (!%p3126_p11)
}
 0x9d5   :  { %s3149_s13 = smov 256   ;;  %s3150_s14 = smov 16  }
 0x9d6   :  { %2767 = dma.vmem_to_hbm [thread:$0]  %s2762_s29, 512, %s4364_s3, [#allocation5], %s3149_s13, %s3149_s13, %s3150_s14  }
 0x9d7   :  { %3134 = dma.done.wait [#allocation5], 512  }
 0x9d8   :  { %3135 = vsyncadd [#allocation5], 4294966784 }
 0x9d9   :  { %3136 = dma.done.wait [#allocation10], 128  }
 0x9da   :  { %3137 = vsyncadd [#allocation10], 4294967168 }
 0x9db   :  { %2801 = vsyncpa [#allocation4], 1 }
 0x9dc   :  { %2802 = vsyncpa [#allocation7], 1 }
 0x9dd   :  { %2803 = vsyncpa [#allocation5], 1 }
 0x9de   :  { %2804 = vsyncpa [#allocation10], 1 }

</bundles_post_ra>
